<compile_context>
chip_gen: v5e
topology: v5e:2x2
jax: 0.10.0
libtpu: 0.0.40
codegen_flags: <defaults>
</compile_context>

<pallas_src>
import functools

import jax
import jax.numpy as jnp
from jax.experimental import pallas as pl
from jax.experimental.pallas import tpu as pltpu

NEG_SLOPE = 0.01     # torch F.leaky_relu default
LANE = 128


def _round_up(n, m):
    return ((n + m - 1) // m) * m


def _leaky(x):
    return jnp.where(x >= 0, x, NEG_SLOPE * x)


# ---------------------------------------------------------------------------
# Fused decoder kernel: 5 matmuls + activations + eval-mode BN, one batch tile.
# ---------------------------------------------------------------------------
def _decoder_kernel(x_ref, w3_ref, b3_ref, w4_ref, b4_ref,
                    m3_ref, c3_ref, s3_ref, t3_ref,
                    m4_ref, c4_ref, m5_ref, c5_ref,
                    out_ref, *, compute_dtype):
    f32 = jnp.float32

    # linear_3 + leaky_relu
    h = jnp.dot(x_ref[...].astype(compute_dtype), w3_ref[...],
                preferred_element_type=f32) + b3_ref[...]
    h = _leaky(h)

    # linear_4 + leaky_relu
    h = jnp.dot(h.astype(compute_dtype), w4_ref[...],
                preferred_element_type=f32) + b4_ref[...]
    h = _leaky(h)

    # fm_conv_3 (unrolled ConvTranspose2d) + leaky_relu + bn3 (eval affine)
    h = jnp.dot(h.astype(compute_dtype), m3_ref[...],
                preferred_element_type=f32) + c3_ref[...]
    h = _leaky(h)
    h = h * s3_ref[...] + t3_ref[...]

    # fm_conv_4 (unrolled ConvTranspose2d) + leaky_relu
    h = jnp.dot(h.astype(compute_dtype), m4_ref[...],
                preferred_element_type=f32) + c4_ref[...]
    h = _leaky(h)

    # fm_conv_5 (unrolled ConvTranspose2d) + relu
    h = jnp.dot(h.astype(compute_dtype), m5_ref[...],
                preferred_element_type=f32) + c5_ref[...]
    out_ref[...] = jnp.maximum(h, 0.0).astype(out_ref.dtype)


# ---------------------------------------------------------------------------
# Wrapper-side weight transforms
# ---------------------------------------------------------------------------
def _convT_as_matrix(weight, stride, h, w):
    """Unroll torch ConvTranspose2d weight (Cin,Cout,kh,kw) into a dense operator.

    Returns M of shape (Cin*h*w, Cout*OH*OW) such that
      flatten(convT(x)) = flatten(x) @ M     (channel-major row-major flatten),
    which matches torch's .view() memory layout exactly.
    """
    cin, cout, kh, kw = weight.shape
    OH = (h - 1) * stride + kh
    OW = (w - 1) * stride + kw
    ci, ih, iw, co, r, c = jnp.meshgrid(
        jnp.arange(cin), jnp.arange(h), jnp.arange(w),
        jnp.arange(cout), jnp.arange(kh), jnp.arange(kw), indexing="ij")
    rows = (ci * h + ih) * w + iw
    cols = (co * OH + ih * stride + r) * OW + (iw * stride + c)
    vals = weight[ci, co, r, c]
    M = jnp.zeros((cin * h * w, cout * OH * OW), jnp.float32)
    M = M.at[rows.reshape(-1), cols.reshape(-1)].set(vals.reshape(-1))
    return M, OH, OW


def _pad2(a, rows, cols):
    return jnp.pad(a, ((0, rows - a.shape[0]), (0, cols - a.shape[1])))


# ---------------------------------------------------------------------------
# Forward
# ---------------------------------------------------------------------------
def representation_decoder_forward(x, params, config, *, b_tile=None,
                                   compute_dtype=jnp.bfloat16):
    R = config["representation_size"]
    KP = config["num_keypoints"]
    C = config["channels"]
    H = config["height"]
    W = config["width"]

    N, SF, KPb, Rx = x.shape
    assert Rx == R
    B = N * SF * KPb

    h3 = H // 4 - 1
    w3s = W // 4 - 1
    d0, d1 = R, 2 * R
    d2 = KP * h3 * w3s

    # --- unroll the conv-transpose stack into dense operators (weight prep) ---
    M3, o3h, o3w = _convT_as_matrix(params["conv3_w"], 2, h3, w3s)   # (d2, d3)
    M4, o4h, o4w = _convT_as_matrix(params["conv4_w"], 2, o3h, o3w)  # (d3, d4)
    M5, o5h, o5w = _convT_as_matrix(params["conv5_w"], 1, o4h, o4w)  # (d4, d5)
    d3, d4, d5 = M3.shape[1], M4.shape[1], M5.shape[1]
    assert (o5h, o5w) == (H, W) and d5 == C * H * W

    # per-channel biases -> flattened (channel-major) bias vectors
    c3 = jnp.repeat(params["conv3_b"].astype(jnp.float32), o3h * o3w)
    c4 = jnp.repeat(params["conv4_b"].astype(jnp.float32), o4h * o4w)
    c5 = jnp.repeat(params["conv5_b"].astype(jnp.float32), o5h * o5w)

    # bn3 (eval mode) folded into per-column scale / shift
    if config["batch_norm"]:
        inv = params["bn3_gamma"] / jnp.sqrt(params["bn3_var"] + 1e-5)
        s3 = jnp.repeat(inv.astype(jnp.float32), o3h * o3w)
        t3 = jnp.repeat((params["bn3_beta"] - params["bn3_mean"] * inv)
                        .astype(jnp.float32), o3h * o3w)
    else:
        s3 = jnp.ones((d3,), jnp.float32)
        t3 = jnp.zeros((d3,), jnp.float32)

    # --- pad every matmul dim to a multiple of 128 (lane-dense, unmasked vst) ---
    p0, p1, p2, p3, p4, p5 = (_round_up(d, LANE) for d in (d0, d1, d2, d3, d4, d5))

    def prep_w(m, rows, cols):                       # weights -> bf16, padded
        return _pad2(m.astype(jnp.float32), rows, cols).astype(compute_dtype)

    def prep_v(v, cols):                             # bias / bn rows -> f32, padded
        return _pad2(v.astype(jnp.float32)[None, :], 1, cols)

    w3p = prep_w(params["lin3_w"].T, p0, p1)         # (R, 2R) padded
    w4p = prep_w(params["lin4_w"].T, p1, p2)         # (2R, d2) padded
    m3p = prep_w(M3, p2, p3)
    m4p = prep_w(M4, p3, p4)
    m5p = prep_w(M5, p4, p5)
    b3p = prep_v(params["lin3_b"], p1)
    b4p = prep_v(params["lin4_b"], p2)
    c3p = prep_v(c3, p3)
    s3p = prep_v(s3, p3)
    t3p = prep_v(t3, p3)
    c4p = prep_v(c4, p4)
    c5p = prep_v(c5, p5)

    # --- batch tiling ---
    if b_tile is None:
        b_tile = min(512, _round_up(B, 8))           # fits v7x's smaller VMEM too
    b_tile = _round_up(b_tile, 8)
    B_pad = _round_up(B, b_tile)

    x2 = x.astype(jnp.float32).reshape(B, R)
    x_pad = jnp.pad(x2, ((0, B_pad - B), (0, p0 - R)))

    kernel = functools.partial(_decoder_kernel, compute_dtype=compute_dtype)

    out = pl.pallas_call(
        kernel,
        out_shape=jax.ShapeDtypeStruct((B_pad, p5), jnp.float32),
        grid_spec=pltpu.PrefetchScalarGridSpec(
            num_scalar_prefetch=0,
            grid=(B_pad // b_tile,),
            in_specs=[
                pl.BlockSpec((b_tile, p0), lambda i: (i, 0)),   # x tile
                pl.BlockSpec((p0, p1), lambda i: (0, 0)),       # lin3 W
                pl.BlockSpec((1, p1), lambda i: (0, 0)),        # lin3 b
                pl.BlockSpec((p1, p2), lambda i: (0, 0)),       # lin4 W
                pl.BlockSpec((1, p2), lambda i: (0, 0)),        # lin4 b
                pl.BlockSpec((p2, p3), lambda i: (0, 0)),       # convT3 operator
                pl.BlockSpec((1, p3), lambda i: (0, 0)),        # convT3 bias
                pl.BlockSpec((1, p3), lambda i: (0, 0)),        # bn3 scale
                pl.BlockSpec((1, p3), lambda i: (0, 0)),        # bn3 shift
                pl.BlockSpec((p3, p4), lambda i: (0, 0)),       # convT4 operator
                pl.BlockSpec((1, p4), lambda i: (0, 0)),        # convT4 bias
                pl.BlockSpec((p4, p5), lambda i: (0, 0)),       # convT5 operator
                pl.BlockSpec((1, p5), lambda i: (0, 0)),        # convT5 bias
            ],
            out_specs=pl.BlockSpec((b_tile, p5), lambda i: (i, 0)),
        ),
        compiler_params=pltpu.CompilerParams(
            dimension_semantics=("parallel",),
            vmem_limit_bytes=32 * 1024 * 1024,
        ),
    )(x_pad, w3p, b3p, w4p, b4p, m3p, c3p, s3p, t3p, m4p, c4p, m5p, c5p)

    out = out[:B, :d5].reshape(N, SF, KPb, C, H, W)
    return out


# ---------------------------------------------------------------------------
# Deterministic parameter init (mirrors the torch __init__ shapes / normal_ init)
# ---------------------------------------------------------------------------
def init_params(key, config):
    R = config["representation_size"]
    KP = config["num_keypoints"]
    C = config["channels"]
    H = config["height"]
    W = config["width"]
    d2 = KP * (H // 4 - 1) * (W // 4 - 1)

    ks = jax.random.split(key, 10)

    def u(k, shape, fan_in):
        b = 1.0 / (fan_in ** 0.5)
        return jax.random.uniform(k, shape, jnp.float32, -b, b)

    return {
        "lin3_w": jax.random.normal(ks[0], (2 * R, R), jnp.float32),
        "lin3_b": u(ks[1], (2 * R,), R),
        "lin4_w": jax.random.normal(ks[2], (d2, 2 * R), jnp.float32),
        "lin4_b": u(ks[3], (d2,), 2 * R),
        "conv3_w": jax.random.normal(ks[4], (KP, 2 * KP, 3, 3), jnp.float32),
        "conv3_b": u(ks[5], (2 * KP,), KP * 9),
        "conv4_w": jax.random.normal(ks[6], (2 * KP, C, 3, 3), jnp.float32),
        "conv4_b": u(ks[7], (C,), 2 * KP * 9),
        "conv5_w": u(ks[8], (C, C, 2, 2), C * 4),
        "conv5_b": u(ks[9], (C,), C * 4),
        "bn3_gamma": jnp.ones((2 * KP,), jnp.float32),
        "bn3_beta": jnp.zeros((2 * KP,), jnp.float32),
        "bn3_mean": jnp.zeros((2 * KP,), jnp.float32),
        "bn3_var": jnp.ones((2 * KP,), jnp.float32),
    }


if __name__ == "__main__":
    config = {
        "representation_size": 8,
        "num_keypoints": 2,
        "batch_norm": True,
        "width": 16,
        "height": 16,
        "channels": 3,
    }
    key = jax.random.PRNGKey(0)
    pkey, xkey = jax.random.split(key)
    params = init_params(pkey, config)

    N, SF = 2, 2
    x = jax.random.normal(
        xkey, (N, SF, config["num_keypoints"], config["representation_size"]),
        jnp.float32)

    out = representation_decoder_forward(x, params, config)
    out = jax.block_until_ready(out)

    assert out.shape == (N, SF, config["num_keypoints"], config["channels"],
                         config["height"], config["width"])
    assert bool(jnp.all(jnp.isfinite(out)))
    assert bool(jnp.all(out >= 0.0))   # final ReLU
    print("KERNEL_OK")
</pallas_src>

<mosaic_0001>
module attributes {stable_mosaic.version = 11 : i64} {
  func.func @_decoder_kernel(%arg0: i32, %arg1: memref<8x128xf32, #tpu.memory_space<vmem>>, %arg2: memref<128x128xbf16, #tpu.memory_space<vmem>>, %arg3: memref<1x128xf32, #tpu.memory_space<vmem>>, %arg4: memref<128x128xbf16, #tpu.memory_space<vmem>>, %arg5: memref<1x128xf32, #tpu.memory_space<vmem>>, %arg6: memref<128x256xbf16, #tpu.memory_space<vmem>>, %arg7: memref<1x256xf32, #tpu.memory_space<vmem>>, %arg8: memref<1x256xf32, #tpu.memory_space<vmem>>, %arg9: memref<1x256xf32, #tpu.memory_space<vmem>>, %arg10: memref<256x768xbf16, #tpu.memory_space<vmem>>, %arg11: memref<1x768xf32, #tpu.memory_space<vmem>>, %arg12: memref<768x768xbf16, #tpu.memory_space<vmem>>, %arg13: memref<1x768xf32, #tpu.memory_space<vmem>>, %arg14: memref<8x768xf32, #tpu.memory_space<vmem>>) attributes {dimension_semantics = [#tpu.dimension_semantics<parallel>], iteration_bounds = array<i64: 1>, scalar_prefetch = 0 : i64, scratch_operands = 0 : i64, tpu.core_type = #tpu.core_type<tc>, window_params = [{transform_indices = @transform_0, window_bounds = array<i64: 8, 128>}, {pipeline_mode = #tpu.pipeline_mode<synchronous>, transform_indices = @transform_1, window_bounds = array<i64: 128, 128>}, {pipeline_mode = #tpu.pipeline_mode<synchronous>, transform_indices = @transform_2, window_bounds = array<i64: 1, 128>}, {pipeline_mode = #tpu.pipeline_mode<synchronous>, transform_indices = @transform_3, window_bounds = array<i64: 128, 128>}, {pipeline_mode = #tpu.pipeline_mode<synchronous>, transform_indices = @transform_4, window_bounds = array<i64: 1, 128>}, {pipeline_mode = #tpu.pipeline_mode<synchronous>, transform_indices = @transform_5, window_bounds = array<i64: 128, 256>}, {pipeline_mode = #tpu.pipeline_mode<synchronous>, transform_indices = @transform_6, window_bounds = array<i64: 1, 256>}, {pipeline_mode = #tpu.pipeline_mode<synchronous>, transform_indices = @transform_7, window_bounds = array<i64: 1, 256>}, {pipeline_mode = #tpu.pipeline_mode<synchronous>, transform_indices = @transform_8, window_bounds = array<i64: 1, 256>}, {pipeline_mode = #tpu.pipeline_mode<synchronous>, transform_indices = @transform_9, window_bounds = array<i64: 256, 768>}, {pipeline_mode = #tpu.pipeline_mode<synchronous>, transform_indices = @transform_10, window_bounds = array<i64: 1, 768>}, {pipeline_mode = #tpu.pipeline_mode<synchronous>, transform_indices = @transform_11, window_bounds = array<i64: 768, 768>}, {pipeline_mode = #tpu.pipeline_mode<synchronous>, transform_indices = @transform_12, window_bounds = array<i64: 1, 768>}, {transform_indices = @transform_13, window_bounds = array<i64: 8, 768>}]} {
    %c0 = arith.constant 0 : index
    %c0_0 = arith.constant 0 : index
    %0 = vector.load %arg1[%c0, %c0_0] : memref<8x128xf32, #tpu.memory_space<vmem>>, vector<8x128xf32>
    %1 = arith.truncf %0 : vector<8x128xf32> to vector<8x128xbf16>
    %c0_1 = arith.constant 0 : index
    %c0_2 = arith.constant 0 : index
    %2 = vector.load %arg2[%c0_1, %c0_2] : memref<128x128xbf16, #tpu.memory_space<vmem>>, vector<128x128xbf16>
    %cst = arith.constant dense<0.000000e+00> : vector<8x128xf32>
    %3 = tpu.matmul %1, %2, %cst {dimension_numbers = #tpu.dot_dimension_numbers<[1], [0], [0], [1], [0, 0, 1, 1], [], []>} : vector<8x128xbf16>, vector<128x128xbf16>, vector<8x128xf32> -> vector<8x128xf32>
    %c0_3 = arith.constant 0 : index
    %c0_4 = arith.constant 0 : index
    %4 = vector.load %arg3[%c0_3, %c0_4] : memref<1x128xf32, #tpu.memory_space<vmem>>, vector<1x128xf32>
    %5 = vector.broadcast %4 : vector<1x128xf32> to vector<8x128xf32>
    %6 = arith.addf %3, %5 : vector<8x128xf32>
    %cst_5 = arith.constant 0.000000e+00 : f32
    %7 = vector.broadcast %cst_5 : f32 to vector<8x128xf32>
    %8 = arith.cmpf oge, %6, %7 : vector<8x128xf32>
    %cst_6 = arith.constant 0.00999999977 : f32
    %9 = vector.broadcast %cst_6 : f32 to vector<8x128xf32>
    %10 = arith.mulf %9, %6 : vector<8x128xf32>
    %11 = arith.select %8, %6, %10 : vector<8x128xi1>, vector<8x128xf32>
    %12 = arith.truncf %11 : vector<8x128xf32> to vector<8x128xbf16>
    %c0_7 = arith.constant 0 : index
    %c0_8 = arith.constant 0 : index
    %13 = vector.load %arg4[%c0_7, %c0_8] : memref<128x128xbf16, #tpu.memory_space<vmem>>, vector<128x128xbf16>
    %cst_9 = arith.constant dense<0.000000e+00> : vector<8x128xf32>
    %14 = tpu.matmul %12, %13, %cst_9 {dimension_numbers = #tpu.dot_dimension_numbers<[1], [0], [0], [1], [0, 0, 1, 1], [], []>} : vector<8x128xbf16>, vector<128x128xbf16>, vector<8x128xf32> -> vector<8x128xf32>
    %c0_10 = arith.constant 0 : index
    %c0_11 = arith.constant 0 : index
    %15 = vector.load %arg5[%c0_10, %c0_11] : memref<1x128xf32, #tpu.memory_space<vmem>>, vector<1x128xf32>
    %16 = vector.broadcast %15 : vector<1x128xf32> to vector<8x128xf32>
    %17 = arith.addf %14, %16 : vector<8x128xf32>
    %cst_12 = arith.constant 0.000000e+00 : f32
    %18 = vector.broadcast %cst_12 : f32 to vector<8x128xf32>
    %19 = arith.cmpf oge, %17, %18 : vector<8x128xf32>
    %cst_13 = arith.constant 0.00999999977 : f32
    %20 = vector.broadcast %cst_13 : f32 to vector<8x128xf32>
    %21 = arith.mulf %20, %17 : vector<8x128xf32>
    %22 = arith.select %19, %17, %21 : vector<8x128xi1>, vector<8x128xf32>
    %23 = arith.truncf %22 : vector<8x128xf32> to vector<8x128xbf16>
    %c0_14 = arith.constant 0 : index
    %c0_15 = arith.constant 0 : index
    %24 = vector.load %arg6[%c0_14, %c0_15] : memref<128x256xbf16, #tpu.memory_space<vmem>>, vector<128x256xbf16>
    %cst_16 = arith.constant dense<0.000000e+00> : vector<8x256xf32>
    %25 = tpu.matmul %23, %24, %cst_16 {dimension_numbers = #tpu.dot_dimension_numbers<[1], [0], [0], [1], [0, 0, 1, 1], [], []>} : vector<8x128xbf16>, vector<128x256xbf16>, vector<8x256xf32> -> vector<8x256xf32>
    %c0_17 = arith.constant 0 : index
    %c0_18 = arith.constant 0 : index
    %26 = vector.load %arg7[%c0_17, %c0_18] : memref<1x256xf32, #tpu.memory_space<vmem>>, vector<1x256xf32>
    %27 = vector.broadcast %26 : vector<1x256xf32> to vector<8x256xf32>
    %28 = arith.addf %25, %27 : vector<8x256xf32>
    %cst_19 = arith.constant 0.000000e+00 : f32
    %29 = vector.broadcast %cst_19 : f32 to vector<8x256xf32>
    %30 = arith.cmpf oge, %28, %29 : vector<8x256xf32>
    %cst_20 = arith.constant 0.00999999977 : f32
    %31 = vector.broadcast %cst_20 : f32 to vector<8x256xf32>
    %32 = arith.mulf %31, %28 : vector<8x256xf32>
    %33 = arith.select %30, %28, %32 : vector<8x256xi1>, vector<8x256xf32>
    %c0_21 = arith.constant 0 : index
    %c0_22 = arith.constant 0 : index
    %34 = vector.load %arg8[%c0_21, %c0_22] : memref<1x256xf32, #tpu.memory_space<vmem>>, vector<1x256xf32>
    %35 = vector.broadcast %34 : vector<1x256xf32> to vector<8x256xf32>
    %36 = arith.mulf %33, %35 : vector<8x256xf32>
    %c0_23 = arith.constant 0 : index
    %c0_24 = arith.constant 0 : index
    %37 = vector.load %arg9[%c0_23, %c0_24] : memref<1x256xf32, #tpu.memory_space<vmem>>, vector<1x256xf32>
    %38 = vector.broadcast %37 : vector<1x256xf32> to vector<8x256xf32>
    %39 = arith.addf %36, %38 : vector<8x256xf32>
    %40 = arith.truncf %39 : vector<8x256xf32> to vector<8x256xbf16>
    %c0_25 = arith.constant 0 : index
    %c0_26 = arith.constant 0 : index
    %41 = vector.load %arg10[%c0_25, %c0_26] : memref<256x768xbf16, #tpu.memory_space<vmem>>, vector<256x768xbf16>
    %cst_27 = arith.constant dense<0.000000e+00> : vector<8x768xf32>
    %42 = tpu.matmul %40, %41, %cst_27 {dimension_numbers = #tpu.dot_dimension_numbers<[1], [0], [0], [1], [0, 0, 1, 1], [], []>} : vector<8x256xbf16>, vector<256x768xbf16>, vector<8x768xf32> -> vector<8x768xf32>
    %c0_28 = arith.constant 0 : index
    %c0_29 = arith.constant 0 : index
    %43 = vector.load %arg11[%c0_28, %c0_29] : memref<1x768xf32, #tpu.memory_space<vmem>>, vector<1x768xf32>
    %44 = vector.broadcast %43 : vector<1x768xf32> to vector<8x768xf32>
    %45 = arith.addf %42, %44 : vector<8x768xf32>
    %cst_30 = arith.constant 0.000000e+00 : f32
    %46 = vector.broadcast %cst_30 : f32 to vector<8x768xf32>
    %47 = arith.cmpf oge, %45, %46 : vector<8x768xf32>
    %cst_31 = arith.constant 0.00999999977 : f32
    %48 = vector.broadcast %cst_31 : f32 to vector<8x768xf32>
    %49 = arith.mulf %48, %45 : vector<8x768xf32>
    %50 = arith.select %47, %45, %49 : vector<8x768xi1>, vector<8x768xf32>
    %51 = arith.truncf %50 : vector<8x768xf32> to vector<8x768xbf16>
    %c0_32 = arith.constant 0 : index
    %c0_33 = arith.constant 0 : index
    %52 = vector.load %arg12[%c0_32, %c0_33] : memref<768x768xbf16, #tpu.memory_space<vmem>>, vector<768x768xbf16>
    %cst_34 = arith.constant dense<0.000000e+00> : vector<8x768xf32>
    %53 = tpu.matmul %51, %52, %cst_34 {dimension_numbers = #tpu.dot_dimension_numbers<[1], [0], [0], [1], [0, 0, 1, 1], [], []>} : vector<8x768xbf16>, vector<768x768xbf16>, vector<8x768xf32> -> vector<8x768xf32>
    %c0_35 = arith.constant 0 : index
    %c0_36 = arith.constant 0 : index
    %54 = vector.load %arg13[%c0_35, %c0_36] : memref<1x768xf32, #tpu.memory_space<vmem>>, vector<1x768xf32>
    %55 = vector.broadcast %54 : vector<1x768xf32> to vector<8x768xf32>
    %56 = arith.addf %53, %55 : vector<8x768xf32>
    %cst_37 = arith.constant 0.000000e+00 : f32
    %57 = vector.broadcast %cst_37 : f32 to vector<8x768xf32>
    %58 = arith.maximumf %56, %57 : vector<8x768xf32>
    %c0_38 = arith.constant 0 : index
    %c0_39 = arith.constant 0 : index
    %59 = vector.load %arg14[%c0_38, %c0_39] : memref<8x768xf32, #tpu.memory_space<vmem>>, vector<8x768xf32>
    tpu.vector_store %arg14[%c0_38, %c0_39], %58 {strides = array<i32>} : memref<8x768xf32, #tpu.memory_space<vmem>>, vector<8x768xf32>,
    return
  }
  func.func @transform_0(%arg0: i32) -> (i32, i32) {
    %c0_i32 = arith.constant 0 : i32
    %c0_i32_0 = arith.constant 0 : i32
    return %arg0, %c0_i32 : i32, i32
  }
  func.func @transform_1(%arg0: i32) -> (i32, i32) {
    %c0_i32 = arith.constant 0 : i32
    %c0_i32_0 = arith.constant 0 : i32
    %c0_i32_1 = arith.constant 0 : i32
    return %c0_i32, %c0_i32_0 : i32, i32
  }
  func.func @transform_2(%arg0: i32) -> (i32, i32) {
    %c0_i32 = arith.constant 0 : i32
    %c0_i32_0 = arith.constant 0 : i32
    %c0_i32_1 = arith.constant 0 : i32
    return %c0_i32, %c0_i32_0 : i32, i32
  }
  func.func @transform_3(%arg0: i32) -> (i32, i32) {
    %c0_i32 = arith.constant 0 : i32
    %c0_i32_0 = arith.constant 0 : i32
    %c0_i32_1 = arith.constant 0 : i32
    return %c0_i32, %c0_i32_0 : i32, i32
  }
  func.func @transform_4(%arg0: i32) -> (i32, i32) {
    %c0_i32 = arith.constant 0 : i32
    %c0_i32_0 = arith.constant 0 : i32
    %c0_i32_1 = arith.constant 0 : i32
    return %c0_i32, %c0_i32_0 : i32, i32
  }
  func.func @transform_5(%arg0: i32) -> (i32, i32) {
    %c0_i32 = arith.constant 0 : i32
    %c0_i32_0 = arith.constant 0 : i32
    %c0_i32_1 = arith.constant 0 : i32
    return %c0_i32, %c0_i32_0 : i32, i32
  }
  func.func @transform_6(%arg0: i32) -> (i32, i32) {
    %c0_i32 = arith.constant 0 : i32
    %c0_i32_0 = arith.constant 0 : i32
    %c0_i32_1 = arith.constant 0 : i32
    return %c0_i32, %c0_i32_0 : i32, i32
  }
  func.func @transform_7(%arg0: i32) -> (i32, i32) {
    %c0_i32 = arith.constant 0 : i32
    %c0_i32_0 = arith.constant 0 : i32
    %c0_i32_1 = arith.constant 0 : i32
    return %c0_i32, %c0_i32_0 : i32, i32
  }
  func.func @transform_8(%arg0: i32) -> (i32, i32) {
    %c0_i32 = arith.constant 0 : i32
    %c0_i32_0 = arith.constant 0 : i32
    %c0_i32_1 = arith.constant 0 : i32
    return %c0_i32, %c0_i32_0 : i32, i32
  }
  func.func @transform_9(%arg0: i32) -> (i32, i32) {
    %c0_i32 = arith.constant 0 : i32
    %c0_i32_0 = arith.constant 0 : i32
    %c0_i32_1 = arith.constant 0 : i32
    return %c0_i32, %c0_i32_0 : i32, i32
  }
  func.func @transform_10(%arg0: i32) -> (i32, i32) {
    %c0_i32 = arith.constant 0 : i32
    %c0_i32_0 = arith.constant 0 : i32
    %c0_i32_1 = arith.constant 0 : i32
    return %c0_i32, %c0_i32_0 : i32, i32
  }
  func.func @transform_11(%arg0: i32) -> (i32, i32) {
    %c0_i32 = arith.constant 0 : i32
    %c0_i32_0 = arith.constant 0 : i32
    %c0_i32_1 = arith.constant 0 : i32
    return %c0_i32, %c0_i32_0 : i32, i32
  }
  func.func @transform_12(%arg0: i32) -> (i32, i32) {
    %c0_i32 = arith.constant 0 : i32
    %c0_i32_0 = arith.constant 0 : i32
    %c0_i32_1 = arith.constant 0 : i32
    return %c0_i32, %c0_i32_0 : i32, i32
  }
  func.func @transform_13(%arg0: i32) -> (i32, i32) {
    %c0_i32 = arith.constant 0 : i32
    %c0_i32_0 = arith.constant 0 : i32
    return %arg0, %c0_i32 : i32, i32
  }
}

</mosaic_0001>

<bundles_post_ra>
// kernel: tpu_custom_call.1
= control target key start
LH: loop header
LB: loop body
LE: loop exit
PB: predicated region body
PF: predicated region fallthrough
CT: control target
= control target key end

     0   :  { %18 = vsyncpa [#allocation3], 0  ;;  %s6254_s0 = inlined_call_operand.hbm [shape: f32[8,128], index: 0, kind: input, shape index: {}]   ;;  %s6255_s1 = inlined_call_operand.hbm [shape: bf16[128,128], index: 1, kind: input, shape index: {}]   ;;  %s6256_s2 = inlined_call_operand.hbm [shape: f32[1,128], index: 2, kind: input, shape index: {}]   ;;  %s6257_s3 = inlined_call_operand.hbm [shape: bf16[128,128], index: 3, kind: input, shape index: {}]   ;;  %s6258_s4 = inlined_call_operand.hbm [shape: f32[1,128], index: 4, kind: input, shape index: {}]   ;;  %s6259_s5 = inlined_call_operand.hbm [shape: bf16[128,256], index: 5, kind: input, shape index: {}]   ;;  %s6260_s6 = inlined_call_operand.hbm [shape: f32[1,256], index: 6, kind: input, shape index: {}]   ;;  %s6261_s7 = inlined_call_operand.hbm [shape: f32[1,256], index: 7, kind: input, shape index: {}]   ;;  %s6262_s8 = inlined_call_operand.hbm [shape: f32[1,256], index: 8, kind: input, shape index: {}]   ;;  %s6263_s9 = inlined_call_operand.hbm [shape: bf16[256,768], index: 9, kind: input, shape index: {}]   ;;  %s6264_s10 = inlined_call_operand.hbm [shape: f32[1,768], index: 10, kind: input, shape index: {}]   ;;  %s6265_s11 = inlined_call_operand.hbm [shape: bf16[768,768], index: 11, kind: input, shape index: {}]   ;;  %s6266_s12 = inlined_call_operand.hbm [shape: f32[1,768], index: 12, kind: input, shape index: {}]   ;;  %s6267_s13 = inlined_call_operand.hbm [shape: f32[8,768], index: 13, kind: output, shape index: {}]  }
   0x1   :  { %19 = vsyncpa [#allocation6], 0 }
   0x2   :  { %20 = vsyncpa [#allocation9], 0 }
   0x3   :  { %21 = vsyncpa [#allocation12], 0 }
   0x4   :  { %22 = vsyncpa [#allocation15], 0 }
   0x5   :  { %23 = vsyncpa [#allocation18], 0 }
   0x6   :  { %24 = vsyncpa [#allocation21], 0  ;;  %s41_s27 = sshll.u32 %s6255_s1, 4  ;;  %s42_s27 = int_to_ptr.hbm [resolvable:$true] %s41_s27 }
   0x7   :  { %25 = vsyncpa [#allocation4], 0  ;;  %s6024_s28 = smov [#allocation5]   ;;  %s65_s15 = sshll.u32 %s6257_s3, 4  ;;  %s66_s15 = int_to_ptr.hbm [resolvable:$true] %s65_s15 }
   0x8   :  { %s43_s29 = sshll.u32 %s6024_s28, 4  ;;  %s6025_s16 = smov 64   ;;  %s44_s29 = int_to_ptr.vmem [resolvable:$true] %s43_s29 }
   0x9   :  { %s6026_s17 = smov 4   ;;  %s6027_s18 = smov [#allocation8]  }
   0xa   :  { %49 = dma.hbm_to_vmem [thread:$0]  %s42_s27, 1024, %s44_s29, [#allocation6], %s6025_s16, %s6025_s16, %s6026_s17  }
   0xb   :  { %s67_s19 = sshll.u32 %s6027_s18, 4  ;;  %s89_s22 = sshll.u32 %s6259_s5, 4  ;;  %s68_s19 = int_to_ptr.vmem [resolvable:$true] %s67_s19  ;;  %s90_s22 = int_to_ptr.hbm [resolvable:$true] %s89_s22 }
   0xc   :  { %73 = dma.hbm_to_vmem [thread:$0]  %s66_s15, 1024, %s68_s19, [#allocation9], %s6025_s16, %s6025_s16, %s6026_s17  }
   0xd   :  { %s6028_s1 = smov [#allocation11]   ;;  %s114_s3 = sshll.u32 %s6261_s7, 4  ;;  %s115_s3 = int_to_ptr.hbm [resolvable:$true] %s114_s3 }
   0xe   :  { %s91_s23 = sshll.u32 %s6028_s1, 4  ;;  %s6029_s26 = smov 128   ;;  %s92_s23 = int_to_ptr.vmem [resolvable:$true] %s91_s23 }
   0xf   :  { %s6030_s28 = smov 8   ;;  %s6031_s27 = smov [#allocation14]  }
  0x10   :  { %97 = dma.hbm_to_vmem [thread:$0]  %s90_s22, 2048, %s92_s23, [#allocation12], %s6029_s26, %s6029_s26, %s6030_s28  }
  0x11   :  { %s116_s29 = sshll.u32 %s6031_s27, 4  ;;  %s135_s5 = sshll.u32 %s6263_s9, 4  ;;  %s117_s29 = int_to_ptr.vmem [resolvable:$true] %s116_s29  ;;  %s136_s5 = int_to_ptr.hbm [resolvable:$true] %s135_s5 }
  0x12   :  { %119 = dma.hbm_to_vmem [thread:$0]  %s115_s3, 32, %s117_s29, [#allocation15]  }
  0x13   :  { %s6032_s15 = smov [#allocation17]   ;;  %s159_s7 = sshll.u32 %s6265_s11, 4  ;;  %s160_s7 = int_to_ptr.hbm [resolvable:$true] %s159_s7 }
  0x14   :  { %s137_s16 = sshll.u32 %s6032_s15, 4  ;;  %s6033_s19 = smov 384   ;;  %s138_s16 = int_to_ptr.vmem [resolvable:$true] %s137_s16 }
  0x15   :  { %s6034_s20 = smov 24   ;;  %s6035_s21 = smov [#allocation20]  }
  0x16   :  { %143 = dma.hbm_to_vmem [thread:$0]  %s136_s5, 12288, %s138_s16, [#allocation18], %s6033_s19, %s6033_s19, %s6034_s20  }
  0x17   :  { %s161_s22 = sshll.u32 %s6035_s21, 4  ;;  %s31_s9 = sshll.u32 %s6254_s0, 4  ;;  %s162_s22 = int_to_ptr.vmem [resolvable:$true] %s161_s22  ;;  %s32_s9 = int_to_ptr.hbm [resolvable:$true] %s31_s9 }
  0x18   :  { %167 = dma.hbm_to_vmem [thread:$0]  %s160_s7, 36864, %s162_s22, [#allocation21], %s6033_s19, %s6033_s19, %s6034_s20  }
  0x19   :  { %s55_s3 = sshll.u32 %s6256_s2, 4  ;;  %s6036_s26 = smov [#allocation2]   ;;  %s56_s3 = int_to_ptr.hbm [resolvable:$true] %s55_s3 }
  0x1a   :  { %s33_s28 = sshll.u32 %s6036_s26, 4  ;;  %s6037_s11 = smov [#allocation7]   ;;  %s34_s28 = int_to_ptr.vmem [resolvable:$true] %s33_s28 }
  0x1b   :  { %36 = dma.hbm_to_vmem [thread:$0]  %s32_s9, 128, %s34_s28, [#allocation3]  }
  0x1c   :  { %s57_s27 = sshll.u32 %s6037_s11, 4  ;;  %s79_s14 = sshll.u32 %s6258_s4, 4  ;;  %s58_s27 = int_to_ptr.vmem [resolvable:$true] %s57_s27  ;;  %s80_s14 = int_to_ptr.hbm [resolvable:$true] %s79_s14 }
  0x1d   :  { %60 = dma.hbm_to_vmem [thread:$0]  %s56_s3, 16, %s58_s27, [#allocation6]  }
  0x1e   :  { %s103_s15 = sshll.u32 %s6260_s6, 4  ;;  %s6038_s16 = smov [#allocation10]   ;;  %s104_s15 = int_to_ptr.hbm [resolvable:$true] %s103_s15 }
  0x1f   :  { %s81_s2 = sshll.u32 %s6038_s16, 4  ;;  %s6039_s17 = smov [#allocation13]   ;;  %s82_s2 = int_to_ptr.vmem [resolvable:$true] %s81_s2 }
  0x20   :  { %84 = dma.hbm_to_vmem [thread:$0]  %s80_s14, 16, %s82_s2, [#allocation9]  }
  0x21   :  { %s105_s18 = sshll.u32 %s6039_s17, 4  ;;  %s125_s20 = sshll.u32 %s6262_s8, 4  ;;  %s106_s18 = int_to_ptr.vmem [resolvable:$true] %s105_s18  ;;  %s126_s20 = int_to_ptr.hbm [resolvable:$true] %s125_s20 }
  0x22   :  { %108 = dma.hbm_to_vmem [thread:$0]  %s104_s15, 32, %s106_s18, [#allocation12]  }
  0x23   :  { %s149_s22 = sshll.u32 %s6264_s10, 4  ;;  %s6040_s1 = smov [#allocation16]   ;;  %s150_s22 = int_to_ptr.hbm [resolvable:$true] %s149_s22 }
  0x24   :  { %s127_s6 = sshll.u32 %s6040_s1, 4  ;;  %s6041_s23 = smov [#allocation19]   ;;  %s128_s6 = int_to_ptr.vmem [resolvable:$true] %s127_s6 }
  0x25   :  { %130 = dma.hbm_to_vmem [thread:$0]  %s126_s20, 32, %s128_s6, [#allocation15]  }
  0x26   :  { %s151_s9 = sshll.u32 %s6041_s23, 4  ;;  %s173_s3 = sshll.u32 %s6266_s12, 4  ;;  %s152_s9 = int_to_ptr.vmem [resolvable:$true] %s151_s9  ;;  %s174_s3 = int_to_ptr.hbm [resolvable:$true] %s173_s3 }
  0x27   :  { %154 = dma.hbm_to_vmem [thread:$0]  %s150_s22, 96, %s152_s9, [#allocation18]  }
  0x28   :  { %s6042_s8 = smov [#allocation22]  }
  0x29   :  { %s175_s26 = sshll.u32 %s6042_s8, 4  ;;  %s176_s26 = int_to_ptr.vmem [resolvable:$true] %s175_s26 }
  0x2a   :  { %178 = dma.hbm_to_vmem [thread:$0]  %s174_s3, 96, %s176_s26, [#allocation21]  }
  0x2b   :  { %6008 = dma.done.wait [#allocation3], 128  }
  0x2c   :  { %6009 = vsyncadd [#allocation3], 4294967168 }
  0x2d   :  { %6010 = dma.done.wait [#allocation6], 1040  }
  0x2e   :  { %6011 = vsyncadd [#allocation6], 4294966256 }
  0x2f   :  { %6012 = dma.done.wait [#allocation9], 1040  }
  0x30   :  { %6013 = vsyncadd [#allocation9], 4294966256 }
  0x31   :  { %6014 = dma.done.wait [#allocation12], 2080  }
  0x32   :  { %6015 = vsyncadd [#allocation12], 4294965216 }
  0x33   :  { %6016 = dma.done.wait [#allocation15], 64  }
  0x34   :  { %6017 = vsyncadd [#allocation15], 4294967232 }
  0x35   :  { %6018 = dma.done.wait [#allocation18], 12384  }
  0x36   :  { %6019 = vsyncadd [#allocation18], 4294954912 }
  0x37   :  { %6020 = dma.done.wait [#allocation21], 36960  }
  0x38   :  { %6021 = vsyncadd [#allocation21], 4294930336  ;;  %v5241_v0 = vld [vmem:[#allocation5 + $0x38] sm:$0xff]  ;;  %v5240_v1 = vld [vmem:[#allocation5 + $0x30] sm:$0xff]  ;;  %s6043_s10 = smov [#allocation23]   ;;  %s3554_s27 = sshll.u32 %s6267_s13, 4  ;;  %s3555_s27 = int_to_ptr.hbm [resolvable:$true] %s3554_s27 }
  0x39   :  { %301 = vmatpush.bf16.msra.mxu0 %v5241_v0  ;;  %v5249_v2 = vld [vmem:[#allocation8 + $0x38] sm:$0xff]  ;;  %v5248_v3 = vld [vmem:[#allocation8 + $0x30] sm:$0xff]  ;;  %v5239_v4 = vld [vmem:[#allocation5 + $0x28] sm:$0xff]  ;;  %s3552_s12 = sshll.u32 %s6043_s10, 4  ;;  %s3553_s12 = int_to_ptr.vmem [resolvable:$true] %s3552_s12 }
  0x3a   :  { %386 = vmatpush.bf16.msra.mxu1 %v5249_v2  ;;  %v5247_v5 = vld [vmem:[#allocation8 + $0x28] sm:$0xff]  ;;  %v5238_v6 = vld [vmem:[#allocation5 + $0x20] sm:$0xff]  ;;  %v5237_v8 = vld [vmem:[#allocation5 + $0x18] sm:$0xff] }
  0x3b   :  { %v5246_v7 = vld [vmem:[#allocation8 + $0x20] sm:$0xff]  ;;  %v5245_v9 = vld [vmem:[#allocation8 + $0x18] sm:$0xff]  ;;  %v5236_v10 = vld [vmem:[#allocation5 + $0x10] sm:$0xff] }
  0x3c   :  { %v5244_v11 = vld [vmem:[#allocation8 + $0x10] sm:$0xff]  ;;  %v5235_v12 = vld [vmem:[#allocation5 + $0x8] sm:$0xff]  ;;  %v5234_v13 = vld [vmem:[#allocation5] sm:$0xff] }
  0x3d   :  { %302 = vmatpush.bf16.msra.mxu0 %v5240_v1  ;;  %v231_v14 = vld [vmem:[#allocation2] sm:$0xff]  ;;  %v5243_v16 = vld [vmem:[#allocation8 + $0x8] sm:$0xff]  ;;  %v5242_v17 = vld [vmem:[#allocation8] sm:$0xff] }
  0x3e   :  { %387 = vmatpush.bf16.msra.mxu1 %v5248_v3  ;;  %v232_v15 = vpack.c.bf16 %v231_v14, %v231_v14  ;;  %v3692_v18 = vld [vmem:[#allocation11 + $0x70] sm:$0xf]  ;;  %v5265_v19 = vld [vmem:[#allocation11 + $0x74] sm:$0xf0]  ;;  %v5264_v20 = vld [vmem:[#allocation11 + $0x74] sm:$0xf] }
  0x3f   :  { %v3693_v21 = vor.u32 %v5265_v19, %v3692_v18  ;;  %v3694_v22 = vld [vmem:[#allocation11 + $0x78] sm:$0xf0]  ;;  %v3684_v23 = vld [vmem:[#allocation11 + $0x60] sm:$0xf]  ;;  %v5263_v24 = vld [vmem:[#allocation11 + $0x64] sm:$0xf0] }
  0x40   :  { %v3697_v25 = vor.u32 %v5264_v20, %v3694_v22  ;;  %v5262_v26 = vld [vmem:[#allocation11 + $0x64] sm:$0xf]  ;;  %v3686_v27 = vld [vmem:[#allocation11 + $0x68] sm:$0xf0]  ;;  %v3685_v28 = vor.u32 %v5263_v24, %v3684_v23  ;;  %v3676_v30 = vld [vmem:[#allocation11 + $0x50] sm:$0xf] }
  0x41   :  { %303 = vmatpush.bf16.msra.mxu0 %v5239_v4  ;;  %505 = vmatpush.bf16.msra.mxu2 %v3693_v21  ;;  %v3689_v29 = vor.u32 %v5262_v26, %v3686_v27  ;;  %v5261_v31 = vld [vmem:[#allocation11 + $0x54] sm:$0xf0]  ;;  %v5260_v32 = vld [vmem:[#allocation11 + $0x54] sm:$0xf]  ;;  %v3678_v33 = vld [vmem:[#allocation11 + $0x58] sm:$0xf0] }
  0x42   :  { %388 = vmatpush.bf16.msra.mxu1 %v5247_v5  ;;  %518 = vmatpush.bf16.msra.mxu3 %v3697_v25  ;;  %v3677_v34 = vor.u32 %v5261_v31, %v3676_v30  ;;  %v3681_v35 = vor.u32 %v5260_v32, %v3678_v33  ;;  %v3668_v36 = vld [vmem:[#allocation11 + $0x40] sm:$0xf]  ;;  %v5259_v37 = vld [vmem:[#allocation11 + $0x44] sm:$0xf0]  ;;  %v5258_v38 = vld [vmem:[#allocation11 + $0x44] sm:$0xf] }
  0x43   :  { %v3670_v39 = vld [vmem:[#allocation11 + $0x48] sm:$0xf0]  ;;  %v3669_v40 = vor.u32 %v5259_v37, %v3668_v36  ;;  %v3660_v42 = vld [vmem:[#allocation11 + $0x30] sm:$0xf]  ;;  %v5257_v43 = vld [vmem:[#allocation11 + $0x34] sm:$0xf0] }
  0x44   :  { %v3673_v41 = vor.u32 %v5258_v38, %v3670_v39  ;;  %v5256_v44 = vld [vmem:[#allocation11 + $0x34] sm:$0xf]  ;;  %v3662_v45 = vld [vmem:[#allocation11 + $0x38] sm:$0xf0]  ;;  %v3661_v46 = vor.u32 %v5257_v43, %v3660_v42  ;;  %v3652_v48 = vld [vmem:[#allocation11 + $0x20] sm:$0xf] }
  0x45   :  { %304 = vmatpush.bf16.msra.mxu0 %v5238_v6  ;;  %506 = vmatpush.bf16.msra.mxu2 %v3685_v28  ;;  %v3665_v47 = vor.u32 %v5256_v44, %v3662_v45  ;;  %v5255_v49 = vld [vmem:[#allocation11 + $0x24] sm:$0xf0]  ;;  %v5254_v50 = vld [vmem:[#allocation11 + $0x24] sm:$0xf]  ;;  %v3654_v51 = vld [vmem:[#allocation11 + $0x28] sm:$0xf0] }
  0x46   :  { %389 = vmatpush.bf16.msra.mxu1 %v5246_v7  ;;  %519 = vmatpush.bf16.msra.mxu3 %v3689_v29  ;;  %v3653_v52 = vor.u32 %v5255_v49, %v3652_v48  ;;  %v3657_v53 = vor.u32 %v5254_v50, %v3654_v51  ;;  %v5670_v54 = vld [vmem:[#allocation7] ss:$0 sm:$0xff]  ;;  %v3644_v61 = vld [vmem:[#allocation11 + $0x10] sm:$0xf]  ;;  %v5253_v62 = vld [vmem:[#allocation11 + $0x14] sm:$0xf0] }
  0x47   :  { %v5252_v63 = vld [vmem:[#allocation11 + $0x14] sm:$0xf]  ;;  %v3645_v0 = vor.u32 %v5253_v62, %v3644_v61  ;;  %v3646_v1 = vld [vmem:[#allocation11 + $0x18] sm:$0xf0]  ;;  %v3636_v3 = vld [vmem:[#allocation11] sm:$0xf] }
  0x48   :  { %v3649_v2 = vor.u32 %v5252_v63, %v3646_v1  ;;  %v5251_v4 = vld [vmem:[#allocation11 + $0x4] sm:$0xf0]  ;;  %v5250_v5 = vld [vmem:[#allocation11 + $0x4] sm:$0xf]  ;;  %v3638_v7 = vld [vmem:[#allocation11 + $0x8] sm:$0xf0] }
  0x49   :  { %305 = vmatpush.bf16.msra.mxu0 %v5237_v8  ;;  %507 = vmatpush.bf16.msra.mxu2 %v3677_v34  ;;  %v3637_v6 = vor.u32 %v5251_v4, %v3636_v3  ;;  %v3641_v8 = vor.u32 %v5250_v5, %v3638_v7  ;;  %v5308_v14 = vld [vmem:[#allocation17 + $0x154] sm:$0xf]  ;;  %v4062_v19 = vld [vmem:[#allocation17 + $0x2e8] sm:$0xf0]  ;;  %v3844_v20 = vld [vmem:[#allocation17 + $0x120] sm:$0xf] }
  0x4a   :  { %390 = vmatpush.bf16.msra.mxu1 %v5245_v9  ;;  %520 = vmatpush.bf16.msra.mxu3 %v3681_v35  ;;  %v3868_v9 = vld [vmem:[#allocation17 + $0x150] sm:$0xf]  ;;  %v5356_v18 = vld [vmem:[#allocation17 + $0x2d4] sm:$0xf]  ;;  %v5305_v22 = vld [vmem:[#allocation17 + $0x134] sm:$0xf0] }
  0x4b   :  { %v4065_v21 = vor.u32 %v5356_v18, %v4062_v19  ;;  %v4036_v23 = vld [vmem:[#allocation17 + $0x2a0] sm:$0xf]  ;;  %v5353_v24 = vld [vmem:[#allocation17 + $0x2b4] sm:$0xf0]  ;;  %v3845_v25 = vor.u32 %v5305_v22, %v3844_v20  ;;  %v5302_v27 = vld [vmem:[#allocation17 + $0x124] sm:$0xf] }
  0x4c   :  { %v4037_v26 = vor.u32 %v5353_v24, %v4036_v23  ;;  %v3846_v28 = vld [vmem:[#allocation17 + $0x138] sm:$0xf0]  ;;  %v5350_v29 = vld [vmem:[#allocation17 + $0x2a4] sm:$0xf]  ;;  %v3820_v32 = vld [vmem:[#allocation17 + $0xf0] sm:$0xf] }
  0x4d   :  { %306 = vmatpush.bf16.msra.mxu0 %v5236_v10  ;;  %508 = vmatpush.bf16.msra.mxu2 %v3669_v40  ;;  %v5311_v10 = vld [vmem:[#allocation17 + $0x164] sm:$0xf0]  ;;  %v3849_v30 = vor.u32 %v5302_v27, %v3846_v28  ;;  %v4038_v31 = vld [vmem:[#allocation17 + $0x2b8] sm:$0xf0]  ;;  %v4012_v35 = vld [vmem:[#allocation17 + $0x270] sm:$0xf] }
  0x4e   :  { %391 = vmatpush.bf16.msra.mxu1 %v5244_v11  ;;  %521 = vmatpush.bf16.msra.mxu3 %v3673_v41  ;;  %v4060_v11 = vld [vmem:[#allocation17 + $0x2d0] sm:$0xf]  ;;  %v5299_v33 = vld [vmem:[#allocation17 + $0x104] sm:$0xf0]  ;;  %v4041_v34 = vor.u32 %v5350_v29, %v4038_v31  ;;  %v5296_v37 = vld [vmem:[#allocation17 + $0xf4] sm:$0xf] }
  0x4f   :  { %v5347_v36 = vld [vmem:[#allocation17 + $0x284] sm:$0xf0]  ;;  %v3821_v38 = vor.u32 %v5299_v33, %v3820_v32  ;;  %v3822_v39 = vld [vmem:[#allocation17 + $0x108] sm:$0xf0]  ;;  %v5344_v40 = vld [vmem:[#allocation17 + $0x274] sm:$0xf] }
  0x50   :  { %v4014_v41 = vld [vmem:[#allocation17 + $0x288] sm:$0xf0]  ;;  %v4013_v42 = vor.u32 %v5347_v36, %v4012_v35  ;;  %v3825_v43 = vor.u32 %v5296_v37, %v3822_v39  ;;  %v3796_v44 = vld [vmem:[#allocation17 + $0xc0] sm:$0xf]  ;;  %v5293_v45 = vld [vmem:[#allocation17 + $0xd4] sm:$0xf0] }
  0x51   :  { %307 = vmatpush.bf16.msra.mxu0 %v5235_v12  ;;  %509 = vmatpush.bf16.msra.mxu2 %v3661_v46  ;;  %v3869_v12 = vor.u32 %v5311_v10, %v3868_v9  ;;  %v3988_v46 = vld [vmem:[#allocation17 + $0x240] sm:$0xf]  ;;  %v5341_v48 = vld [vmem:[#allocation17 + $0x254] sm:$0xf0]  ;;  %v5290_v49 = vld [vmem:[#allocation17 + $0xc4] sm:$0xf] }
  0x52   :  { %392 = vmatpush.bf16.msra.mxu1 %v5243_v16  ;;  %522 = vmatpush.bf16.msra.mxu3 %v3665_v47  ;;  %v4017_v47 = vor.u32 %v5344_v40, %v4014_v41  ;;  %v3798_v50 = vld [vmem:[#allocation17 + $0xd8] sm:$0xf0]  ;;  %v5338_v51 = vld [vmem:[#allocation17 + $0x244] sm:$0xf]  ;;  %v5284_v61 = vld [vmem:[#allocation17 + $0x94] sm:$0xf] }
  0x53   :  { %v3774_v62 = vld [vmem:[#allocation17 + $0xa8] sm:$0xf0]  ;;  %v5332_v63 = vld [vmem:[#allocation17 + $0x214] sm:$0xf]  ;;  %v3748_v4 = vld [vmem:[#allocation17 + $0x60] sm:$0xf] }
  0x54   :  { %v3777_v3 = vor.u32 %v5284_v61, %v3774_v62  ;;  %v5281_v5 = vld [vmem:[#allocation17 + $0x74] sm:$0xf0]  ;;  %v5278_v9 = vld [vmem:[#allocation17 + $0x64] sm:$0xf]  ;;  %v3750_v10 = vld [vmem:[#allocation17 + $0x78] sm:$0xf0] }
  0x55   :  { %308 = vmatpush.bf16.msra.mxu0 %v5234_v13  ;;  %510 = vmatpush.bf16.msra.mxu2 %v3653_v52  ;;  %v5359_v13 = vld [vmem:[#allocation17 + $0x2e4] sm:$0xf0]  ;;  %v3990_v52 = vld [vmem:[#allocation17 + $0x258] sm:$0xf0]  ;;  %v3916_v19 = vld [vmem:[#allocation17 + $0x1b0] sm:$0xf] }
  0x56   :  { %393 = vmatpush.bf16.msra.mxu1 %v5242_v17  ;;  %523 = vmatpush.bf16.msra.mxu3 %v3657_v53  ;;  %v4061_v16 = vor.u32 %v5359_v13, %v4060_v11  ;;  %v3797_v53 = vor.u32 %v5293_v45, %v3796_v44  ;;  %v5326_v11 = vld [vmem:[#allocation17 + $0x1e4] sm:$0xf]  ;;  %v5671_v13 = vld [vmem:[#allocation10] ss:$0 sm:$0xff]  ;;  %v5275_v18 = vld [vmem:[#allocation17 + $0x44] sm:$0xf0] }
  0x57   :  { %v5272_v22 = vld [vmem:[#allocation17 + $0x34] sm:$0xf]  ;;  %v3726_v23 = vld [vmem:[#allocation17 + $0x48] sm:$0xf0]  ;;  %v3700_v27 = vld [vmem:[#allocation17] sm:$0xf] }
  0x58   :  { %309 = vmatmul.bf16.vlgmr.msra.gmra.mxu0 %v232_v15  ;;  %v3870_v15 = vld [vmem:[#allocation17 + $0x168] sm:$0xf0]  ;;  %v5320_v24 = vld [vmem:[#allocation17 + $0x1b4] sm:$0xf]  ;;  %v5269_v31 = vld [vmem:[#allocation17 + $0x14] sm:$0xf0] }
  0x59   :  { %511 = vmatpush.bf16.msra.mxu2 %v3645_v0  ;;  %v3873_v17 = vor.u32 %v5308_v14, %v3870_v15  ;;  %1145 = vmatpush.bf16.msrb.mxu0 %v3869_v12  ;;  %v3966_v0 = vld [vmem:[#allocation17 + $0x228] sm:$0xf0]  ;;  %v3942_v12 = vld [vmem:[#allocation17 + $0x1f8] sm:$0xf0]  ;;  %v3749_v14 = vor.u32 %v5281_v5, %v3748_v4  ;;  %v3892_v32 = vld [vmem:[#allocation17 + $0x180] sm:$0xf] }
  0x5a   :  { %524 = vmatpush.bf16.msra.mxu3 %v3649_v2  ;;  %1158 = vmatpush.bf16.msrb.mxu1 %v4061_v16  ;;  %v3969_v7 = vor.u32 %v5332_v63, %v3966_v0  ;;  %v3753_v16 = vor.u32 %v5278_v9, %v3750_v10  ;;  %v3945_v20 = vor.u32 %v5326_v11, %v3942_v12  ;;  %v5317_v33 = vld [vmem:[#allocation17 + $0x194] sm:$0xf0]  ;;  %v5266_v36 = vld [vmem:[#allocation17 + $0x4] sm:$0xf]  ;;  %v3702_v37 = vld [vmem:[#allocation17 + $0x18] sm:$0xf0] }
  0x5b   :  { %v3894_v39 = vld [vmem:[#allocation17 + $0x198] sm:$0xf0]  ;;  %v3876_v40 = vld [vmem:[#allocation17 + $0x158] sm:$0xf]  ;;  %v5312_v41 = vld [vmem:[#allocation17 + $0x16c] sm:$0xf0] }
  0x5c   :  { %v4068_v44 = vld [vmem:[#allocation17 + $0x2d8] sm:$0xf]  ;;  %v5360_v45 = vld [vmem:[#allocation17 + $0x2ec] sm:$0xf0]  ;;  %v5354_v63 = vld [vmem:[#allocation17 + $0x2bc] sm:$0xf0] }
  0x5d   :  { %512 = vmatpush.bf16.msra.mxu2 %v3637_v6  ;;  %1146 = vmatpush.bf16.msrb.mxu0 %v3845_v25  ;;  %v3940_v6 = vld [vmem:[#allocation17 + $0x1e0] sm:$0xf]  ;;  %v3918_v25 = vld [vmem:[#allocation17 + $0x1c8] sm:$0xf0]  ;;  %v4020_v9 = vld [vmem:[#allocation17 + $0x278] sm:$0xf] }
  0x5e   :  { %525 = vmatpush.bf16.msra.mxu3 %v3641_v8  ;;  %1159 = vmatpush.bf16.msrb.mxu1 %v4037_v26  ;;  %v5329_v8 = vld [vmem:[#allocation17 + $0x1f4] sm:$0xf0]  ;;  %v3921_v35 = vor.u32 %v5320_v24, %v3918_v25  ;;  %v5303_v0 = vld [vmem:[#allocation17 + $0x12c] sm:$0xf]  ;;  %v5348_v11 = vld [vmem:[#allocation17 + $0x28c] sm:$0xf0] }
  0x5f   :  { %v3941_v15 = vor.u32 %v5329_v8, %v3940_v6  ;;  %v5300_v8 = vld [vmem:[#allocation17 + $0x10c] sm:$0xf0]  ;;  %v5297_v12 = vld [vmem:[#allocation17 + $0xfc] sm:$0xf]  ;;  %v5291_v24 = vld [vmem:[#allocation17 + $0xcc] sm:$0xf] }
  0x60   :  { %v3806_v25 = vld [vmem:[#allocation17 + $0xe0] sm:$0xf0] }
  0x61   :  { %1171 = vmatpush.bf16.msrb.mxu2 %v3873_v17  ;;  %1147 = vmatpush.bf16.msrb.mxu0 %v3821_v38  ;;  %v3724_v17 = vld [vmem:[#allocation17 + $0x30] sm:$0xf]  ;;  %v5314_v38 = vld [vmem:[#allocation17 + $0x184] sm:$0xf] }
  0x62   :  { %1184 = vmatpush.bf16.msrb.mxu3 %v4065_v21  ;;  %1160 = vmatpush.bf16.msrb.mxu1 %v4013_v42  ;;  %v5323_v21 = vld [vmem:[#allocation17 + $0x1c4] sm:$0xf0]  ;;  %v3725_v26 = vor.u32 %v5275_v18, %v3724_v17  ;;  %v4021_v17 = vor.u32 %v5348_v11, %v4020_v9  ;;  %v5267_v9 = vld [vmem:[#allocation17 + $0xc] sm:$0xf] }
  0x63   :  { %v3917_v29 = vor.u32 %v5323_v21, %v3916_v19  ;;  %v3804_v19 = vld [vmem:[#allocation17 + $0xc8] sm:$0xf] }
  0x64   :  { %v3996_v21 = vld [vmem:[#allocation17 + $0x248] sm:$0xf] }
  0x65   :  { %1172 = vmatpush.bf16.msrb.mxu2 %v3849_v30  ;;  %1148 = vmatpush.bf16.msrb.mxu0 %v3797_v53  ;;  %v3729_v30 = vor.u32 %v5272_v22, %v3726_v23  ;;  %v5342_v23 = vld [vmem:[#allocation17 + $0x25c] sm:$0xf0] }
  0x66   :  { %1185 = vmatpush.bf16.msrb.mxu3 %v4041_v34 }
  0x69   :  { %1173 = vmatpush.bf16.msrb.mxu2 %v3825_v43  ;;  %v3701_v43 = vor.u32 %v5269_v31, %v3700_v27  ;;  %v3998_v27 = vld [vmem:[#allocation17 + $0x260] sm:$0xf0] }
  0x6a   :  { %1186 = vmatpush.bf16.msrb.mxu3 %v4017_v47  ;;  %v3878_v47 = vld [vmem:[#allocation17 + $0x170] sm:$0xf0] }
  0xd5   :  { %v310_v55 = vpop.f32.mrf.mxu0 }
  0xd6   :  { %v311_v56 = vadd.f32 %v5670_v54, %v310_v55  ;;  %v3989_v54 = vor.u32 %v5341_v48, %v3988_v46  ;;  %v3801_v55 = vor.u32 %v5290_v49, %v3798_v50  ;;  %v5309_v46 = vld [vmem:[#allocation17 + $0x15c] sm:$0xf]  ;;  %v3893_v49 = vor.u32 %v5317_v33, %v3892_v32  ;;  %v3780_v32 = vld [vmem:[#allocation17 + $0x98] sm:$0xf]  ;;  %v5288_v33 = vld [vmem:[#allocation17 + $0xac] sm:$0xf0] }
  0xd7   :  { %v3705_v50 = vor.u32 %v5266_v36, %v3702_v37  ;;  %v5336_v36 = vld [vmem:[#allocation17 + $0x22c] sm:$0xf0]  ;;  %v5285_v37 = vld [vmem:[#allocation17 + $0x9c] sm:$0xf] }
  0xd8   :  { %v315_v57 = vmul.f32 0.01, %v311_v56  ;;  %vm314_vm0 = vcmp.ge.f32.partialorder %v311_v56, 0.0  ;;  %1161 = vmatpush.bf16.msrb.mxu1 %v3989_v54  ;;  %1174 = vmatpush.bf16.msrb.mxu2 %v3801_v55  ;;  %v3897_v54 = vor.u32 %v5314_v38, %v3894_v39  ;;  %v3877_v55 = vor.u32 %v5312_v41, %v3876_v40  ;;  %v3782_v38 = vld [vmem:[#allocation17 + $0xb0] sm:$0xf0] }
  0xd9   :  { %v3785_v40 = vor.u32 %v5285_v37, %v3782_v38  ;;  %v5333_v41 = vld [vmem:[#allocation17 + $0x21c] sm:$0xf]  ;;  %v4076_v37 = vld [vmem:[#allocation17 + $0x2e0] sm:$0xf]  ;;  %v5361_v38 = vld [vmem:[#allocation17 + $0x2f4] sm:$0xf0] }
  0xda   :  { %v316_v58 = vsel %vm314_vm0, %v311_v56, %v315_v57  ;;  %v3772_v56 = vld [vmem:[#allocation17 + $0x90] sm:$0xf]  ;;  %v5287_v57 = vld [vmem:[#allocation17 + $0xa4] sm:$0xf0] }
  0xdb   :  { %v317_v59 = vpack.c.bf16 %v316_v58, %v316_v58  ;;  %v3964_v58 = vld [vmem:[#allocation17 + $0x210] sm:$0xf]  ;;  %v3773_v1 = vor.u32 %v5287_v57, %v3772_v56  ;;  %v4069_v56 = vor.u32 %v5360_v45, %v4068_v44  ;;  %v3881_v57 = vor.u32 %v5309_v46, %v3878_v47  ;;  %v3756_v44 = vld [vmem:[#allocation17 + $0x68] sm:$0xf]  ;;  %v5282_v45 = vld [vmem:[#allocation17 + $0x7c] sm:$0xf0] }
  0xdc   :  { %1175 = vmatpush.bf16.msrb.mxu2 %v3777_v3  ;;  %v4046_v3 = vld [vmem:[#allocation17 + $0x2c0] sm:$0xf0]  ;;  %v3948_v46 = vld [vmem:[#allocation17 + $0x1e8] sm:$0xf]  ;;  %v3757_v47 = vor.u32 %v5282_v45, %v3756_v44  ;;  %v3886_v44 = vld [vmem:[#allocation17 + $0x178] sm:$0xf0] }
  0xdd   :  { %v312_v60 = vpop.f32.mrf.mxu0  ;;  %394 = vmatmul.bf16.vlgmr.msra.gmra.mxu1 %v317_v59  ;;  %v3993_v59 = vor.u32 %v5338_v51, %v3990_v52  ;;  %1149 = vmatpush.bf16.msrb.mxu0 %v3773_v1  ;;  %v5357_v51 = vld [vmem:[#allocation17 + $0x2dc] sm:$0xf]  ;;  %v4070_v52 = vld [vmem:[#allocation17 + $0x2f0] sm:$0xf0]  ;;  %v3854_v1 = vld [vmem:[#allocation17 + $0x140] sm:$0xf0] }
  0xde   :  { %v5335_v60 = vld [vmem:[#allocation17 + $0x224] sm:$0xf0]  ;;  %v4073_v62 = vor.u32 %v5357_v51, %v4070_v52  ;;  %v3857_v6 = vor.u32 %v5303_v0, %v3854_v1  ;;  %v5321_v0 = vld [vmem:[#allocation17 + $0x1bc] sm:$0xf]  ;;  %v5358_v45 = vld [vmem:[#allocation17 + $0x2e4] sm:$0xf] }
  0xdf   :  { %v3965_v2 = vor.u32 %v5335_v60, %v3964_v58  ;;  %1187 = vmatpush.bf16.msrb.mxu3 %v3993_v59  ;;  %v3852_v58 = vld [vmem:[#allocation17 + $0x128] sm:$0xf]  ;;  %v5306_v59 = vld [vmem:[#allocation17 + $0x13c] sm:$0xf0] }
  0xe0   :  { %1176 = vmatpush.bf16.msrb.mxu2 %v3753_v16  ;;  %v4044_v60 = vld [vmem:[#allocation17 + $0x2a8] sm:$0xf]  ;;  %v3853_v4 = vor.u32 %v5306_v59, %v3852_v58  ;;  %v3924_v59 = vld [vmem:[#allocation17 + $0x1b8] sm:$0xf] }
  0xe1   :  { %1162 = vmatpush.bf16.msrb.mxu1 %v3965_v2  ;;  %1150 = vmatpush.bf16.msrb.mxu0 %v3749_v14  ;;  %v5351_v2 = vld [vmem:[#allocation17 + $0x2ac] sm:$0xf]  ;;  %v4045_v5 = vor.u32 %v5354_v63, %v4044_v60  ;;  %v5345_v14 = vld [vmem:[#allocation17 + $0x27c] sm:$0xf]  ;;  %v5324_v60 = vld [vmem:[#allocation17 + $0x1cc] sm:$0xf0] }
  0xe2   :  { %v4049_v10 = vor.u32 %v5351_v2, %v4046_v3  ;;  %v3734_v63 = vld [vmem:[#allocation17 + $0x50] sm:$0xf0] }
  0xe3   :  { %1188 = vmatpush.bf16.msrb.mxu3 %v3969_v7  ;;  %v3828_v7 = vld [vmem:[#allocation17 + $0xf8] sm:$0xf]  ;;  %v3926_v2 = vld [vmem:[#allocation17 + $0x1d0] sm:$0xf0] }
  0xe4   :  { %1177 = vmatpush.bf16.msrb.mxu2 %v3729_v30  ;;  %v3829_v16 = vor.u32 %v5300_v8, %v3828_v7  ;;  %v3809_v30 = vor.u32 %v5291_v24, %v3806_v25  ;;  %v3929_v3 = vor.u32 %v5321_v0, %v3926_v2  ;;  %v5318_v8 = vld [vmem:[#allocation17 + $0x19c] sm:$0xf0]  ;;  %v5301_v0 = vld [vmem:[#allocation17 + $0x114] sm:$0xf0] }
  0xe5   :  { %1163 = vmatpush.bf16.msrb.mxu1 %v3941_v15  ;;  %1151 = vmatpush.bf16.msrb.mxu0 %v3725_v26  ;;  %v4022_v15 = vld [vmem:[#allocation17 + $0x290] sm:$0xf0]  ;;  %v5339_v26 = vld [vmem:[#allocation17 + $0x24c] sm:$0xf] }
  0xe6   :  { %v4025_v22 = vor.u32 %v5345_v14, %v4022_v15  ;;  %v4001_v31 = vor.u32 %v5339_v26, %v3998_v27  ;;  %v3902_v14 = vld [vmem:[#allocation17 + $0x1a0] sm:$0xf0] }
  0xe7   :  { %1189 = vmatpush.bf16.msrb.mxu3 %v3945_v20  ;;  %v5294_v20 = vld [vmem:[#allocation17 + $0xdc] sm:$0xf0] }
  0xe8   :  { %1178 = vmatpush.bf16.msrb.mxu2 %v3705_v50  ;;  %v3758_v50 = vld [vmem:[#allocation17 + $0x80] sm:$0xf0] }
  0xe9   :  { %1164 = vmatpush.bf16.msrb.mxu1 %v3917_v29  ;;  %1152 = vmatpush.bf16.msrb.mxu0 %v3701_v43  ;;  %v3997_v29 = vor.u32 %v5342_v23, %v3996_v21  ;;  %v545_v23 = vld [vmem:[#allocation16] sm:$0x3] }
  0xeb   :  { %1190 = vmatpush.bf16.msrb.mxu3 %v3921_v35  ;;  %v3781_v35 = vor.u32 %v5288_v33, %v3780_v32 }
  0xed   :  { %1165 = vmatpush.bf16.msrb.mxu1 %v3893_v49  ;;  %1197 = vmatpush.bf16.msra.mxu0 %v3877_v55  ;;  %v5279_v49 = vld [vmem:[#allocation17 + $0x6c] sm:$0xf] }
  0xee   :  { %v3761_v52 = vor.u32 %v5279_v49, %v3758_v50  ;;  %v4077_v50 = vor.u32 %v5361_v38, %v4076_v37 }
  0xef   :  { %1191 = vmatpush.bf16.msrb.mxu3 %v3897_v54  ;;  %v3950_v54 = vld [vmem:[#allocation17 + $0x200] sm:$0xf0] }
  0xf1   :  { %1210 = vmatpush.bf16.msra.mxu1 %v4069_v56  ;;  %1198 = vmatpush.bf16.msra.mxu0 %v3853_v4  ;;  %v3732_v56 = vld [vmem:[#allocation17 + $0x38] sm:$0xf]  ;;  %v3708_v4 = vld [vmem:[#allocation17 + $0x8] sm:$0xf] }
  0xf5   :  { %1211 = vmatpush.bf16.msra.mxu1 %v4045_v5  ;;  %1199 = vmatpush.bf16.msra.mxu0 %v3829_v16  ;;  %v5270_v5 = vld [vmem:[#allocation17 + $0x1c] sm:$0xf0]  ;;  %v419_v16 = vld [vmem:[#allocation13] sm:$0x3] }
  0xf6   :  { %v3709_v7 = vor.u32 %v5270_v5, %v3708_v4  ;;  %v5349_v4 = vld [vmem:[#allocation17 + $0x294] sm:$0xf0]  ;;  %v5298_v5 = vld [vmem:[#allocation17 + $0x104] sm:$0xf] }
  0xf9   :  { %1212 = vmatpush.bf16.msra.mxu1 %v4021_v17  ;;  %v421_v17 = vperm.slane %v419_v16, 0 }
  0xfd   :  { %1213 = vmatpush.bf16.msra.mxu1 %v3997_v29  ;;  %v547_v29 = vperm.slane %v545_v23, 0 }
 0x15a   :  { %v395_v28 = vpop.f32.mrf.mxu1 }
 0x15b   :  { %v396_v34 = vadd.f32 %v5671_v13, %v395_v28  ;;  %v3830_v13 = vld [vmem:[#allocation17 + $0x110] sm:$0xf0]  ;;  %v3805_v28 = vor.u32 %v5294_v20, %v3804_v19  ;;  %v537_v19 = vld [vmem:[#allocation14] sm:$0x3] }
 0x15c   :  { %v3833_v18 = vor.u32 %v5297_v12, %v3830_v13  ;;  %v5315_v13 = vld [vmem:[#allocation17 + $0x18c] sm:$0xf]  ;;  %v539_v25 = vperm.slane %v537_v19, 0  ;;  %v540_v26 = vperm.slane %v537_v19, 1  ;;  %v5340_v19 = vld [vmem:[#allocation17 + $0x254] sm:$0xf] }
 0x15d   :  { %v400_v42 = vmul.f32 0.01, %v396_v34  ;;  %vm399_vm1 = vcmp.ge.f32.partialorder %v396_v34, 0.0  ;;  %1200 = vmatpush.bf16.msra.mxu0 %v3805_v28  ;;  %v3905_v15 = vor.u32 %v5315_v13, %v3902_v14 }
 0x15f   :  { %v401_v48 = vsel %vm399_vm1, %v396_v34, %v400_v42  ;;  %v3972_v34 = vld [vmem:[#allocation17 + $0x218] sm:$0xf]  ;;  %v3974_v42 = vld [vmem:[#allocation17 + $0x230] sm:$0xf0] }
 0x160   :  { %v402_v53 = vpack.c.bf16 %v401_v48, %v401_v48  ;;  %v3973_v39 = vor.u32 %v5336_v36, %v3972_v34  ;;  %v3977_v43 = vor.u32 %v5333_v41, %v3974_v42  ;;  %v5330_v48 = vld [vmem:[#allocation17 + $0x1fc] sm:$0xf0]  ;;  %v5313_v36 = vld [vmem:[#allocation17 + $0x174] sm:$0xf0] }
 0x161   :  { %1201 = vmatpush.bf16.msra.mxu0 %v3781_v35  ;;  %v3949_v51 = vor.u32 %v5330_v48, %v3948_v46  ;;  %v3884_v35 = vld [vmem:[#allocation17 + $0x160] sm:$0xf]  ;;  %v4078_v46 = vld [vmem:[#allocation17 + $0x2f8] sm:$0xf0] }
 0x162   :  { %v397_v61 = vpop.f32.mrf.mxu1  ;;  %513 = vmatmul.bf16.vlgmr.msra.gmra.mxu2 %v402_v53  ;;  %526 = vmatmul.bf16.vlgmr.msra.gmra.mxu3 %v402_v53  ;;  %v5327_v53 = vld [vmem:[#allocation17 + $0x1ec] sm:$0xf]  ;;  %v3885_v49 = vor.u32 %v5313_v36, %v3884_v35  ;;  %v3764_v35 = vld [vmem:[#allocation17 + $0x70] sm:$0xf]  ;;  %v5283_v36 = vld [vmem:[#allocation17 + $0x84] sm:$0xf0] }
 0x163   :  { %1223 = vmatpush.bf16.msra.mxu2 %v3881_v57  ;;  %1236 = vmatpush.bf16.msra.mxu3 %v4073_v62  ;;  %v3953_v55 = vor.u32 %v5327_v53, %v3950_v54  ;;  %v5276_v57 = vld [vmem:[#allocation17 + $0x4c] sm:$0xf0]  ;;  %v3925_v61 = vor.u32 %v5324_v60, %v3924_v59  ;;  %v5273_v62 = vld [vmem:[#allocation17 + $0x3c] sm:$0xf]  ;;  %v4081_v54 = vor.u32 %v5358_v45, %v4078_v46  ;;  %v5352_v59 = vld [vmem:[#allocation17 + $0x2b4] sm:$0xf] }
 0x164   :  { %1214 = vmatpush.bf16.msra.mxu1 %v3973_v39  ;;  %v3733_v58 = vor.u32 %v5276_v57, %v3732_v56  ;;  %v3737_v1 = vor.u32 %v5273_v62, %v3734_v63  ;;  %v5310_v39 = vld [vmem:[#allocation17 + $0x164] sm:$0xf]  ;;  %v5355_v56 = vld [vmem:[#allocation17 + $0x2c4] sm:$0xf0]  ;;  %v5304_v57 = vld [vmem:[#allocation17 + $0x134] sm:$0xf]  ;;  %v3765_v45 = vor.u32 %v5283_v36, %v3764_v35 }
 0x165   :  { %1202 = vmatpush.bf16.msra.mxu0 %v3757_v47  ;;  %v3889_v53 = vor.u32 %v5310_v39, %v3886_v44  ;;  %v4054_v60 = vld [vmem:[#allocation17 + $0x2c8] sm:$0xf0]  ;;  %v3836_v63 = vld [vmem:[#allocation17 + $0x100] sm:$0xf]  ;;  %v3956_v39 = vld [vmem:[#allocation17 + $0x1f0] sm:$0xf] }
 0x166   :  { %v4057_v2 = vor.u32 %v5352_v59, %v4054_v60  ;;  %v3958_v44 = vld [vmem:[#allocation17 + $0x208] sm:$0xf0]  ;;  %v4396_v35 = vld [vmem:[#allocation20 + $0x270] sm:$0xf] }
 0x167   :  { %1224 = vmatpush.bf16.msra.mxu2 %v3857_v6  ;;  %1237 = vmatpush.bf16.msra.mxu3 %v4049_v10  ;;  %v3900_v6 = vld [vmem:[#allocation17 + $0x188] sm:$0xf]  ;;  %v3710_v10 = vld [vmem:[#allocation17 + $0x20] sm:$0xf0]  ;;  %v5443_v36 = vld [vmem:[#allocation20 + $0x284] sm:$0xf0] }
 0x168   :  { %1215 = vmatpush.bf16.msra.mxu1 %v3949_v51  ;;  %v3901_v11 = vor.u32 %v5318_v8, %v3900_v6  ;;  %v3713_v12 = vor.u32 %v5267_v9, %v3710_v10  ;;  %v3860_v51 = vld [vmem:[#allocation17 + $0x130] sm:$0xf]  ;;  %v3838_v6 = vld [vmem:[#allocation17 + $0x118] sm:$0xf0]  ;;  %v3837_v9 = vor.u32 %v5301_v0, %v3836_v63 }
 0x169   :  { %1203 = vmatpush.bf16.msra.mxu0 %v3733_v58  ;;  %v3862_v58 = vld [vmem:[#allocation17 + $0x148] sm:$0xf0]  ;;  %v4030_v8 = vld [vmem:[#allocation17 + $0x298] sm:$0xf0]  ;;  %v3841_v13 = vor.u32 %v5298_v5, %v3838_v6  ;;  %v3908_v63 = vld [vmem:[#allocation17 + $0x190] sm:$0xf] }
 0x16a   :  { %v5316_v5 = vld [vmem:[#allocation17 + $0x194] sm:$0xf]  ;;  %v3910_v6 = vld [vmem:[#allocation17 + $0x1a8] sm:$0xf0] }
 0x16b   :  { %1225 = vmatpush.bf16.msra.mxu2 %v3833_v18  ;;  %1238 = vmatpush.bf16.msra.mxu3 %v4025_v22  ;;  %v422_v18 = vperm.slane %v419_v16, 1  ;;  %v5343_v16 = vld [vmem:[#allocation17 + $0x264] sm:$0xf0] }
 0x16c   :  { %1216 = vmatpush.bf16.msra.mxu1 %v3925_v61 }
 0x16d   :  { %1204 = vmatpush.bf16.msra.mxu0 %v3709_v7  ;;  %v5346_v7 = vld [vmem:[#allocation17 + $0x284] sm:$0xf] }
 0x16e   :  { %v4033_v14 = vor.u32 %v5346_v7, %v4030_v8  ;;  %v4252_v7 = vld [vmem:[#allocation20 + $0x150] sm:$0xf]  ;;  %v5407_v8 = vld [vmem:[#allocation20 + $0x164] sm:$0xf0] }
 0x16f   :  { %1226 = vmatpush.bf16.msra.mxu2 %v3809_v30  ;;  %1239 = vmatpush.bf16.msra.mxu3 %v4001_v31  ;;  %v548_v30 = vperm.slane %v545_v23, 1  ;;  %v3788_v23 = vld [vmem:[#allocation17 + $0xa0] sm:$0xf] }
 0x170   :  { %1217 = vmatpush.bf16.msra.mxu1 %v3901_v11  ;;  %v3812_v11 = vld [vmem:[#allocation17 + $0xd0] sm:$0xf] }
 0x173   :  { %1227 = vmatpush.bf16.msra.mxu2 %v3785_v40  ;;  %1240 = vmatpush.bf16.msra.mxu3 %v3977_v43 }
 0x177   :  { %1228 = vmatpush.bf16.msra.mxu2 %v3761_v52  ;;  %1241 = vmatpush.bf16.msra.mxu3 %v3953_v55  ;;  %v5307_v52 = vld [vmem:[#allocation17 + $0x144] sm:$0xf0]  ;;  %v4052_v55 = vld [vmem:[#allocation17 + $0x2b0] sm:$0xf] }
 0x178   :  { %v3861_v61 = vor.u32 %v5307_v52, %v3860_v51  ;;  %v4053_v62 = vor.u32 %v5355_v56, %v4052_v55  ;;  %v5274_v55 = vld [vmem:[#allocation17 + $0x44] sm:$0xf]  ;;  %v3742_v56 = vld [vmem:[#allocation17 + $0x58] sm:$0xf0] }
 0x179   :  { %v3745_v0 = vor.u32 %v5274_v55, %v3742_v56  ;;  %v5485_v55 = vld [vmem:[#allocation20 + $0x3d4] sm:$0xf0]  ;;  %v4756_v56 = vld [vmem:[#allocation20 + $0x540] sm:$0xf] }
 0x17b   :  { %1229 = vmatpush.bf16.msra.mxu2 %v3737_v1  ;;  %1242 = vmatpush.bf16.msra.mxu3 %v3929_v3  ;;  %v3865_v1 = vor.u32 %v5304_v57, %v3862_v58  ;;  %v4028_v3 = vld [vmem:[#allocation17 + $0x280] sm:$0xf]  ;;  %v5322_v57 = vld [vmem:[#allocation17 + $0x1c4] sm:$0xf]  ;;  %v3934_v58 = vld [vmem:[#allocation17 + $0x1d8] sm:$0xf0] }
 0x17c   :  { %v4029_v10 = vor.u32 %v5349_v4, %v4028_v3  ;;  %v5268_v3 = vld [vmem:[#allocation17 + $0x14] sm:$0xf]  ;;  %v3718_v4 = vld [vmem:[#allocation17 + $0x28] sm:$0xf0] }
 0x17f   :  { %1230 = vmatpush.bf16.msra.mxu2 %v3713_v12  ;;  %1243 = vmatpush.bf16.msra.mxu3 %v3905_v15  ;;  %v5295_v12 = vld [vmem:[#allocation17 + $0xe4] sm:$0xf0]  ;;  %v4004_v15 = vld [vmem:[#allocation17 + $0x250] sm:$0xf] }
 0x1e5   :  { %v514_v20 = vpop.f32.mrf.mxu2  ;;  %v527_v21 = vpop.f32.mrf.mxu3 }
 0x1e6   :  { %v515_v22 = vadd.f32 %v514_v20, %v421_v17  ;;  %v528_v24 = vadd.f32 %v527_v21, %v422_v18  ;;  %v5292_v17 = vld [vmem:[#allocation17 + $0xd4] sm:$0xf]  ;;  %v3814_v18 = vld [vmem:[#allocation17 + $0xe8] sm:$0xf0]  ;;  %v3813_v21 = vor.u32 %v5295_v12, %v3812_v11 }
 0x1e7   :  { %v4006_v20 = vld [vmem:[#allocation17 + $0x268] sm:$0xf0] }
 0x1e8   :  { %vm531_vm2 = vcmp.ge.f32.partialorder %v515_v22, 0.0  ;;  %v533_v27 = vmul.f32 0.01, %v515_v22  ;;  %vm532_vm3 = vcmp.ge.f32.partialorder %v528_v24, 0.0  ;;  %v534_v28 = vmul.f32 0.01, %v528_v24 }
 0x1ea   :  { %v535_v31 = vsel %vm531_vm2, %v515_v22, %v533_v27  ;;  %v536_v32 = vsel %vm532_vm3, %v528_v24, %v534_v28  ;;  %v4005_v22 = vor.u32 %v5343_v16, %v4004_v15  ;;  %v5289_v24 = vld [vmem:[#allocation17 + $0xb4] sm:$0xf0]  ;;  %v3980_v27 = vld [vmem:[#allocation17 + $0x220] sm:$0xf]  ;;  %v4228_v15 = vld [vmem:[#allocation20 + $0x120] sm:$0xf] }
 0x1eb   :  { %v543_v33 = vmul.f32 %v539_v25, %v535_v31  ;;  %v544_v34 = vmul.f32 %v540_v26, %v536_v32  ;;  %v3817_v25 = vor.u32 %v5292_v17, %v3814_v18  ;;  %v4009_v26 = vor.u32 %v5340_v19, %v4006_v20  ;;  %v5337_v28 = vld [vmem:[#allocation17 + $0x234] sm:$0xf0]  ;;  %v5334_v31 = vld [vmem:[#allocation17 + $0x224] sm:$0xf]  ;;  %v3982_v32 = vld [vmem:[#allocation17 + $0x238] sm:$0xf0] }
 0x1ec   :  { %v3985_v38 = vor.u32 %v5334_v31, %v3982_v32  ;;  %v4636_v16 = vld [vmem:[#allocation20 + $0x450] sm:$0xf]  ;;  %v4253_v17 = vor.u32 %v5407_v8, %v4252_v7  ;;  %v5503_v19 = vld [vmem:[#allocation20 + $0x464] sm:$0xf0]  ;;  %v5497_v31 = vld [vmem:[#allocation20 + $0x434] sm:$0xf0] }
 0x1ed   :  { %v551_v40 = vadd.f32 %v547_v29, %v543_v33  ;;  %v552_v41 = vadd.f32 %v548_v30, %v544_v34  ;;  %v516_v42 = vpop.f32.mrf.mxu2  ;;  %v529_v43 = vpop.f32.mrf.mxu3  ;;  %v5286_v29 = vld [vmem:[#allocation17 + $0xa4] sm:$0xf]  ;;  %v3790_v30 = vld [vmem:[#allocation17 + $0xb8] sm:$0xf0]  ;;  %v3789_v33 = vor.u32 %v5289_v24, %v3788_v23  ;;  %v3981_v34 = vor.u32 %v5337_v28, %v3980_v27  ;;  %v4828_v20 = vld [vmem:[#allocation20 + $0x5d0] sm:$0xf] }
 0x1ee   :  { %v3793_v37 = vor.u32 %v5286_v29, %v3790_v30  ;;  %v3766_v42 = vld [vmem:[#allocation17 + $0x88] sm:$0xf0]  ;;  %v5328_v43 = vld [vmem:[#allocation17 + $0x1f4] sm:$0xf]  ;;  %v4420_v23 = vld [vmem:[#allocation20 + $0x2a0] sm:$0xf] }
 0x1ef   :  { %v6153_v47 = vpack.c.bf16 %v551_v40, %v551_v40  ;;  %v6155_v48 = vpack.c.bf16 %v552_v41, %v552_v41  ;;  %v5331_v40 = vld [vmem:[#allocation17 + $0x204] sm:$0xf0]  ;;  %v5280_v41 = vld [vmem:[#allocation17 + $0x74] sm:$0xf]  ;;  %v3961_v52 = vor.u32 %v5328_v43, %v3958_v44  ;;  %v5449_v24 = vld [vmem:[#allocation20 + $0x2b4] sm:$0xf0] }
 0x1f0   :  { %v3957_v46 = vor.u32 %v5331_v40, %v3956_v39  ;;  %v3769_v51 = vor.u32 %v5280_v41, %v3766_v42  ;;  %v4612_v27 = vld [vmem:[#allocation20 + $0x420] sm:$0xf]  ;;  %v4421_v30 = vor.u32 %v5449_v24, %v4420_v23  ;;  %v4588_v39 = vld [vmem:[#allocation20 + $0x3f0] sm:$0xf]  ;;  %v4397_v42 = vor.u32 %v5443_v36, %v4396_v35  ;;  %v5491_v43 = vld [vmem:[#allocation20 + $0x404] sm:$0xf0] }
 0x1f1   :  { %1153 = vmatmul.bf16.vlgmr.msrb.gmra.mxu0 %v6153_v47  ;;  %1166 = vmatmul.bf16.vlgmr.msrb.gmra.mxu1 %v6155_v48  ;;  %v4804_v32 = vld [vmem:[#allocation20 + $0x5a0] sm:$0xf]  ;;  %v4780_v44 = vld [vmem:[#allocation20 + $0x570] sm:$0xf]  ;;  %v5425_v8 = vld [vmem:[#allocation20 + $0x1f4] sm:$0xf0] }
 0x1f2   :  { %1179 = vmatmul.bf16.vlgmr.msrb.gmra.mxu2 %v6153_v47  ;;  %1192 = vmatmul.bf16.vlgmr.msrb.gmra.mxu3 %v6155_v48  ;;  %v4324_v7 = vld [vmem:[#allocation20 + $0x1e0] sm:$0xf]  ;;  %v4492_v24 = vld [vmem:[#allocation20 + $0x330] sm:$0xf]  ;;  %v5647_v36 = vld [vmem:[#allocation20 + $0x8e4] sm:$0xf0] }
 0x1f3   :  { %1249 = vmatpush.bf16.msrb.mxu0 %v3885_v49  ;;  %1262 = vmatpush.bf16.msrb.mxu1 %v4077_v50  ;;  %v3740_v49 = vld [vmem:[#allocation17 + $0x40] sm:$0xf]  ;;  %v5277_v50 = vld [vmem:[#allocation17 + $0x54] sm:$0xf0] }
 0x1f4   :  { %1275 = vmatpush.bf16.msrb.mxu2 %v3889_v53  ;;  %1288 = vmatpush.bf16.msrb.mxu3 %v4081_v54  ;;  %v3932_v53 = vld [vmem:[#allocation17 + $0x1c0] sm:$0xf]  ;;  %v5325_v54 = vld [vmem:[#allocation17 + $0x1d4] sm:$0xf0]  ;;  %v3741_v59 = vor.u32 %v5277_v50, %v3740_v49  ;;  %v4372_v49 = vld [vmem:[#allocation20 + $0x240] sm:$0xf] }
 0x1f5   :  { %v3933_v60 = vor.u32 %v5325_v54, %v3932_v53  ;;  %v5437_v50 = vld [vmem:[#allocation20 + $0x254] sm:$0xf0]  ;;  %v5212_v35 = vld [vmem:[#allocation20 + $0x8d0] sm:$0xf] }
 0x1f6   :  { %v4373_v54 = vor.u32 %v5437_v50, %v4372_v49  ;;  %v4254_v49 = vld [vmem:[#allocation20 + $0x168] sm:$0xf0]  ;;  %v5593_v50 = vld [vmem:[#allocation20 + $0x734] sm:$0xf0] }
 0x1f7   :  { %1250 = vmatpush.bf16.msrb.mxu0 %v3861_v61  ;;  %1263 = vmatpush.bf16.msrb.mxu1 %v4053_v62  ;;  %v3716_v61 = vld [vmem:[#allocation17 + $0x10] sm:$0xf]  ;;  %v5271_v62 = vld [vmem:[#allocation17 + $0x24] sm:$0xf0] }
 0x1f8   :  { %1276 = vmatpush.bf16.msrb.mxu2 %v3865_v1  ;;  %1289 = vmatpush.bf16.msrb.mxu3 %v4057_v2  ;;  %v3937_v1 = vor.u32 %v5322_v57, %v3934_v58  ;;  %v5319_v2 = vld [vmem:[#allocation17 + $0x1a4] sm:$0xf0]  ;;  %v3717_v11 = vor.u32 %v5271_v62, %v3716_v61  ;;  %v5533_v57 = vld [vmem:[#allocation20 + $0x554] sm:$0xf0]  ;;  %v5383_v58 = vld [vmem:[#allocation20 + $0xa4] sm:$0xf0] }
 0x1f9   :  { %v3909_v12 = vor.u32 %v5319_v2, %v3908_v63  ;;  %v4132_v61 = vld [vmem:[#allocation20 + $0x60] sm:$0xf]  ;;  %v4540_v63 = vld [vmem:[#allocation20 + $0x390] sm:$0xf] }
 0x1fb   :  { %1251 = vmatpush.bf16.msrb.mxu0 %v3837_v9  ;;  %1264 = vmatpush.bf16.msrb.mxu1 %v4029_v10  ;;  %v4444_v9 = vld [vmem:[#allocation20 + $0x2d0] sm:$0xf]  ;;  %v5455_v10 = vld [vmem:[#allocation20 + $0x2e4] sm:$0xf0] }
 0x1fc   :  { %1277 = vmatpush.bf16.msrb.mxu2 %v3841_v13  ;;  %1290 = vmatpush.bf16.msrb.mxu3 %v4033_v14  ;;  %v3721_v13 = vor.u32 %v5268_v3, %v3718_v4  ;;  %v3913_v14 = vor.u32 %v5316_v5, %v3910_v6  ;;  %v4445_v18 = vor.u32 %v5455_v10, %v4444_v9  ;;  %v5479_v3 = vld [vmem:[#allocation20 + $0x3a4] sm:$0xf0]  ;;  %v4732_v4 = vld [vmem:[#allocation20 + $0x510] sm:$0xf]  ;;  %v5377_v6 = vld [vmem:[#allocation20 + $0x74] sm:$0xf0] }
 0x1fd   :  { %v5527_v5 = vld [vmem:[#allocation20 + $0x524] sm:$0xf0]  ;;  %v4108_v9 = vld [vmem:[#allocation20 + $0x30] sm:$0xf]  ;;  %v4541_v10 = vor.u32 %v5479_v3, %v4540_v63  ;;  %v5398_v3 = vld [vmem:[#allocation20 + $0x124] sm:$0xf] }
 0x1ff   :  { %1252 = vmatpush.bf16.msrb.mxu0 %v3813_v21  ;;  %1265 = vmatpush.bf16.msrb.mxu1 %v4005_v22  ;;  %v5551_v21 = vld [vmem:[#allocation20 + $0x5e4] sm:$0xf0]  ;;  %v5401_v22 = vld [vmem:[#allocation20 + $0x134] sm:$0xf0] }
 0x200   :  { %1278 = vmatpush.bf16.msrb.mxu2 %v3817_v25  ;;  %1291 = vmatpush.bf16.msrb.mxu3 %v4009_v26  ;;  %v4204_v25 = vld [vmem:[#allocation20 + $0xf0] sm:$0xf]  ;;  %v4637_v26 = vor.u32 %v5503_v19, %v4636_v16  ;;  %v4829_v28 = vor.u32 %v5551_v21, %v4828_v20  ;;  %v4229_v29 = vor.u32 %v5401_v22, %v4228_v15  ;;  %v5473_v15 = vld [vmem:[#allocation20 + $0x374] sm:$0xf0]  ;;  %v4708_v16 = vld [vmem:[#allocation20 + $0x4e0] sm:$0xf] }
 0x201   :  { %1205 = vmatmul.bf16.vlgmr.msra.gmra.mxu0 %v6153_v47  ;;  %1218 = vmatmul.bf16.vlgmr.msra.gmra.mxu1 %v6155_v48  ;;  %v4300_v19 = vld [vmem:[#allocation20 + $0x1b0] sm:$0xf]  ;;  %v5419_v20 = vld [vmem:[#allocation20 + $0x1c4] sm:$0xf0]  ;;  %v4084_v21 = vld [vmem:[#allocation20] sm:$0xf] }
 0x202   :  { %1231 = vmatmul.bf16.vlgmr.msra.gmra.mxu2 %v6153_v47  ;;  %1244 = vmatmul.bf16.vlgmr.msra.gmra.mxu3 %v6155_v48  ;;  %v5365_v22 = vld [vmem:[#allocation20 + $0x14] sm:$0xf0] }
 0x203   :  { %1253 = vmatpush.bf16.msrb.mxu0 %v3789_v33  ;;  %1266 = vmatpush.bf16.msrb.mxu1 %v3981_v34  ;;  %v5545_v33 = vld [vmem:[#allocation20 + $0x5b4] sm:$0xf0]  ;;  %v5395_v34 = vld [vmem:[#allocation20 + $0x104] sm:$0xf0] }
 0x204   :  { %1279 = vmatpush.bf16.msrb.mxu2 %v3793_v37  ;;  %1292 = vmatpush.bf16.msrb.mxu3 %v3985_v38  ;;  %v4180_v37 = vld [vmem:[#allocation20 + $0xc0] sm:$0xf]  ;;  %v4613_v38 = vor.u32 %v5497_v31, %v4612_v27  ;;  %v4805_v40 = vor.u32 %v5545_v33, %v4804_v32  ;;  %v4205_v41 = vor.u32 %v5395_v34, %v4204_v25  ;;  %v5020_v31 = vld [vmem:[#allocation20 + $0x750] sm:$0xf]  ;;  %v5413_v33 = vld [vmem:[#allocation20 + $0x194] sm:$0xf0] }
 0x205   :  { %v4301_v27 = vor.u32 %v5419_v20, %v4300_v19  ;;  %v4276_v32 = vld [vmem:[#allocation20 + $0x180] sm:$0xf]  ;;  %v5599_v34 = vld [vmem:[#allocation20 + $0x764] sm:$0xf0]  ;;  %v4206_v19 = vld [vmem:[#allocation20 + $0x108] sm:$0xf0] }
 0x207   :  { %1254 = vmatpush.bf16.msrb.mxu0 %v3765_v45  ;;  %1267 = vmatpush.bf16.msrb.mxu1 %v3957_v46  ;;  %v5539_v45 = vld [vmem:[#allocation20 + $0x584] sm:$0xf0]  ;;  %v5389_v46 = vld [vmem:[#allocation20 + $0xd4] sm:$0xf0] }
 0x208   :  { %1280 = vmatpush.bf16.msrb.mxu2 %v3769_v51  ;;  %1293 = vmatpush.bf16.msrb.mxu3 %v3961_v52  ;;  %v4156_v51 = vld [vmem:[#allocation20 + $0x90] sm:$0xf]  ;;  %v4781_v52 = vor.u32 %v5539_v45, %v4780_v44  ;;  %v4181_v53 = vor.u32 %v5389_v46, %v4180_v37  ;;  %v4996_v44 = vld [vmem:[#allocation20 + $0x720] sm:$0xf]  ;;  %v5213_v45 = vor.u32 %v5647_v36, %v5212_v35  ;;  %v5404_v46 = vld [vmem:[#allocation20 + $0x154] sm:$0xf] }
 0x209   :  { %v5440_v36 = vld [vmem:[#allocation20 + $0x274] sm:$0xf] }
 0x20b   :  { %1255 = vmatpush.bf16.msrb.mxu0 %v3741_v59  ;;  %1268 = vmatpush.bf16.msrb.mxu1 %v3933_v60  ;;  %v4348_v59 = vld [vmem:[#allocation20 + $0x210] sm:$0xf]  ;;  %v5431_v60 = vld [vmem:[#allocation20 + $0x224] sm:$0xf0] }
 0x20c   :  { %1281 = vmatpush.bf16.msrb.mxu2 %v3745_v0  ;;  %1294 = vmatpush.bf16.msrb.mxu3 %v3937_v1  ;;  %v4757_v0 = vor.u32 %v5533_v57, %v4756_v56  ;;  %v4157_v1 = vor.u32 %v5383_v58, %v4156_v51  ;;  %v4349_v2 = vor.u32 %v5431_v60, %v4348_v59  ;;  %v5188_v51 = vld [vmem:[#allocation20 + $0x8a0] sm:$0xf]  ;;  %v5587_v56 = vld [vmem:[#allocation20 + $0x704] sm:$0xf0]  ;;  %v5164_v57 = vld [vmem:[#allocation20 + $0x870] sm:$0xf] }
 0x20d   :  { %v5635_v58 = vld [vmem:[#allocation20 + $0x884] sm:$0xf0] }
 0x20e   :  { %v5165_v60 = vor.u32 %v5635_v58, %v5164_v57  ;;  %v5428_v57 = vld [vmem:[#allocation20 + $0x214] sm:$0xf]  ;;  %v4350_v58 = vld [vmem:[#allocation20 + $0x228] sm:$0xf0] }
 0x20f   :  { %1256 = vmatpush.bf16.msrb.mxu0 %v3717_v11  ;;  %1269 = vmatpush.bf16.msrb.mxu1 %v3909_v12  ;;  %v4516_v11 = vld [vmem:[#allocation20 + $0x360] sm:$0xf]  ;;  %v4733_v12 = vor.u32 %v5527_v5, %v4732_v4  ;;  %v4230_v4 = vld [vmem:[#allocation20 + $0x138] sm:$0xf0] }
 0x210   :  { %1282 = vmatpush.bf16.msrb.mxu2 %v3721_v13  ;;  %1295 = vmatpush.bf16.msrb.mxu3 %v3913_v14  ;;  %v4133_v13 = vor.u32 %v5377_v6, %v4132_v61  ;;  %v4325_v14 = vor.u32 %v5425_v8, %v4324_v7  ;;  %v4517_v23 = vor.u32 %v5473_v15, %v4516_v11  ;;  %v4948_v61 = vld [vmem:[#allocation20 + $0x6c0] sm:$0xf]  ;;  %v5509_v7 = vld [vmem:[#allocation20 + $0x494] sm:$0xf0]  ;;  %v5452_v11 = vld [vmem:[#allocation20 + $0x2d4] sm:$0xf] }
 0x211   :  { %v4233_v5 = vor.u32 %v5398_v3, %v4230_v4  ;;  %v4660_v6 = vld [vmem:[#allocation20 + $0x480] sm:$0xf]  ;;  %v4086_v3 = vld [vmem:[#allocation20 + $0x18] sm:$0xf0] }
 0x212   :  { %1257 = vmatmul.bf16.vlgmr.msrb.gmra.mxu0 %v6153_v47  ;;  %1270 = vmatmul.bf16.vlgmr.msrb.gmra.mxu1 %v6155_v48  ;;  %v5140_v8 = vld [vmem:[#allocation20 + $0x840] sm:$0xf] }
 0x213   :  { %3067 = vmatpush.bf16.msra.mxu0 %v4253_v17  ;;  %3080 = vmatpush.bf16.msra.mxu1 %v4445_v18  ;;  %v5521_v17 = vld [vmem:[#allocation20 + $0x4f4] sm:$0xf0]  ;;  %v5371_v18 = vld [vmem:[#allocation20 + $0x44] sm:$0xf0]  ;;  %v4900_v15 = vld [vmem:[#allocation20 + $0x660] sm:$0xf] }
 0x214   :  { %1283 = vmatmul.bf16.vlgmr.msrb.gmra.mxu2 %v6153_v47  ;;  %1296 = vmatmul.bf16.vlgmr.msrb.gmra.mxu3 %v6155_v48  ;;  %v4589_v47 = vor.u32 %v5491_v43, %v4588_v39  ;;  %v4564_v48 = vld [vmem:[#allocation20 + $0x3c0] sm:$0xf]  ;;  %v4709_v25 = vor.u32 %v5521_v17, %v4708_v16  ;;  %v4085_v39 = vor.u32 %v5365_v22, %v4084_v21  ;;  %v5569_v16 = vld [vmem:[#allocation20 + $0x674] sm:$0xf0]  ;;  %v5116_v21 = vld [vmem:[#allocation20 + $0x810] sm:$0xf] }
 0x215   :  { %3093 = vmatpush.bf16.msra.mxu2 %v4637_v26  ;;  %3106 = vmatpush.bf16.msra.mxu3 %v4829_v28  ;;  %v4565_v62 = vor.u32 %v5485_v55, %v4564_v48  ;;  %v4109_v26 = vor.u32 %v5371_v18, %v4108_v9  ;;  %v5467_v28 = vld [vmem:[#allocation20 + $0x344] sm:$0xf0]  ;;  %v5021_v43 = vor.u32 %v5599_v34, %v5020_v31  ;;  %v5392_v18 = vld [vmem:[#allocation20 + $0xf4] sm:$0xf]  ;;  %v4182_v31 = vld [vmem:[#allocation20 + $0xd8] sm:$0xf0] }
 0x216   :  { %v4493_v37 = vor.u32 %v5467_v28, %v4492_v24  ;;  %v4661_v9 = vor.u32 %v5509_v7, %v4660_v6  ;;  %v4901_v17 = vor.u32 %v5569_v16, %v4900_v15  ;;  %v4209_v20 = vor.u32 %v5392_v18, %v4206_v19  ;;  %v5623_v22 = vld [vmem:[#allocation20 + $0x824] sm:$0xf0]  ;;  %v5446_v24 = vld [vmem:[#allocation20 + $0x2a4] sm:$0xf]  ;;  %v5617_v34 = vld [vmem:[#allocation20 + $0x7f4] sm:$0xf0] }
 0x217   :  { %3068 = vmatpush.bf16.msra.mxu0 %v4229_v29  ;;  %3081 = vmatpush.bf16.msra.mxu1 %v4421_v30  ;;  %v4684_v29 = vld [vmem:[#allocation20 + $0x4b0] sm:$0xf]  ;;  %v5515_v30 = vld [vmem:[#allocation20 + $0x4c4] sm:$0xf0]  ;;  %v5416_v6 = vld [vmem:[#allocation20 + $0x1b4] sm:$0xf] }
 0x218   :  { %v5563_v28 = vld [vmem:[#allocation20 + $0x644] sm:$0xf0]  ;;  %v4302_v7 = vld [vmem:[#allocation20 + $0x1c8] sm:$0xf0]  ;;  %v5500_v18 = vld [vmem:[#allocation20 + $0x454] sm:$0xf] }
 0x219   :  { %3094 = vmatpush.bf16.msra.mxu2 %v4613_v38  ;;  %3107 = vmatpush.bf16.msra.mxu3 %v4805_v40  ;;  %v4685_v38 = vor.u32 %v5515_v30, %v4684_v29  ;;  %v4277_v40 = vor.u32 %v5413_v33, %v4276_v32  ;;  %v5386_v30 = vld [vmem:[#allocation20 + $0xc4] sm:$0xf]  ;;  %v5092_v33 = vld [vmem:[#allocation20 + $0x7e0] sm:$0xf]  ;;  %v4638_v19 = vld [vmem:[#allocation20 + $0x468] sm:$0xf0] }
 0x21a   :  { %v4185_v32 = vor.u32 %v5386_v30, %v4182_v31  ;;  %v5093_v35 = vor.u32 %v5617_v34, %v5092_v33  ;;  %v4614_v30 = vld [vmem:[#allocation20 + $0x438] sm:$0xf0]  ;;  %v5548_v33 = vld [vmem:[#allocation20 + $0x5d4] sm:$0xf]  ;;  %v4830_v34 = vld [vmem:[#allocation20 + $0x5e8] sm:$0xf0] }
 0x21b   :  { %3069 = vmatpush.bf16.msra.mxu0 %v4205_v41  ;;  %3082 = vmatpush.bf16.msra.mxu1 %v4397_v42  ;;  %v4468_v41 = vld [vmem:[#allocation20 + $0x300] sm:$0xf]  ;;  %v5461_v42 = vld [vmem:[#allocation20 + $0x314] sm:$0xf0] }
 0x21c   :  { %v4469_v48 = vor.u32 %v5461_v42, %v4468_v41  ;;  %v5380_v42 = vld [vmem:[#allocation20 + $0x94] sm:$0xf] }
 0x21d   :  { %3095 = vmatpush.bf16.msra.mxu2 %v4589_v47  ;;  %3108 = vmatpush.bf16.msra.mxu3 %v4781_v52  ;;  %v5641_v47 = vld [vmem:[#allocation20 + $0x8b4] sm:$0xf0]  ;;  %v4257_v52 = vor.u32 %v5404_v46, %v4254_v49  ;;  %v5611_v46 = vld [vmem:[#allocation20 + $0x7c4] sm:$0xf0] }
 0x21e   :  { %v5189_v55 = vor.u32 %v5641_v47, %v5188_v51  ;;  %v4374_v51 = vld [vmem:[#allocation20 + $0x258] sm:$0xf0] }
 0x21f   :  { %3070 = vmatpush.bf16.msra.mxu0 %v4181_v53  ;;  %3083 = vmatpush.bf16.msra.mxu1 %v4373_v54  ;;  %v4997_v53 = vor.u32 %v5593_v50, %v4996_v44  ;;  %v4972_v54 = vld [vmem:[#allocation20 + $0x6f0] sm:$0xf]  ;;  %v5434_v50 = vld [vmem:[#allocation20 + $0x244] sm:$0xf] }
 0x220   :  { %v4973_v59 = vor.u32 %v5587_v56, %v4972_v54  ;;  %v4377_v47 = vor.u32 %v5434_v50, %v4374_v51  ;;  %v5044_v54 = vld [vmem:[#allocation20 + $0x780] sm:$0xf]  ;;  %v5482_v51 = vld [vmem:[#allocation20 + $0x3c4] sm:$0xf] }
 0x221   :  { %3096 = vmatpush.bf16.msra.mxu2 %v4565_v62  ;;  %3109 = vmatpush.bf16.msra.mxu3 %v4757_v0  ;;  %v5581_v62 = vld [vmem:[#allocation20 + $0x6d4] sm:$0xf0]  ;;  %v4924_v0 = vld [vmem:[#allocation20 + $0x690] sm:$0xf] }
 0x222   :  { %v4949_v63 = vor.u32 %v5581_v62, %v4948_v61  ;;  %v4110_v61 = vld [vmem:[#allocation20 + $0x48] sm:$0xf0] }
 0x223   :  { %3071 = vmatpush.bf16.msra.mxu0 %v4157_v1  ;;  %3084 = vmatpush.bf16.msra.mxu1 %v4349_v2  ;;  %v5575_v1 = vld [vmem:[#allocation20 + $0x6a4] sm:$0xf0] }
 0x224   :  { %v4925_v2 = vor.u32 %v5575_v1, %v4924_v0  ;;  %v4326_v0 = vld [vmem:[#allocation20 + $0x1f8] sm:$0xf0] }
 0x225   :  { %3097 = vmatpush.bf16.msra.mxu2 %v4541_v10  ;;  %3110 = vmatpush.bf16.msra.mxu3 %v4733_v12  ;;  %v5629_v10 = vld [vmem:[#allocation20 + $0x854] sm:$0xf0]  ;;  %v4446_v12 = vld [vmem:[#allocation20 + $0x2e8] sm:$0xf0] }
 0x227   :  { %3072 = vmatpush.bf16.msra.mxu0 %v4133_v13  ;;  %3085 = vmatpush.bf16.msra.mxu1 %v4325_v14  ;;  %v5141_v13 = vor.u32 %v5629_v10, %v5140_v8  ;;  %v4449_v14 = vor.u32 %v5452_v11, %v4446_v12  ;;  %v4305_v8 = vor.u32 %v5416_v6, %v4302_v7  ;;  %v5410_v10 = vld [vmem:[#allocation20 + $0x184] sm:$0xf]  ;;  %v4278_v11 = vld [vmem:[#allocation20 + $0x198] sm:$0xf0] }
 0x228   :  { %v4281_v12 = vor.u32 %v5410_v10, %v4278_v11  ;;  %v5590_v6 = vld [vmem:[#allocation20 + $0x724] sm:$0xf] }
 0x229   :  { %3098 = vmatpush.bf16.msra.mxu2 %v4517_v23  ;;  %3111 = vmatpush.bf16.msra.mxu3 %v4709_v25  ;;  %v5117_v23 = vor.u32 %v5623_v22, %v5116_v21  ;;  %v4422_v25 = vld [vmem:[#allocation20 + $0x2b8] sm:$0xf0]  ;;  %v5530_v7 = vld [vmem:[#allocation20 + $0x544] sm:$0xf] }
 0x22b   :  { %3073 = vmatpush.bf16.msra.mxu0 %v4109_v26  ;;  %3086 = vmatpush.bf16.msra.mxu1 %v4301_v27  ;;  %v4425_v26 = vor.u32 %v5446_v24, %v4422_v25  ;;  %v4876_v27 = vld [vmem:[#allocation20 + $0x630] sm:$0xf]  ;;  %v4641_v24 = vor.u32 %v5500_v18, %v4638_v19  ;;  %v5214_v19 = vld [vmem:[#allocation20 + $0x8e8] sm:$0xf0] }
 0x22c   :  { %v4877_v29 = vor.u32 %v5563_v28, %v4876_v27 }
 0x22d   :  { %3099 = vmatpush.bf16.msra.mxu2 %v4493_v37  ;;  %3112 = vmatpush.bf16.msra.mxu3 %v4685_v38  ;;  %v4398_v37 = vld [vmem:[#allocation20 + $0x288] sm:$0xf0] }
 0x22e   :  { %v4401_v38 = vor.u32 %v5440_v36, %v4398_v37  ;;  %v4590_v37 = vld [vmem:[#allocation20 + $0x408] sm:$0xf0] }
 0x22f   :  { %3074 = vmatpush.bf16.msra.mxu0 %v4085_v39  ;;  %3087 = vmatpush.bf16.msra.mxu1 %v4277_v40  ;;  %v4852_v39 = vld [vmem:[#allocation20 + $0x600] sm:$0xf]  ;;  %v5557_v40 = vld [vmem:[#allocation20 + $0x614] sm:$0xf0] }
 0x230   :  { %v4853_v41 = vor.u32 %v5557_v40, %v4852_v39  ;;  %v4833_v40 = vor.u32 %v5548_v33, %v4830_v34  ;;  %v5638_v34 = vld [vmem:[#allocation20 + $0x8a4] sm:$0xf] }
 0x231   :  { %3100 = vmatpush.bf16.msra.mxu2 %v4469_v48  ;;  %3113 = vmatpush.bf16.msra.mxu3 %v4661_v9  ;;  %v5374_v48 = vld [vmem:[#allocation20 + $0x64] sm:$0xf] }
 0x233   :  { %3119 = vmatpush.bf16.msrb.mxu0 %v5021_v43  ;;  %3132 = vmatpush.bf16.msrb.mxu1 %v5213_v45  ;;  %v4158_v43 = vld [vmem:[#allocation20 + $0xa8] sm:$0xf0]  ;;  %v5068_v45 = vld [vmem:[#allocation20 + $0x7b0] sm:$0xf] }
 0x234   :  { %v4161_v44 = vor.u32 %v5380_v42, %v4158_v43  ;;  %v5069_v49 = vor.u32 %v5611_v46, %v5068_v45  ;;  %v5542_v45 = vld [vmem:[#allocation20 + $0x5a4] sm:$0xf]  ;;  %v4806_v46 = vld [vmem:[#allocation20 + $0x5b8] sm:$0xf0] }
 0x235   :  { %3145 = vmatpush.bf16.msrb.mxu2 %v4257_v52  ;;  %3158 = vmatpush.bf16.msrb.mxu3 %v4449_v14  ;;  %v4134_v52 = vld [vmem:[#allocation20 + $0x78] sm:$0xf0] }
 0x237   :  { %3120 = vmatpush.bf16.msrb.mxu0 %v4997_v53  ;;  %3133 = vmatpush.bf16.msrb.mxu1 %v5189_v55  ;;  %v4137_v53 = vor.u32 %v5374_v48, %v4134_v52  ;;  %v5605_v55 = vld [vmem:[#allocation20 + $0x794] sm:$0xf0] }
 0x238   :  { %v5045_v56 = vor.u32 %v5605_v55, %v5044_v54 }
 0x239   :  { %3146 = vmatpush.bf16.msrb.mxu2 %v4233_v5  ;;  %3159 = vmatpush.bf16.msrb.mxu3 %v4425_v26  ;;  %v6169_v5 = vld [vmem:[#allocation19] sm:$0x3f] }
 0x23a   :  { %v653_v9 = vperm.slane %v6169_v5, 0  ;;  %v656_v52 = vperm.slane %v6169_v5, 3 }
 0x23b   :  { %3121 = vmatpush.bf16.msrb.mxu0 %v4973_v59  ;;  %3134 = vmatpush.bf16.msrb.mxu1 %v5165_v60  ;;  %v4353_v59 = vor.u32 %v5428_v57, %v4350_v58  ;;  %v5368_v60 = vld [vmem:[#allocation20 + $0x34] sm:$0xf]  ;;  %v4782_v58 = vld [vmem:[#allocation20 + $0x588] sm:$0xf0] }
 0x23c   :  { %v4113_v62 = vor.u32 %v5368_v60, %v4110_v61  ;;  %v5536_v57 = vld [vmem:[#allocation20 + $0x574] sm:$0xf]  ;;  %v4542_v61 = vld [vmem:[#allocation20 + $0x3a8] sm:$0xf0] }
 0x23d   :  { %3147 = vmatpush.bf16.msrb.mxu2 %v4209_v20  ;;  %3160 = vmatpush.bf16.msrb.mxu3 %v4401_v38  ;;  %v655_v38 = vperm.slane %v6169_v5, 2  ;;  %v5476_v60 = vld [vmem:[#allocation20 + $0x394] sm:$0xf] }
 0x23f   :  { %3122 = vmatpush.bf16.msrb.mxu0 %v4949_v63  ;;  %3135 = vmatpush.bf16.msrb.mxu1 %v5141_v13  ;;  %v5422_v63 = vld [vmem:[#allocation20 + $0x1e4] sm:$0xf] }
 0x240   :  { %v4329_v1 = vor.u32 %v5422_v63, %v4326_v0  ;;  %v4785_v63 = vor.u32 %v5536_v57, %v4782_v58 }
 0x241   :  { %3148 = vmatpush.bf16.msrb.mxu2 %v4185_v32  ;;  %3161 = vmatpush.bf16.msrb.mxu3 %v4377_v47  ;;  %v4566_v47 = vld [vmem:[#allocation20 + $0x3d8] sm:$0xf0] }
 0x242   :  { %v4569_v55 = vor.u32 %v5482_v51, %v4566_v47 }
 0x243   :  { %3123 = vmatpush.bf16.msrb.mxu0 %v4925_v2  ;;  %3136 = vmatpush.bf16.msrb.mxu1 %v5117_v23  ;;  %v5362_v2 = vld [vmem:[#allocation20 + $0x4] sm:$0xf] }
 0x244   :  { %v4089_v4 = vor.u32 %v5362_v2, %v4086_v3 }
 0x245   :  { %3149 = vmatpush.bf16.msrb.mxu2 %v4161_v44  ;;  %3162 = vmatpush.bf16.msrb.mxu3 %v4353_v59  ;;  %v5022_v59 = vld [vmem:[#allocation20 + $0x768] sm:$0xf0] }
 0x247   :  { %3124 = vmatpush.bf16.msrb.mxu0 %v4901_v17  ;;  %3137 = vmatpush.bf16.msrb.mxu1 %v5093_v35  ;;  %v654_v17 = vperm.slane %v6169_v5, 1  ;;  %v5488_v35 = vld [vmem:[#allocation20 + $0x3f4] sm:$0xf] }
 0x248   :  { %v4593_v44 = vor.u32 %v5488_v35, %v4590_v37  ;;  %v5190_v35 = vld [vmem:[#allocation20 + $0x8b8] sm:$0xf0] }
 0x249   :  { %3150 = vmatpush.bf16.msrb.mxu2 %v4137_v53  ;;  %3163 = vmatpush.bf16.msrb.mxu3 %v4329_v1  ;;  %v4809_v53 = vor.u32 %v5542_v45, %v4806_v46  ;;  %v4950_v45 = vld [vmem:[#allocation20 + $0x6d8] sm:$0xf0]  ;;  %v5458_v46 = vld [vmem:[#allocation20 + $0x304] sm:$0xf] }
 0x24b   :  { %3125 = vmatpush.bf16.msrb.mxu0 %v4877_v29  ;;  %3138 = vmatpush.bf16.msrb.mxu1 %v5069_v49  ;;  %v5494_v29 = vld [vmem:[#allocation20 + $0x424] sm:$0xf] }
 0x24c   :  { %v4617_v32 = vor.u32 %v5494_v29, %v4614_v30  ;;  %v4494_v29 = vld [vmem:[#allocation20 + $0x348] sm:$0xf0] }
 0x24d   :  { %3151 = vmatpush.bf16.msrb.mxu2 %v4113_v62  ;;  %3164 = vmatpush.bf16.msrb.mxu3 %v4305_v8  ;;  %v4758_v8 = vld [vmem:[#allocation20 + $0x558] sm:$0xf0] }
 0x24e   :  { %v4761_v18 = vor.u32 %v5530_v7, %v4758_v8 }
 0x24f   :  { %3126 = vmatpush.bf16.msrb.mxu0 %v4853_v41  ;;  %3139 = vmatpush.bf16.msrb.mxu1 %v5045_v56  ;;  %v5596_v56 = vld [vmem:[#allocation20 + $0x754] sm:$0xf] }
 0x250   :  { %v5025_v3 = vor.u32 %v5596_v56, %v5022_v59  ;;  %v5166_v56 = vld [vmem:[#allocation20 + $0x888] sm:$0xf0]  ;;  %v5572_v59 = vld [vmem:[#allocation20 + $0x694] sm:$0xf] }
 0x251   :  { %3152 = vmatpush.bf16.msrb.mxu2 %v4089_v4  ;;  %3165 = vmatpush.bf16.msrb.mxu3 %v4281_v12  ;;  %v4545_v4 = vor.u32 %v5476_v60, %v4542_v61  ;;  %v4926_v60 = vld [vmem:[#allocation20 + $0x6a8] sm:$0xf0]  ;;  %v4260_v61 = vld [vmem:[#allocation20 + $0x158] sm:$0xf] }
 0x26e   :  { %v1154_v13 = vpop.f32.mrf.mxu0  ;;  %v1167_v14 = vpop.f32.mrf.mxu1 }
 0x26f   :  { %v1155_v15 = vadd.f32 %v1154_v13, %v653_v9  ;;  %v4998_v13 = vld [vmem:[#allocation20 + $0x738] sm:$0xf0] }
 0x271   :  { %v1168_v16 = vadd.f32 %v1167_v14, %v1155_v15  ;;  %v5470_v14 = vld [vmem:[#allocation20 + $0x364] sm:$0xf]  ;;  %v4518_v15 = vld [vmem:[#allocation20 + $0x378] sm:$0xf0] }
 0x273   :  { %vm1301_vm4 = vcmp.ge.f32.partialorder %v1168_v16, 0.0  ;;  %v1307_v20 = vmul.f32 0.01, %v1168_v16 }
 0x275   :  { %v1313_v21 = vsel %vm1301_vm4, %v1168_v16, %v1307_v20  ;;  %v1180_v22 = vpop.f32.mrf.mxu2  ;;  %v1193_v23 = vpop.f32.mrf.mxu3  ;;  %v5644_v16 = vld [vmem:[#allocation20 + $0x8d4] sm:$0xf] }
 0x276   :  { %v6173_v25 = vpack.c.bf16 %v1313_v21, %v1313_v21  ;;  %v1181_v26 = vadd.f32 %v1180_v22, %v654_v17  ;;  %v1156_v27 = vpop.f32.mrf.mxu0  ;;  %v1169_v28 = vpop.f32.mrf.mxu1  ;;  %v5584_v20 = vld [vmem:[#allocation20 + $0x6f4] sm:$0xf]  ;;  %v4974_v21 = vld [vmem:[#allocation20 + $0x708] sm:$0xf0]  ;;  %v5001_v22 = vor.u32 %v5590_v6, %v4998_v13  ;;  %v4902_v13 = vld [vmem:[#allocation20 + $0x678] sm:$0xf0] }
 0x277   :  { %v5464_v27 = vld [vmem:[#allocation20 + $0x334] sm:$0xf] }
 0x278   :  { %v1194_v31 = vadd.f32 %v1193_v23, %v1181_v26  ;;  %3075 = vmatmul.bf16.vlgmr.msra.gmra.mxu0 %v6173_v25  ;;  %v4521_v23 = vor.u32 %v5470_v14, %v4518_v15  ;;  %v4734_v26 = vld [vmem:[#allocation20 + $0x528] sm:$0xf0]  ;;  %v4236_v14 = vld [vmem:[#allocation20 + $0x128] sm:$0xf] }
 0x279   :  { %3171 = vmatpush.bf16.msra.mxu0 %v4641_v24  ;;  %v5524_v24 = vld [vmem:[#allocation20 + $0x514] sm:$0xf] }
 0x27a   :  { %vm1302_vm5 = vcmp.ge.f32.partialorder %v1194_v31, 0.0  ;;  %v1308_v36 = vmul.f32 0.01, %v1194_v31  ;;  %v4737_v33 = vor.u32 %v5524_v24, %v4734_v26 }
 0x27c   :  { %v1314_v39 = vsel %vm1302_vm5, %v1194_v31, %v1308_v36  ;;  %v657_v31 = vperm.slane %v6169_v5, 4 }
 0x27d   :  { %v6177_v41 = vpack.c.bf16 %v1314_v39, %v1314_v39  ;;  %v1182_v42 = vpop.f32.mrf.mxu2  ;;  %v1195_v43 = vpop.f32.mrf.mxu3  ;;  %3172 = vmatpush.bf16.msra.mxu0 %v4617_v32  ;;  %v5217_v32 = vor.u32 %v5644_v16, %v5214_v19  ;;  %v4977_v39 = vor.u32 %v5584_v20, %v4974_v21  ;;  %v5402_v19 = vld [vmem:[#allocation20 + $0x13c] sm:$0xf0]  ;;  %v5506_v20 = vld [vmem:[#allocation20 + $0x484] sm:$0xf]  ;;  %v4662_v21 = vld [vmem:[#allocation20 + $0x498] sm:$0xf0] }
 0x27e   :  { %v1206_v49 = vpop.f32.mrf.mxu0  ;;  %v1219_v50 = vpop.f32.mrf.mxu1  ;;  %v5578_v42 = vld [vmem:[#allocation20 + $0x6c4] sm:$0xf] }
 0x27f   :  { %v1207_v48 = vadd.f32 %v1206_v49, %v655_v38  ;;  %3088 = vmatmul.bf16.vlgmr.msra.gmra.mxu1 %v6177_v41  ;;  %v5518_v43 = vld [vmem:[#allocation20 + $0x4e4] sm:$0xf]  ;;  %v4470_v49 = vld [vmem:[#allocation20 + $0x318] sm:$0xf0] }
 0x280   :  { %3184 = vmatpush.bf16.msra.mxu1 %v4833_v40  ;;  %v4497_v40 = vor.u32 %v5464_v27, %v4494_v29  ;;  %v4473_v57 = vor.u32 %v5458_v46, %v4470_v49  ;;  %v5118_v27 = vld [vmem:[#allocation20 + $0x828] sm:$0xf0]  ;;  %v5456_v29 = vld [vmem:[#allocation20 + $0x2ec] sm:$0xf0]  ;;  %v5450_v46 = vld [vmem:[#allocation20 + $0x2bc] sm:$0xf0] }
 0x281   :  { %v1220_v54 = vadd.f32 %v1219_v50, %v1207_v48  ;;  %3173 = vmatpush.bf16.msra.mxu0 %v4593_v44  ;;  %v4710_v44 = vld [vmem:[#allocation20 + $0x4f8] sm:$0xf0]  ;;  %v5193_v48 = vor.u32 %v5638_v34, %v5190_v35  ;;  %v4212_v34 = vld [vmem:[#allocation20 + $0xf8] sm:$0xf] }
 0x283   :  { %vm1303_vm6 = vcmp.ge.f32.partialorder %v1220_v54, 0.0  ;;  %v1309_v62 = vmul.f32 0.01, %v1220_v54 }
 0x284   :  { %3185 = vmatpush.bf16.msra.mxu1 %v4809_v53  ;;  %v658_v53 = vperm.slane %v6169_v5, 5  ;;  %v5626_v5 = vld [vmem:[#allocation20 + $0x844] sm:$0xf] }
 0x285   :  { %v1315_v0 = vsel %vm1303_vm6, %v1220_v54, %v1309_v62  ;;  %v1232_v1 = vpop.f32.mrf.mxu2  ;;  %v1245_v2 = vpop.f32.mrf.mxu3  ;;  %3174 = vmatpush.bf16.msra.mxu0 %v4569_v55  ;;  %v4953_v54 = vor.u32 %v5578_v42, %v4950_v45  ;;  %v5632_v55 = vld [vmem:[#allocation20 + $0x874] sm:$0xf]  ;;  %v5408_v62 = vld [vmem:[#allocation20 + $0x16c] sm:$0xf0]  ;;  %v4428_v45 = vld [vmem:[#allocation20 + $0x2a8] sm:$0xf] }
 0x286   :  { %v6181_v9 = vpack.c.bf16 %v1315_v0, %v1315_v0  ;;  %v1233_v10 = vadd.f32 %v1232_v1, %v656_v52  ;;  %v1208_v11 = vpop.f32.mrf.mxu0  ;;  %v1221_v12 = vpop.f32.mrf.mxu1  ;;  %v4713_v52 = vor.u32 %v5518_v43, %v4710_v44  ;;  %v4686_v0 = vld [vmem:[#allocation20 + $0x4c8] sm:$0xf0]  ;;  %v5094_v44 = vld [vmem:[#allocation20 + $0x7f8] sm:$0xf0] }
 0x287   :  { %v5566_v12 = vld [vmem:[#allocation20 + $0x664] sm:$0xf] }
 0x288   :  { %v1246_v17 = vadd.f32 %v1245_v2, %v1233_v10  ;;  %3101 = vmatmul.bf16.vlgmr.msra.gmra.mxu2 %v6181_v9  ;;  %3186 = vmatpush.bf16.msra.mxu1 %v4785_v63  ;;  %v5512_v63 = vld [vmem:[#allocation20 + $0x4b4] sm:$0xf]  ;;  %v5169_v2 = vor.u32 %v5632_v55, %v5166_v56  ;;  %v4261_v10 = vor.u32 %v5408_v62, %v4260_v61  ;;  %v4644_v55 = vld [vmem:[#allocation20 + $0x458] sm:$0xf]  ;;  %v5504_v56 = vld [vmem:[#allocation20 + $0x46c] sm:$0xf0] }
 0x289   :  { %3197 = vmatpush.bf16.msra.mxu2 %v5025_v3  ;;  %3175 = vmatpush.bf16.msra.mxu0 %v4545_v4  ;;  %v4929_v3 = vor.u32 %v5572_v59, %v4926_v60  ;;  %v5142_v4 = vld [vmem:[#allocation20 + $0x858] sm:$0xf0]  ;;  %v4689_v11 = vor.u32 %v5512_v63, %v4686_v0  ;;  %v4905_v26 = vor.u32 %v5566_v12, %v4902_v13  ;;  %v5608_v60 = vld [vmem:[#allocation20 + $0x7b4] sm:$0xf]  ;;  %v5070_v61 = vld [vmem:[#allocation20 + $0x7c8] sm:$0xf0] }
 0x28a   :  { %vm1304_vm7 = vcmp.ge.f32.partialorder %v1246_v17, 0.0  ;;  %v1310_v28 = vmul.f32 0.01, %v1246_v17  ;;  %v4645_v63 = vor.u32 %v5504_v56, %v4644_v55  ;;  %v4404_v0 = vld [vmem:[#allocation20 + $0x278] sm:$0xf] }
 0x28b   :  { %v5438_v12 = vld [vmem:[#allocation20 + $0x25c] sm:$0xf0]  ;;  %v4308_v55 = vld [vmem:[#allocation20 + $0x1b8] sm:$0xf] }
 0x28c   :  { %v1316_v30 = vsel %vm1304_vm7, %v1246_v17, %v1310_v28  ;;  %3187 = vmatpush.bf16.msra.mxu1 %v4761_v18  ;;  %v4452_v28 = vld [vmem:[#allocation20 + $0x2d8] sm:$0xf] }
 0x28d   :  { %v6185_v36 = vpack.c.bf16 %v1316_v30, %v1316_v30  ;;  %v1234_v37 = vpop.f32.mrf.mxu2  ;;  %v1247_v38 = vpop.f32.mrf.mxu3  ;;  %3198 = vmatpush.bf16.msra.mxu2 %v5001_v22  ;;  %3176 = vmatpush.bf16.msra.mxu0 %v4521_v23  ;;  %v5145_v22 = vor.u32 %v5626_v5, %v5142_v4  ;;  %v5620_v23 = vld [vmem:[#allocation20 + $0x814] sm:$0xf]  ;;  %v4237_v30 = vor.u32 %v5402_v19, %v4236_v14  ;;  %v4620_v5 = vld [vmem:[#allocation20 + $0x428] sm:$0xf]  ;;  %v5498_v4 = vld [vmem:[#allocation20 + $0x43c] sm:$0xf0] }
 0x28e   :  { %v5396_v37 = vld [vmem:[#allocation20 + $0x10c] sm:$0xf0]  ;;  %v5121_v38 = vor.u32 %v5620_v23, %v5118_v27  ;;  %v4453_v42 = vor.u32 %v5456_v29, %v4452_v28  ;;  %v4621_v14 = vor.u32 %v5498_v4, %v4620_v5  ;;  %v5378_v19 = vld [vmem:[#allocation20 + $0x7c] sm:$0xf0]  ;;  %v4284_v5 = vld [vmem:[#allocation20 + $0x188] sm:$0xf] }
 0x28f   :  { %v1258_v50 = vpop.f32.mrf.mxu0  ;;  %v1271_v51 = vpop.f32.mrf.mxu1  ;;  %3114 = vmatmul.bf16.vlgmr.msra.gmra.mxu3 %v6185_v36  ;;  %v5432_v27 = vld [vmem:[#allocation20 + $0x22c] sm:$0xf0]  ;;  %v5414_v4 = vld [vmem:[#allocation20 + $0x19c] sm:$0xf0] }
 0x290   :  { %v1259_v47 = vadd.f32 %v1258_v50, %v657_v31  ;;  %3210 = vmatpush.bf16.msra.mxu3 %v5217_v32  ;;  %3188 = vmatpush.bf16.msra.mxu1 %v4737_v33  ;;  %v4665_v31 = vor.u32 %v5506_v20, %v4662_v21  ;;  %v5560_v32 = vld [vmem:[#allocation20 + $0x634] sm:$0xf]  ;;  %v4878_v33 = vld [vmem:[#allocation20 + $0x648] sm:$0xf0]  ;;  %v4596_v20 = vld [vmem:[#allocation20 + $0x3f8] sm:$0xf] }
 0x291   :  { %3199 = vmatpush.bf16.msra.mxu2 %v4977_v39  ;;  %3177 = vmatpush.bf16.msra.mxu0 %v4497_v40  ;;  %v5614_v39 = vld [vmem:[#allocation20 + $0x7e4] sm:$0xf]  ;;  %v4881_v43 = vor.u32 %v5560_v32, %v4878_v33  ;;  %v5492_v21 = vld [vmem:[#allocation20 + $0x40c] sm:$0xf0]  ;;  %v4116_v32 = vld [vmem:[#allocation20 + $0x38] sm:$0xf] }
 0x292   :  { %v1272_v58 = vadd.f32 %v1271_v51, %v1259_v47  ;;  %v4213_v47 = vor.u32 %v5396_v37, %v4212_v34  ;;  %v4597_v29 = vor.u32 %v5492_v21, %v4596_v20  ;;  %v5372_v33 = vld [vmem:[#allocation20 + $0x4c] sm:$0xf0]  ;;  %v4572_v34 = vld [vmem:[#allocation20 + $0x3c8] sm:$0xf] }
 0x293   :  { %v4716_v20 = vld [vmem:[#allocation20 + $0x4e8] sm:$0xf] }
 0x294   :  { %vm1305_vm8 = vcmp.ge.f32.partialorder %v1272_v58, 0.0  ;;  %v1311_v1 = vmul.f32 0.01, %v1272_v58  ;;  %3211 = vmatpush.bf16.msra.mxu3 %v5193_v48  ;;  %3189 = vmatpush.bf16.msra.mxu1 %v4713_v52  ;;  %v5554_v48 = vld [vmem:[#allocation20 + $0x604] sm:$0xf] }
 0x295   :  { %3200 = vmatpush.bf16.msra.mxu2 %v4953_v54  ;;  %3178 = vmatpush.bf16.msra.mxu0 %v4473_v57  ;;  %v4854_v52 = vld [vmem:[#allocation20 + $0x618] sm:$0xf0]  ;;  %v5390_v54 = vld [vmem:[#allocation20 + $0xdc] sm:$0xf0]  ;;  %v5097_v57 = vor.u32 %v5614_v39, %v5094_v44  ;;  %v4332_v39 = vld [vmem:[#allocation20 + $0x1e8] sm:$0xf] }
 0x296   :  { %v1317_v6 = vsel %vm1305_vm8, %v1272_v58, %v1311_v1  ;;  %v4429_v58 = vor.u32 %v5450_v46, %v4428_v45  ;;  %v4857_v59 = vor.u32 %v5554_v48, %v4854_v52  ;;  %v5444_v1 = vld [vmem:[#allocation20 + $0x28c] sm:$0xf0]  ;;  %v4788_v44 = vld [vmem:[#allocation20 + $0x578] sm:$0xf]  ;;  %v4092_v46 = vld [vmem:[#allocation20 + $0x8] sm:$0xf] }
 0x297   :  { %v1284_v7 = vpop.f32.mrf.mxu2  ;;  %v1297_v8 = vpop.f32.mrf.mxu3  ;;  %v6189_v15 = vpack.c.bf16 %v1317_v6, %v1317_v6  ;;  %v5073_v6 = vor.u32 %v5608_v60, %v5070_v61  ;;  %v5540_v45 = vld [vmem:[#allocation20 + $0x58c] sm:$0xf0]  ;;  %v5028_v48 = vld [vmem:[#allocation20 + $0x758] sm:$0xf]  ;;  %v5534_v60 = vld [vmem:[#allocation20 + $0x55c] sm:$0xf0] }
 0x298   :  { %v1285_v16 = vadd.f32 %v1284_v7, %v658_v53  ;;  %v1260_v17 = vpop.f32.mrf.mxu0  ;;  %v1273_v18 = vpop.f32.mrf.mxu1  ;;  %3212 = vmatpush.bf16.msra.mxu3 %v5169_v2  ;;  %3153 = vmatmul.bf16.vlgmr.msrb.gmra.mxu2 %v6173_v25  ;;  %v4188_v53 = vld [vmem:[#allocation20 + $0xc8] sm:$0xf]  ;;  %v4164_v2 = vld [vmem:[#allocation20 + $0x98] sm:$0xf]  ;;  %v5602_v7 = vld [vmem:[#allocation20 + $0x784] sm:$0xf] }
 0x299   :  { %3127 = vmatmul.bf16.vlgmr.msrb.gmra.mxu0 %v6189_v15  ;;  %3201 = vmatpush.bf16.msra.mxu2 %v4929_v3  ;;  %v4189_v62 = vor.u32 %v5390_v54, %v4188_v53  ;;  %v5384_v3 = vld [vmem:[#allocation20 + $0xac] sm:$0xf0]  ;;  %v4140_v18 = vld [vmem:[#allocation20 + $0x68] sm:$0xf]  ;;  %v4789_v54 = vor.u32 %v5540_v45, %v4788_v44  ;;  %v4932_v45 = vld [vmem:[#allocation20 + $0x698] sm:$0xf] }
 0x29a   :  { %v1298_v24 = vadd.f32 %v1297_v8, %v1285_v16  ;;  %3223 = vmatpush.bf16.msrb.mxu0 %v4261_v10  ;;  %3190 = vmatpush.bf16.msra.mxu1 %v4689_v11  ;;  %v4405_v8 = vor.u32 %v5444_v1, %v4404_v0  ;;  %v5046_v10 = vld [vmem:[#allocation20 + $0x798] sm:$0xf0]  ;;  %v4380_v11 = vld [vmem:[#allocation20 + $0x248] sm:$0xf]  ;;  %v4165_v13 = vor.u32 %v5384_v3, %v4164_v2  ;;  %v4836_v16 = vld [vmem:[#allocation20 + $0x5d8] sm:$0xf] }
 0x29b   :  { %v5552_v17 = vld [vmem:[#allocation20 + $0x5ec] sm:$0xf0]  ;;  %v4381_v23 = vor.u32 %v5438_v12, %v4380_v11  ;;  %v4141_v28 = vor.u32 %v5378_v19, %v4140_v18  ;;  %v5004_v0 = vld [vmem:[#allocation20 + $0x728] sm:$0xf]  ;;  %v5594_v1 = vld [vmem:[#allocation20 + $0x73c] sm:$0xf0]  ;;  %v4285_v18 = vor.u32 %v5414_v4, %v4284_v5 }
 0x29c   :  { %vm1306_vm9 = vcmp.ge.f32.partialorder %v1298_v24, 0.0  ;;  %v1312_v35 = vmul.f32 0.01, %v1298_v24  ;;  %3213 = vmatpush.bf16.msra.mxu3 %v5145_v22  ;;  %v5049_v22 = vor.u32 %v5602_v7, %v5046_v10  ;;  %v5600_v52 = vld [vmem:[#allocation20 + $0x76c] sm:$0xf0]  ;;  %v5005_v11 = vor.u32 %v5594_v1, %v5004_v0 }
 0x29d   :  { %3202 = vmatpush.bf16.msra.mxu2 %v4905_v26  ;;  %v4356_v26 = vld [vmem:[#allocation20 + $0x218] sm:$0xf]  ;;  %v5029_v61 = vor.u32 %v5600_v52, %v5028_v48  ;;  %v5648_v12 = vld [vmem:[#allocation20 + $0x8ec] sm:$0xf0]  ;;  %v4668_v48 = vld [vmem:[#allocation20 + $0x488] sm:$0xf] }
 0x29e   :  { %v1318_v40 = vsel %vm1306_vm9, %v1298_v24, %v1312_v35  ;;  %3224 = vmatpush.bf16.msrb.mxu0 %v4237_v30  ;;  %3191 = vmatpush.bf16.msra.mxu1 %v4665_v31  ;;  %v4837_v24 = vor.u32 %v5552_v17, %v4836_v16  ;;  %v4812_v30 = vld [vmem:[#allocation20 + $0x5a8] sm:$0xf]  ;;  %v5546_v31 = vld [vmem:[#allocation20 + $0x5bc] sm:$0xf0]  ;;  %v4357_v37 = vor.u32 %v5432_v27, %v4356_v26  ;;  %v4740_v7 = vld [vmem:[#allocation20 + $0x518] sm:$0xf] }
 0x29f   :  { %v6193_v49 = vpack.c.bf16 %v1318_v40, %v1318_v40  ;;  %v1286_v50 = vpop.f32.mrf.mxu2  ;;  %v1299_v51 = vpop.f32.mrf.mxu3  ;;  %3166 = vmatmul.bf16.vlgmr.msrb.gmra.mxu3 %v6177_v41  ;;  %v5486_v35 = vld [vmem:[#allocation20 + $0x3dc] sm:$0xf0]  ;;  %v5220_v10 = vld [vmem:[#allocation20 + $0x8d8] sm:$0xf]  ;;  %v5588_v17 = vld [vmem:[#allocation20 + $0x70c] sm:$0xf0] }
 0x2a0   :  { %3214 = vmatpush.bf16.msra.mxu3 %v5121_v38  ;;  %v4813_v38 = vor.u32 %v5546_v31, %v4812_v30  ;;  %v5426_v40 = vld [vmem:[#allocation20 + $0x1fc] sm:$0xf0]  ;;  %v4548_v51 = vld [vmem:[#allocation20 + $0x398] sm:$0xf]  ;;  %v5221_v21 = vor.u32 %v5648_v12, %v5220_v10  ;;  %v4956_v30 = vld [vmem:[#allocation20 + $0x6c8] sm:$0xf] }
 0x2a1   :  { %3140 = vmatmul.bf16.vlgmr.msrb.gmra.mxu1 %v6193_v49  ;;  %3203 = vmatpush.bf16.msra.mxu2 %v4881_v43  ;;  %v4573_v43 = vor.u32 %v5486_v35, %v4572_v34  ;;  %v5366_v50 = vld [vmem:[#allocation20 + $0x1c] sm:$0xf0]  ;;  %v4333_v53 = vor.u32 %v5426_v40, %v4332_v39  ;;  %v4980_v16 = vld [vmem:[#allocation20 + $0x6f8] sm:$0xf]  ;;  %v5516_v39 = vld [vmem:[#allocation20 + $0x4cc] sm:$0xf0] }
 0x2a2   :  { %3236 = vmatpush.bf16.msrb.mxu1 %v4453_v42  ;;  %3225 = vmatpush.bf16.msrb.mxu0 %v4213_v47  ;;  %v4117_v42 = vor.u32 %v5372_v33, %v4116_v32  ;;  %v5480_v47 = vld [vmem:[#allocation20 + $0x3ac] sm:$0xf0]  ;;  %v4093_v56 = vor.u32 %v5366_v50, %v4092_v46  ;;  %v5642_v26 = vld [vmem:[#allocation20 + $0x8bc] sm:$0xf0]  ;;  %v4981_v27 = vor.u32 %v5588_v17, %v4980_v16  ;;  %v5405_v32 = vld [vmem:[#allocation20 + $0x15c] sm:$0xf] }
 0x2a3   :  { %v5582_v31 = vld [vmem:[#allocation20 + $0x6dc] sm:$0xf0]  ;;  %v4262_v33 = vld [vmem:[#allocation20 + $0x170] sm:$0xf0]  ;;  %v5636_v44 = vld [vmem:[#allocation20 + $0x88c] sm:$0xf0] }
 0x2a4   :  { %3215 = vmatpush.bf16.msra.mxu3 %v5097_v57  ;;  %v4549_v57 = vor.u32 %v5480_v47, %v4548_v51  ;;  %v4957_v40 = vor.u32 %v5582_v31, %v4956_v30  ;;  %v5576_v46 = vld [vmem:[#allocation20 + $0x6ac] sm:$0xf0]  ;;  %v5399_v50 = vld [vmem:[#allocation20 + $0x12c] sm:$0xf]  ;;  %v4238_v51 = vld [vmem:[#allocation20 + $0x140] sm:$0xf0] }
 0x2a5   :  { %3204 = vmatpush.bf16.msra.mxu2 %v4857_v59  ;;  %v4764_v59 = vld [vmem:[#allocation20 + $0x548] sm:$0xf]  ;;  %v5624_v5 = vld [vmem:[#allocation20 + $0x82c] sm:$0xf0]  ;;  %v4884_v10 = vld [vmem:[#allocation20 + $0x638] sm:$0xf] }
 0x2a6   :  { %3237 = vmatpush.bf16.msrb.mxu1 %v4429_v58  ;;  %3226 = vmatpush.bf16.msrb.mxu0 %v4189_v62  ;;  %v5420_v58 = vld [vmem:[#allocation20 + $0x1cc] sm:$0xf0]  ;;  %v4524_v62 = vld [vmem:[#allocation20 + $0x368] sm:$0xf]  ;;  %v4765_v3 = vor.u32 %v5534_v60, %v4764_v59  ;;  %v4454_v59 = vld [vmem:[#allocation20 + $0x2f0] sm:$0xf0] }
 0x2a7   :  { %v4309_v2 = vor.u32 %v5420_v58, %v4308_v55  ;;  %v5630_v55 = vld [vmem:[#allocation20 + $0x85c] sm:$0xf0]  ;;  %v5453_v58 = vld [vmem:[#allocation20 + $0x2dc] sm:$0xf]  ;;  %v4908_v60 = vld [vmem:[#allocation20 + $0x668] sm:$0xf] }
 0x2a8   :  { %3216 = vmatpush.bf16.msra.mxu3 %v5073_v6  ;;  %3205 = vmatmul.bf16.vlgmr.msra.gmra.mxu2 %v6189_v15  ;;  %v5387_v12 = vld [vmem:[#allocation20 + $0xcc] sm:$0xf]  ;;  %v5100_v17 = vld [vmem:[#allocation20 + $0x7e8] sm:$0xf] }
 0x2a9   :  { %3249 = vmatpush.bf16.msrb.mxu2 %v4645_v63  ;;  %3179 = vmatmul.bf16.vlgmr.msra.gmra.mxu0 %v6181_v9  ;;  %v5474_v63 = vld [vmem:[#allocation20 + $0x37c] sm:$0xf0] }
 0x2aa   :  { %3238 = vmatpush.bf16.msrb.mxu1 %v4405_v8  ;;  %3227 = vmatpush.bf16.msrb.mxu0 %v4165_v13  ;;  %v4525_v6 = vor.u32 %v5474_v63, %v4524_v62  ;;  %v5528_v8 = vld [vmem:[#allocation20 + $0x52c] sm:$0xf0]  ;;  %v4500_v13 = vld [vmem:[#allocation20 + $0x338] sm:$0xf]  ;;  %v5393_v62 = vld [vmem:[#allocation20 + $0xfc] sm:$0xf] }
 0x2ab   :  { %v4741_v19 = vor.u32 %v5528_v8, %v4740_v7  ;;  %v4214_v63 = vld [vmem:[#allocation20 + $0x110] sm:$0xf0]  ;;  %v5447_v7 = vld [vmem:[#allocation20 + $0x2ac] sm:$0xf]  ;;  %v4430_v8 = vld [vmem:[#allocation20 + $0x2c0] sm:$0xf0] }
 0x2ac   :  { %3217 = vmatpush.bf16.msra.mxu3 %v5049_v22  ;;  %v4433_v16 = vor.u32 %v5447_v7, %v4430_v8  ;;  %v5483_v7 = vld [vmem:[#allocation20 + $0x3cc] sm:$0xf]  ;;  %v4574_v8 = vld [vmem:[#allocation20 + $0x3e0] sm:$0xf0] }
 0x2ad   :  { %3250 = vmatpush.bf16.msrb.mxu2 %v4621_v14  ;;  %v5468_v14 = vld [vmem:[#allocation20 + $0x34c] sm:$0xf0] }
 0x2ae   :  { %3239 = vmatpush.bf16.msrb.mxu1 %v4381_v23  ;;  %3228 = vmatpush.bf16.msrb.mxu0 %v4141_v28  ;;  %v4501_v22 = vor.u32 %v5468_v14, %v4500_v13  ;;  %v5522_v23 = vld [vmem:[#allocation20 + $0x4fc] sm:$0xf0]  ;;  %v4476_v28 = vld [vmem:[#allocation20 + $0x308] sm:$0xf]  ;;  %v4190_v13 = vld [vmem:[#allocation20 + $0xe0] sm:$0xf0] }
 0x2af   :  { %3218 = vmatmul.bf16.vlgmr.msra.gmra.mxu3 %v6193_v49  ;;  %v4717_v34 = vor.u32 %v5522_v23, %v4716_v20  ;;  %v4193_v20 = vor.u32 %v5387_v12, %v4190_v13  ;;  %v4860_v23 = vld [vmem:[#allocation20 + $0x608] sm:$0xf] }
 0x2b0   :  { %3262 = vmatpush.bf16.msrb.mxu3 %v4837_v24  ;;  %v5196_v24 = vld [vmem:[#allocation20 + $0x8a8] sm:$0xf] }
 0x2b1   :  { %3251 = vmatpush.bf16.msrb.mxu2 %v4597_v29  ;;  %3192 = vmatmul.bf16.vlgmr.msra.gmra.mxu1 %v6185_v36  ;;  %v5462_v29 = vld [vmem:[#allocation20 + $0x31c] sm:$0xf0]  ;;  %v5197_v35 = vor.u32 %v5642_v26, %v5196_v24  ;;  %v5381_v26 = vld [vmem:[#allocation20 + $0x9c] sm:$0xf] }
 0x2b2   :  { %3240 = vmatpush.bf16.msrb.mxu1 %v4357_v37  ;;  %3229 = vmatpush.bf16.msrb.mxu0 %v4117_v42  ;;  %v4477_v37 = vor.u32 %v5462_v29, %v4476_v28  ;;  %v4265_v42 = vor.u32 %v5405_v32, %v4262_v33  ;;  %v5558_v24 = vld [vmem:[#allocation20 + $0x61c] sm:$0xf0]  ;;  %v5501_v28 = vld [vmem:[#allocation20 + $0x45c] sm:$0xf]  ;;  %v4646_v29 = vld [vmem:[#allocation20 + $0x470] sm:$0xf0] }
 0x2b3   :  { %v4861_v32 = vor.u32 %v5558_v24, %v4860_v23  ;;  %v4550_v23 = vld [vmem:[#allocation20 + $0x3b0] sm:$0xf0]  ;;  %v5591_v24 = vld [vmem:[#allocation20 + $0x72c] sm:$0xf] }
 0x2b4   :  { %3263 = vmatpush.bf16.msrb.mxu3 %v4813_v38  ;;  %v4692_v38 = vld [vmem:[#allocation20 + $0x4b8] sm:$0xf] }
 0x2b5   :  { %3252 = vmatpush.bf16.msrb.mxu2 %v4573_v43  ;;  %v5172_v43 = vld [vmem:[#allocation20 + $0x878] sm:$0xf]  ;;  %v4693_v47 = vor.u32 %v5516_v39, %v4692_v38  ;;  %v4649_v38 = vor.u32 %v5501_v28, %v4646_v29  ;;  %v4382_v39 = vld [vmem:[#allocation20 + $0x260] sm:$0xf0]  ;;  %v5411_v29 = vld [vmem:[#allocation20 + $0x18c] sm:$0xf] }
 0x2b6   :  { %3241 = vmatpush.bf16.msrb.mxu1 %v4333_v53  ;;  %3230 = vmatpush.bf16.msrb.mxu0 %v4093_v56  ;;  %v5173_v52 = vor.u32 %v5636_v44, %v5172_v43  ;;  %v5510_v53 = vld [vmem:[#allocation20 + $0x49c] sm:$0xf0]  ;;  %v4933_v56 = vor.u32 %v5576_v46, %v4932_v45  ;;  %v5495_v43 = vld [vmem:[#allocation20 + $0x42c] sm:$0xf]  ;;  %v4622_v44 = vld [vmem:[#allocation20 + $0x440] sm:$0xf0] }
 0x2b7   :  { %v4669_v0 = vor.u32 %v5510_v53, %v4668_v48  ;;  %v5052_v46 = vld [vmem:[#allocation20 + $0x788] sm:$0xf]  ;;  %v5429_v48 = vld [vmem:[#allocation20 + $0x21c] sm:$0xf]  ;;  %v4625_v53 = vor.u32 %v5495_v43, %v4622_v44 }
 0x2b8   :  { %3264 = vmatpush.bf16.msrb.mxu3 %v4789_v54  ;;  %v5148_v54 = vld [vmem:[#allocation20 + $0x848] sm:$0xf] }
 0x2b9   :  { %3253 = vmatpush.bf16.msrb.mxu2 %v4549_v57  ;;  %3231 = vmatmul.bf16.vlgmr.msrb.gmra.mxu0 %v6173_v25  ;;  %v4241_v57 = vor.u32 %v5399_v50, %v4238_v51  ;;  %v5149_v1 = vor.u32 %v5630_v55, %v5148_v54  ;;  %v5549_v54 = vld [vmem:[#allocation20 + $0x5dc] sm:$0xf]  ;;  %v4838_v55 = vld [vmem:[#allocation20 + $0x5f0] sm:$0xf0] }
 0x2ba   :  { %3275 = vmatpush.bf16.msra.mxu0 %v5029_v61  ;;  %3242 = vmatpush.bf16.msrb.mxu1 %v4309_v2  ;;  %v5570_v61 = vld [vmem:[#allocation20 + $0x67c] sm:$0xf0]  ;;  %v4457_v2 = vor.u32 %v5453_v58, %v4454_v59  ;;  %v5489_v58 = vld [vmem:[#allocation20 + $0x3fc] sm:$0xf]  ;;  %v4598_v59 = vld [vmem:[#allocation20 + $0x410] sm:$0xf0] }
 0x2bb   :  { %v4909_v4 = vor.u32 %v5570_v61, %v4908_v60 }
 0x2bc   :  { %3265 = vmatpush.bf16.msrb.mxu3 %v4765_v3  ;;  %v5124_v3 = vld [vmem:[#allocation20 + $0x818] sm:$0xf] }
 0x2bd   :  { %3254 = vmatpush.bf16.msrb.mxu2 %v4525_v6  ;;  %v4217_v6 = vor.u32 %v5393_v62, %v4214_v63  ;;  %v5125_v14 = vor.u32 %v5624_v5, %v5124_v3  ;;  %v4841_v62 = vor.u32 %v5549_v54, %v4838_v55  ;;  %v5423_v63 = vld [vmem:[#allocation20 + $0x1ec] sm:$0xf]  ;;  %v4814_v5 = vld [vmem:[#allocation20 + $0x5c0] sm:$0xf0]  ;;  %v4502_v54 = vld [vmem:[#allocation20 + $0x350] sm:$0xf0] }
 0x2be   :  { %3276 = vmatpush.bf16.msra.mxu0 %v5005_v11  ;;  %3243 = vmatpush.bf16.msrb.mxu1 %v4285_v18  ;;  %v5564_v11 = vld [vmem:[#allocation20 + $0x64c] sm:$0xf0]  ;;  %v5618_v18 = vld [vmem:[#allocation20 + $0x7fc] sm:$0xf0]  ;;  %v5543_v3 = vld [vmem:[#allocation20 + $0x5ac] sm:$0xf] }
 0x2bf   :  { %v5101_v30 = vor.u32 %v5618_v18, %v5100_v17  ;;  %v4817_v13 = vor.u32 %v5543_v3, %v4814_v5  ;;  %v4577_v17 = vor.u32 %v5483_v7, %v4574_v8  ;;  %v4310_v18 = vld [vmem:[#allocation20 + $0x1d0] sm:$0xf0]  ;;  %v5579_v55 = vld [vmem:[#allocation20 + $0x6cc] sm:$0xf]  ;;  %v5573_v3 = vld [vmem:[#allocation20 + $0x69c] sm:$0xf] }
 0x2c0   :  { %3266 = vmatpush.bf16.msrb.mxu3 %v4741_v19  ;;  %v4885_v19 = vor.u32 %v5564_v11, %v4884_v10  ;;  %v5597_v10 = vld [vmem:[#allocation20 + $0x75c] sm:$0xf]  ;;  %v5030_v11 = vld [vmem:[#allocation20 + $0x770] sm:$0xf0] }
 0x2c1   :  { %3255 = vmatpush.bf16.msrb.mxu2 %v4501_v22  ;;  %3244 = vmatmul.bf16.vlgmr.msrb.gmra.mxu1 %v6177_v41  ;;  %v4406_v22 = vld [vmem:[#allocation20 + $0x290] sm:$0xf0] }
 0x2c2   :  { %3288 = vmatpush.bf16.msra.mxu1 %v5221_v21  ;;  %3277 = vmatpush.bf16.msra.mxu0 %v4981_v27  ;;  %v5441_v21 = vld [vmem:[#allocation20 + $0x27c] sm:$0xf]  ;;  %v4166_v27 = vld [vmem:[#allocation20 + $0xb0] sm:$0xf0] }
 0x2c3   :  { %v4409_v31 = vor.u32 %v5441_v21, %v4406_v22  ;;  %v4169_v33 = vor.u32 %v5381_v26, %v4166_v27  ;;  %v5033_v21 = vor.u32 %v5597_v10, %v5030_v11  ;;  %v5477_v22 = vld [vmem:[#allocation20 + $0x39c] sm:$0xf]  ;;  %v5006_v26 = vld [vmem:[#allocation20 + $0x740] sm:$0xf0]  ;;  %v4934_v5 = vld [vmem:[#allocation20 + $0x6b0] sm:$0xf0] }
 0x2c4   :  { %3267 = vmatpush.bf16.msrb.mxu3 %v4717_v34  ;;  %v5076_v34 = vld [vmem:[#allocation20 + $0x7b8] sm:$0xf]  ;;  %v5513_v11 = vld [vmem:[#allocation20 + $0x4bc] sm:$0xf] }
 0x2c5   :  { %3256 = vmatpush.bf16.msrb.mxu2 %v4477_v37  ;;  %v5435_v37 = vld [vmem:[#allocation20 + $0x24c] sm:$0xf] }
 0x2c6   :  { %3289 = vmatpush.bf16.msra.mxu1 %v5197_v35  ;;  %3278 = vmatpush.bf16.msra.mxu0 %v4957_v40  ;;  %v5612_v35 = vld [vmem:[#allocation20 + $0x7cc] sm:$0xf0]  ;;  %v5375_v40 = vld [vmem:[#allocation20 + $0x6c] sm:$0xf]  ;;  %v4385_v50 = vor.u32 %v5435_v37, %v4382_v39  ;;  %v5222_v37 = vld [vmem:[#allocation20 + $0x8f0] sm:$0xf0] }
 0x2c7   :  { %v5077_v45 = vor.u32 %v5612_v35, %v5076_v34  ;;  %v5645_v34 = vld [vmem:[#allocation20 + $0x8dc] sm:$0xf]  ;;  %v5009_v35 = vor.u32 %v5591_v24, %v5006_v26  ;;  %v4526_v39 = vld [vmem:[#allocation20 + $0x380] sm:$0xf0] }
 0x2c8   :  { %3268 = vmatpush.bf16.msrb.mxu3 %v4693_v47  ;;  %3257 = vmatmul.bf16.vlgmr.msrb.gmra.mxu2 %v6181_v9  ;;  %v5606_v47 = vld [vmem:[#allocation20 + $0x79c] sm:$0xf0]  ;;  %v4670_v26 = vld [vmem:[#allocation20 + $0x4a0] sm:$0xf0] }
 0x2c9   :  { %3301 = vmatpush.bf16.msra.mxu2 %v4265_v42  ;;  %v4142_v42 = vld [vmem:[#allocation20 + $0x80] sm:$0xf0]  ;;  %v5053_v60 = vor.u32 %v5606_v47, %v5052_v46  ;;  %v5639_v47 = vld [vmem:[#allocation20 + $0x8ac] sm:$0xf] }
 0x2ca   :  { %3290 = vmatpush.bf16.msra.mxu1 %v5173_v52  ;;  %3279 = vmatpush.bf16.msra.mxu0 %v4933_v56  ;;  %v4145_v51 = vor.u32 %v5375_v40, %v4142_v42  ;;  %v4358_v52 = vld [vmem:[#allocation20 + $0x230] sm:$0xf0]  ;;  %v5369_v56 = vld [vmem:[#allocation20 + $0x3c] sm:$0xf] }
 0x2cb   :  { %v4361_v61 = vor.u32 %v5429_v48, %v4358_v52  ;;  %v5585_v40 = vld [vmem:[#allocation20 + $0x6fc] sm:$0xf]  ;;  %v4982_v42 = vld [vmem:[#allocation20 + $0x710] sm:$0xf0]  ;;  %v5198_v52 = vld [vmem:[#allocation20 + $0x8c0] sm:$0xf0] }
 0x2cc   :  { %3269 = vmatpush.bf16.msrb.mxu3 %v4669_v0  ;;  %v4334_v0 = vld [vmem:[#allocation20 + $0x200] sm:$0xf0]  ;;  %v4985_v48 = vor.u32 %v5585_v40, %v4982_v42  ;;  %v5615_v42 = vld [vmem:[#allocation20 + $0x7ec] sm:$0xf] }
 0x2cd   :  { %3302 = vmatpush.bf16.msra.mxu2 %v4241_v57  ;;  %v4118_v57 = vld [vmem:[#allocation20 + $0x50] sm:$0xf0]  ;;  %v4337_v12 = vor.u32 %v5423_v63, %v4334_v0 }
 0x2ce   :  { %3291 = vmatpush.bf16.msra.mxu1 %v5149_v1  ;;  %3280 = vmatpush.bf16.msra.mxu0 %v4909_v4  ;;  %v4121_v1 = vor.u32 %v5369_v56, %v4118_v57  ;;  %v5363_v4 = vld [vmem:[#allocation20 + $0xc] sm:$0xf]  ;;  %v4958_v56 = vld [vmem:[#allocation20 + $0x6e0] sm:$0xf0]  ;;  %v5174_v63 = vld [vmem:[#allocation20 + $0x890] sm:$0xf0] }
 0x2cf   :  { %3270 = vmatmul.bf16.vlgmr.msrb.gmra.mxu3 %v6185_v36  ;;  %v4961_v0 = vor.u32 %v5579_v55, %v4958_v56  ;;  %v5505_v55 = vld [vmem:[#allocation20 + $0x474] sm:$0xf0] }
 0x2d0   :  { %3314 = vmatpush.bf16.msra.mxu3 %v4457_v2  ;;  %v4601_v2 = vor.u32 %v5489_v58, %v4598_v59  ;;  %v5519_v58 = vld [vmem:[#allocation20 + $0x4ec] sm:$0xf]  ;;  %v5201_v59 = vor.u32 %v5639_v47, %v5198_v52  ;;  %v4196_v52 = vld [vmem:[#allocation20 + $0xd0] sm:$0xf] }
 0x2d1   :  { %3303 = vmatpush.bf16.msra.mxu2 %v4217_v6  ;;  %v4094_v6 = vld [vmem:[#allocation20 + $0x20] sm:$0xf0]  ;;  %v5555_v47 = vld [vmem:[#allocation20 + $0x60c] sm:$0xf] }
 0x2d2   :  { %3292 = vmatpush.bf16.msra.mxu1 %v5125_v14  ;;  %3281 = vmatpush.bf16.msra.mxu0 %v4885_v19  ;;  %v5417_v14 = vld [vmem:[#allocation20 + $0x1bc] sm:$0xf] }
 0x2d3   :  { %v5537_v19 = vld [vmem:[#allocation20 + $0x57c] sm:$0xf]  ;;  %v4313_v27 = vor.u32 %v5417_v14, %v4310_v18  ;;  %v5567_v18 = vld [vmem:[#allocation20 + $0x66c] sm:$0xf] }
 0x2d4   :  { %3315 = vmatpush.bf16.msra.mxu3 %v4433_v16  ;;  %v4097_v16 = vor.u32 %v5363_v4, %v4094_v6  ;;  %v4268_v4 = vld [vmem:[#allocation20 + $0x160] sm:$0xf]  ;;  %v5409_v6 = vld [vmem:[#allocation20 + $0x174] sm:$0xf0] }
 0x2d5   :  { %3304 = vmatpush.bf16.msra.mxu2 %v4193_v20  ;;  %v4790_v20 = vld [vmem:[#allocation20 + $0x590] sm:$0xf0]  ;;  %v4269_v14 = vor.u32 %v5409_v6, %v4268_v4 }
 0x2d6   :  { %3293 = vmatpush.bf16.msra.mxu1 %v5101_v30  ;;  %3282 = vmatpush.bf16.msra.mxu0 %v4861_v32  ;;  %v4793_v28 = vor.u32 %v5537_v19, %v4790_v20  ;;  %v4286_v30 = vld [vmem:[#allocation20 + $0x1a0] sm:$0xf0]  ;;  %v5531_v32 = vld [vmem:[#allocation20 + $0x54c] sm:$0xf]  ;;  %v4244_v20 = vld [vmem:[#allocation20 + $0x130] sm:$0xf] }
 0x2d7   :  { %v4289_v43 = vor.u32 %v5411_v29, %v4286_v30  ;;  %v4910_v19 = vld [vmem:[#allocation20 + $0x680] sm:$0xf0] }
 0x2d8   :  { %3316 = vmatpush.bf16.msra.mxu3 %v4409_v31  ;;  %v4553_v31 = vor.u32 %v5477_v22, %v4550_v23  ;;  %v5507_v23 = vld [vmem:[#allocation20 + $0x48c] sm:$0xf]  ;;  %v4913_v29 = vor.u32 %v5567_v18, %v4910_v19  ;;  %v5553_v18 = vld [vmem:[#allocation20 + $0x5f4] sm:$0xf0]  ;;  %v4148_v19 = vld [vmem:[#allocation20 + $0x70] sm:$0xf] }
 0x2d9   :  { %3305 = vmatpush.bf16.msra.mxu2 %v4169_v33  ;;  %3283 = vmatmul.bf16.vlgmr.msra.gmra.mxu0 %v6189_v15  ;;  %v4766_v33 = vld [vmem:[#allocation20 + $0x560] sm:$0xf0] }
 0x2da   :  { %3327 = vmatpush.bf16.msrb.mxu0 %v4649_v38  ;;  %3294 = vmatpush.bf16.msra.mxu1 %v5077_v45  ;;  %v5471_v38 = vld [vmem:[#allocation20 + $0x36c] sm:$0xf]  ;;  %v4769_v44 = vor.u32 %v5531_v32, %v4766_v33  ;;  %v5225_v45 = vor.u32 %v5645_v34, %v5222_v37  ;;  %v5457_v32 = vld [vmem:[#allocation20 + $0x2f4] sm:$0xf0]  ;;  %v5561_v33 = vld [vmem:[#allocation20 + $0x63c] sm:$0xf] }
 0x2db   :  { %v4529_v46 = vor.u32 %v5471_v38, %v4526_v39  ;;  %v4886_v34 = vld [vmem:[#allocation20 + $0x650] sm:$0xf0]  ;;  %v5397_v37 = vld [vmem:[#allocation20 + $0x114] sm:$0xf0]  ;;  %v4673_v38 = vor.u32 %v5507_v23, %v4670_v26 }
 0x2dc   :  { %3317 = vmatpush.bf16.msra.mxu3 %v4385_v50  ;;  %v5525_v50 = vld [vmem:[#allocation20 + $0x51c] sm:$0xf] }
 0x2dd   :  { %3306 = vmatpush.bf16.msra.mxu2 %v4145_v51  ;;  %v4742_v51 = vld [vmem:[#allocation20 + $0x530] sm:$0xf0] }
 0x2de   :  { %3328 = vmatpush.bf16.msrb.mxu0 %v4625_v53  ;;  %3295 = vmatpush.bf16.msra.mxu1 %v5053_v60  ;;  %v5465_v53 = vld [vmem:[#allocation20 + $0x33c] sm:$0xf]  ;;  %v4745_v57 = vor.u32 %v5525_v50, %v4742_v51  ;;  %v4436_v50 = vld [vmem:[#allocation20 + $0x2b0] sm:$0xf]  ;;  %v5451_v51 = vld [vmem:[#allocation20 + $0x2c4] sm:$0xf0] }
 0x2df   :  { %v4505_v60 = vor.u32 %v5465_v53, %v4502_v54  ;;  %v5391_v53 = vld [vmem:[#allocation20 + $0xe4] sm:$0xf0]  ;;  %v4652_v54 = vld [vmem:[#allocation20 + $0x460] sm:$0xf] }
 0x2e0   :  { %3318 = vmatpush.bf16.msra.mxu3 %v4361_v61  ;;  %v4718_v61 = vld [vmem:[#allocation20 + $0x500] sm:$0xf0] }
 0x2e1   :  { %3307 = vmatpush.bf16.msra.mxu2 %v4121_v1  ;;  %3296 = vmatmul.bf16.vlgmr.msra.gmra.mxu1 %v6193_v49  ;;  %v5459_v1 = vld [vmem:[#allocation20 + $0x30c] sm:$0xf]  ;;  %v4721_v7 = vor.u32 %v5519_v58, %v4718_v61  ;;  %v5609_v58 = vld [vmem:[#allocation20 + $0x7bc] sm:$0xf]  ;;  %v5078_v61 = vld [vmem:[#allocation20 + $0x7d0] sm:$0xf0] }
 0x2e2   :  { %3340 = vmatpush.bf16.msrb.mxu1 %v4841_v62  ;;  %3329 = vmatpush.bf16.msrb.mxu0 %v4601_v2  ;;  %v5633_v62 = vld [vmem:[#allocation20 + $0x87c] sm:$0xf]  ;;  %v4478_v2 = vld [vmem:[#allocation20 + $0x320] sm:$0xf0]  ;;  %v5081_v6 = vor.u32 %v5609_v58, %v5078_v61 }
 0x2e3   :  { %v5177_v8 = vor.u32 %v5633_v62, %v5174_v63  ;;  %v4481_v10 = vor.u32 %v5459_v1, %v4478_v2  ;;  %v4412_v62 = vld [vmem:[#allocation20 + $0x280] sm:$0xf]  ;;  %v5445_v63 = vld [vmem:[#allocation20 + $0x294] sm:$0xf0] }
 0x2e4   :  { %3319 = vmatpush.bf16.msra.mxu3 %v4337_v12  ;;  %v4694_v12 = vld [vmem:[#allocation20 + $0x4d0] sm:$0xf0]  ;;  %v4172_v1 = vld [vmem:[#allocation20 + $0xa0] sm:$0xf]  ;;  %v5385_v2 = vld [vmem:[#allocation20 + $0xb4] sm:$0xf0] }
 0x2e5   :  { %3308 = vmatpush.bf16.msra.mxu2 %v4097_v16  ;;  %v5627_v16 = vld [vmem:[#allocation20 + $0x84c] sm:$0xf]  ;;  %v4697_v22 = vor.u32 %v5513_v11, %v4694_v12  ;;  %v4173_v12 = vor.u32 %v5385_v2, %v4172_v1  ;;  %v4532_v1 = vld [vmem:[#allocation20 + $0x370] sm:$0xf] }
 0x2e6   :  { %3341 = vmatpush.bf16.msrb.mxu1 %v4817_v13  ;;  %3330 = vmatpush.bf16.msrb.mxu0 %v4577_v17  ;;  %v4937_v13 = vor.u32 %v5573_v3, %v4934_v5  ;;  %v5150_v17 = vld [vmem:[#allocation20 + $0x860] sm:$0xf0]  ;;  %v4628_v3 = vld [vmem:[#allocation20 + $0x430] sm:$0xf]  ;;  %v5499_v5 = vld [vmem:[#allocation20 + $0x444] sm:$0xf0] }
 0x2e7   :  { %v5153_v24 = vor.u32 %v5627_v16, %v5150_v17  ;;  %v4844_v16 = vld [vmem:[#allocation20 + $0x5e0] sm:$0xf]  ;;  %v4629_v17 = vor.u32 %v5499_v5, %v4628_v3  ;;  %v5475_v3 = vld [vmem:[#allocation20 + $0x384] sm:$0xf0]  ;;  %v5012_v5 = vld [vmem:[#allocation20 + $0x730] sm:$0xf] }
 0x2e8   :  { %3320 = vmatpush.bf16.msra.mxu3 %v4313_v27  ;;  %3309 = vmatmul.bf16.vlgmr.msra.gmra.mxu2 %v6173_v25  ;;  %v5621_v27 = vld [vmem:[#allocation20 + $0x81c] sm:$0xf]  ;;  %v4845_v26 = vor.u32 %v5553_v18, %v4844_v16  ;;  %v4533_v16 = vor.u32 %v5475_v3, %v4532_v1  ;;  %v5228_v18 = vld [vmem:[#allocation20 + $0x8e0] sm:$0xf]  ;;  %v5511_v1 = vld [vmem:[#allocation20 + $0x4a4] sm:$0xf0] }
 0x2e9   :  { %3353 = vmatpush.bf16.msrb.mxu2 %v5033_v21  ;;  %v5403_v21 = vld [vmem:[#allocation20 + $0x144] sm:$0xf0] }
 0x2ea   :  { %3342 = vmatpush.bf16.msrb.mxu1 %v4793_v28  ;;  %3331 = vmatpush.bf16.msrb.mxu0 %v4553_v31  ;;  %v5126_v28 = vld [vmem:[#allocation20 + $0x830] sm:$0xf0]  ;;  %v4245_v30 = vor.u32 %v5403_v21, %v4244_v20  ;;  %v4460_v31 = vld [vmem:[#allocation20 + $0x2e0] sm:$0xf]  ;;  %v5379_v20 = vld [vmem:[#allocation20 + $0x84] sm:$0xf0] }
 0x2eb   :  { %v5129_v39 = vor.u32 %v5621_v27, %v5126_v28  ;;  %v4461_v40 = vor.u32 %v5457_v32, %v4460_v31  ;;  %v4604_v21 = vld [vmem:[#allocation20 + $0x400] sm:$0xf]  ;;  %v4149_v27 = vor.u32 %v5379_v20, %v4148_v19  ;;  %v5547_v32 = vld [vmem:[#allocation20 + $0x5c4] sm:$0xf0]  ;;  %v5649_v19 = vld [vmem:[#allocation20 + $0x8f4] sm:$0xf0] }
 0x2ec   :  { %3321 = vmatpush.bf16.msra.mxu3 %v4289_v43  ;;  %v5102_v43 = vld [vmem:[#allocation20 + $0x800] sm:$0xf0]  ;;  %v4364_v28 = vld [vmem:[#allocation20 + $0x220] sm:$0xf] }
 0x2ed   :  { %3354 = vmatpush.bf16.msrb.mxu2 %v5009_v35  ;;  %v4220_v35 = vld [vmem:[#allocation20 + $0x100] sm:$0xf]  ;;  %v5105_v56 = vor.u32 %v5615_v42, %v5102_v43 }
 0x2ee   :  { %3343 = vmatpush.bf16.msrb.mxu1 %v4769_v44  ;;  %3332 = vmatpush.bf16.msrb.mxu0 %v4529_v46  ;;  %v4221_v46 = vor.u32 %v5397_v37, %v4220_v35  ;;  %v4580_v35 = vld [vmem:[#allocation20 + $0x3d0] sm:$0xf]  ;;  %v5487_v37 = vld [vmem:[#allocation20 + $0x3e4] sm:$0xf0]  ;;  %v4508_v20 = vld [vmem:[#allocation20 + $0x340] sm:$0xf] }
 0x2ef   :  { %3322 = vmatmul.bf16.vlgmr.msra.gmra.mxu3 %v6177_v41 }
 0x2f0   :  { %3366 = vmatpush.bf16.msrb.mxu3 %v5225_v45  ;;  %v4889_v45 = vor.u32 %v5561_v33, %v4886_v34  ;;  %v4124_v33 = vld [vmem:[#allocation20 + $0x40] sm:$0xf]  ;;  %v5373_v34 = vld [vmem:[#allocation20 + $0x54] sm:$0xf0] }
 0x2f1   :  { %3355 = vmatpush.bf16.msrb.mxu2 %v4985_v48  ;;  %v4862_v48 = vld [vmem:[#allocation20 + $0x620] sm:$0xf0]  ;;  %v4125_v43 = vor.u32 %v5373_v34, %v4124_v33  ;;  %v5204_v34 = vld [vmem:[#allocation20 + $0x8b0] sm:$0xf] }
 0x2f2   :  { %3344 = vmatpush.bf16.msrb.mxu1 %v4745_v57  ;;  %3333 = vmatpush.bf16.msrb.mxu0 %v4505_v60  ;;  %v4437_v57 = vor.u32 %v5451_v51, %v4436_v50  ;;  %v4197_v60 = vor.u32 %v5391_v53, %v4196_v52  ;;  %v5541_v50 = vld [vmem:[#allocation20 + $0x594] sm:$0xf0]  ;;  %v4581_v51 = vor.u32 %v5487_v37, %v4580_v35  ;;  %v4556_v52 = vld [vmem:[#allocation20 + $0x3a0] sm:$0xf]  ;;  %v5643_v35 = vld [vmem:[#allocation20 + $0x8c4] sm:$0xf0] }
 0x2f3   :  { %v5481_v53 = vld [vmem:[#allocation20 + $0x3b4] sm:$0xf0]  ;;  %v4484_v37 = vld [vmem:[#allocation20 + $0x310] sm:$0xf] }
 0x2f4   :  { %3367 = vmatpush.bf16.msrb.mxu3 %v5201_v59  ;;  %v4865_v59 = vor.u32 %v5555_v47, %v4862_v48  ;;  %v4100_v47 = vld [vmem:[#allocation20 + $0x10] sm:$0xf]  ;;  %v5367_v48 = vld [vmem:[#allocation20 + $0x24] sm:$0xf0]  ;;  %v4557_v61 = vor.u32 %v5481_v53, %v4556_v52 }
 0x2f5   :  { %3356 = vmatpush.bf16.msrb.mxu2 %v4961_v0  ;;  %v6210_v44 = vpop.f32.mrf.mxu0  ;;  %v4653_v0 = vor.u32 %v5505_v55, %v4652_v54  ;;  %v5036_v54 = vld [vmem:[#allocation20 + $0x760] sm:$0xf]  ;;  %v5601_v55 = vld [vmem:[#allocation20 + $0x774] sm:$0xf0]  ;;  %v4101_v58 = vor.u32 %v5367_v48, %v4100_v47 }
 0x2f6   :  { %3345 = vmatpush.bf16.msrb.mxu1 %v4721_v7  ;;  %3334 = vmatpush.bf16.msrb.mxu0 %v4481_v10  ;;  %v4413_v7 = vor.u32 %v5445_v63, %v4412_v62  ;;  %v5054_v10 = vld [vmem:[#allocation20 + $0x7a0] sm:$0xf0]  ;;  %v5037_v62 = vor.u32 %v5601_v55, %v5036_v54  ;;  %v4772_v63 = vld [vmem:[#allocation20 + $0x550] sm:$0xf]  ;;  %v4700_v47 = vld [vmem:[#allocation20 + $0x4c0] sm:$0xf] }
 0x2f7   :  { %v5517_v55 = vld [vmem:[#allocation20 + $0x4d4] sm:$0xf0] }
 0x2f8   :  { %3368 = vmatpush.bf16.msrb.mxu3 %v5177_v8  ;;  %v5603_v8 = vld [vmem:[#allocation20 + $0x78c] sm:$0xf] }
 0x2f9   :  { %3357 = vmatpush.bf16.msrb.mxu2 %v4937_v13  ;;  %3335 = vmatmul.bf16.vlgmr.msrb.gmra.mxu0 %v6181_v9  ;;  %v4388_v13 = vld [vmem:[#allocation20 + $0x250] sm:$0xf]  ;;  %v5057_v23 = vor.u32 %v5603_v8, %v5054_v10 }
 0x2fa   :  { %3379 = vmatpush.bf16.msra.mxu0 %v4269_v14  ;;  %3346 = vmatpush.bf16.msrb.mxu1 %v4697_v22  ;;  %v5439_v14 = vld [vmem:[#allocation20 + $0x264] sm:$0xf0]  ;;  %v5493_v22 = vld [vmem:[#allocation20 + $0x414] sm:$0xf0]  ;;  %v4292_v10 = vld [vmem:[#allocation20 + $0x190] sm:$0xf] }
 0x2fb   :  { %v4605_v31 = vor.u32 %v5493_v22, %v4604_v21  ;;  %v5469_v21 = vld [vmem:[#allocation20 + $0x354] sm:$0xf0]  ;;  %v4988_v22 = vld [vmem:[#allocation20 + $0x700] sm:$0xf] }
 0x2fc   :  { %3369 = vmatpush.bf16.msrb.mxu3 %v5153_v24  ;;  %v6213_v4 = vpop.f32.mrf.mxu1  ;;  %v4389_v24 = vor.u32 %v5439_v14, %v4388_v13  ;;  %v4748_v13 = vld [vmem:[#allocation20 + $0x520] sm:$0xf]  ;;  %v5529_v14 = vld [vmem:[#allocation20 + $0x534] sm:$0xf0] }
 0x2fd   :  { %3358 = vmatpush.bf16.msrb.mxu2 %v4913_v29  ;;  %v3078_v11 = vpop.f32.mrf.mxu0  ;;  %v5433_v29 = vld [vmem:[#allocation20 + $0x234] sm:$0xf0] }
 0x2fe   :  { %3380 = vmatpush.bf16.msra.mxu0 %v4245_v30  ;;  %3347 = vmatpush.bf16.msrb.mxu1 %v4673_v38  ;;  %v4820_v30 = vld [vmem:[#allocation20 + $0x5b0] sm:$0xf] }
 0x2ff   :  { %v4821_v42 = vor.u32 %v5547_v32, %v4820_v30  ;;  %v5523_v30 = vld [vmem:[#allocation20 + $0x504] sm:$0xf0]  ;;  %v4509_v32 = vor.u32 %v5469_v21, %v4508_v20 }
 0x300   :  { %3370 = vmatpush.bf16.msrb.mxu3 %v5129_v39  ;;  %v4365_v39 = vor.u32 %v5433_v29, %v4364_v28  ;;  %v5229_v28 = vor.u32 %v5649_v19, %v5228_v18  ;;  %v4724_v29 = vld [vmem:[#allocation20 + $0x4f0] sm:$0xf]  ;;  %v5394_v18 = vld [vmem:[#allocation20 + $0x104] sm:$0xf]  ;;  %v4222_v19 = vld [vmem:[#allocation20 + $0x118] sm:$0xf0] }
 0x301   :  { %3359 = vmatpush.bf16.msrb.mxu2 %v4889_v45  ;;  %3348 = vmatmul.bf16.vlgmr.msrb.gmra.mxu1 %v6185_v36  ;;  %v5427_v45 = vld [vmem:[#allocation20 + $0x204] sm:$0xf0] }
 0x302   :  { %3392 = vmatpush.bf16.msra.mxu1 %v4461_v40  ;;  %3381 = vmatpush.bf16.msra.mxu0 %v4221_v46  ;;  %v4340_v40 = vld [vmem:[#allocation20 + $0x1f0] sm:$0xf]  ;;  %v4796_v46 = vld [vmem:[#allocation20 + $0x580] sm:$0xf] }
 0x304   :  { %3371 = vmatpush.bf16.msrb.mxu3 %v5105_v56  ;;  %v3091_v38 = vpop.f32.mrf.mxu1  ;;  %v4341_v56 = vor.u32 %v5427_v45, %v4340_v40  ;;  %v4964_v40 = vld [vmem:[#allocation20 + $0x6d0] sm:$0xf]  ;;  %v5406_v45 = vld [vmem:[#allocation20 + $0x164] sm:$0xf] }
 0x305   :  { %3360 = vmatpush.bf16.msrb.mxu2 %v4865_v59  ;;  %v4316_v59 = vld [vmem:[#allocation20 + $0x1c0] sm:$0xf] }
 0x306   :  { %3393 = vmatpush.bf16.msra.mxu1 %v4437_v57  ;;  %3382 = vmatpush.bf16.msra.mxu0 %v4197_v60  ;;  %v4797_v57 = vor.u32 %v5541_v50, %v4796_v46  ;;  %v5421_v60 = vld [vmem:[#allocation20 + $0x1d4] sm:$0xf0]  ;;  %v4270_v46 = vld [vmem:[#allocation20 + $0x178] sm:$0xf0]  ;;  %v4725_v50 = vor.u32 %v5523_v30, %v4724_v29  ;;  %v5448_v30 = vld [vmem:[#allocation20 + $0x2b4] sm:$0xf] }
 0x307   :  { %v4317_v8 = vor.u32 %v5421_v60, %v4316_v59  ;;  %v5577_v59 = vld [vmem:[#allocation20 + $0x6b4] sm:$0xf0] }
 0x308   :  { %3372 = vmatpush.bf16.msrb.mxu3 %v5081_v6  ;;  %3361 = vmatmul.bf16.vlgmr.msrb.gmra.mxu2 %v6189_v15  ;;  %v5595_v6 = vld [vmem:[#allocation20 + $0x744] sm:$0xf0]  ;;  %v5625_v29 = vld [vmem:[#allocation20 + $0x834] sm:$0xf0] }
 0x309   :  { %3405 = vmatpush.bf16.msra.mxu2 %v4653_v0  ;;  %v5535_v0 = vld [vmem:[#allocation20 + $0x564] sm:$0xf0] }
 0x30a   :  { %3394 = vmatpush.bf16.msra.mxu1 %v4413_v7  ;;  %3383 = vmatpush.bf16.msra.mxu0 %v4173_v12  ;;  %v6219_v7 = vld [vmem:[#allocation22] sm:$0x3f]  ;;  %v4773_v11 = vor.u32 %v5535_v0, %v4772_v63  ;;  %v5415_v12 = vld [vmem:[#allocation20 + $0x1a4] sm:$0xf0]  ;;  %v4676_v0 = vld [vmem:[#allocation20 + $0x490] sm:$0xf] }
 0x30b   :  { %v6217_v2 = vpop.f32.mrf.mxu2  ;;  %v4677_v21 = vor.u32 %v5511_v1, %v4676_v0 }
 0x30c   :  { %3373 = vmatpush.bf16.msrb.mxu3 %v5057_v23  ;;  %v5589_v23 = vld [vmem:[#allocation20 + $0x714] sm:$0xf0] }
 0x30d   :  { %3406 = vmatpush.bf16.msra.mxu2 %v4629_v17  ;;  %v5013_v17 = vor.u32 %v5595_v6, %v5012_v5  ;;  %v4989_v33 = vor.u32 %v5589_v23, %v4988_v22 }
 0x30e   :  { %3395 = vmatpush.bf16.msra.mxu1 %v4389_v24  ;;  %3384 = vmatpush.bf16.msra.mxu0 %v4149_v27  ;;  %v1615_v24 = vperm.slane %v6219_v7, 0  ;;  %v4749_v27 = vor.u32 %v5529_v14, %v4748_v13  ;;  %v4462_v13 = vld [vmem:[#allocation20 + $0x2f8] sm:$0xf0]  ;;  %v4916_v14 = vld [vmem:[#allocation20 + $0x670] sm:$0xf] }
 0x30f   :  { %3374 = vmatmul.bf16.vlgmr.msrb.gmra.mxu3 %v6193_v49 }
 0x310   :  { %3418 = vmatpush.bf16.msra.mxu3 %v4845_v26  ;;  %v4293_v26 = vor.u32 %v5415_v12, %v4292_v10  ;;  %v5631_v10 = vld [vmem:[#allocation20 + $0x864] sm:$0xf0] }
 0x311   :  { %3407 = vmatpush.bf16.msra.mxu2 %v4605_v31 }
 0x312   :  { %3396 = vmatpush.bf16.msra.mxu1 %v4365_v39  ;;  %3385 = vmatpush.bf16.msra.mxu0 %v4125_v43  ;;  %v3115_v31 = vpop.f32.mrf.mxu3  ;;  %v5463_v39 = vld [vmem:[#allocation20 + $0x324] sm:$0xf0]  ;;  %v3077_v43 = vadd.f32 %v6210_v44, %v1615_v24  ;;  %v4273_v44 = vor.u32 %v5406_v45, %v4270_v46 }
 0x313   :  { %v3104_v38 = vpop.f32.mrf.mxu2  ;;  %v4485_v53 = vor.u32 %v5463_v39, %v4484_v37  ;;  %v5388_v37 = vld [vmem:[#allocation20 + $0xd4] sm:$0xf] }
 0x314   :  { %3419 = vmatpush.bf16.msra.mxu3 %v4821_v42  ;;  %v5583_v42 = vld [vmem:[#allocation20 + $0x6e4] sm:$0xf0]  ;;  %v3090_v48 = vadd.f32 %v6213_v4, %v3077_v43  ;;  %v4701_v4 = vor.u32 %v5517_v55, %v4700_v47  ;;  %v4198_v38 = vld [vmem:[#allocation20 + $0xe8] sm:$0xf0]  ;;  %v1616_v43 = vperm.slane %v6219_v7, 1 }
 0x315   :  { %3408 = vmatpush.bf16.msra.mxu2 %v4581_v51  ;;  %v5205_v51 = vor.u32 %v5643_v35, %v5204_v34  ;;  %v4965_v54 = vor.u32 %v5583_v42, %v4964_v40  ;;  %v5565_v34 = vld [vmem:[#allocation20 + $0x654] sm:$0xf0]  ;;  %v5108_v40 = vld [vmem:[#allocation20 + $0x7f0] sm:$0xf]  ;;  %v5619_v42 = vld [vmem:[#allocation20 + $0x804] sm:$0xf0] }
 0x316   :  { %3397 = vmatpush.bf16.msra.mxu1 %v4341_v56  ;;  %3386 = vmatpush.bf16.msra.mxu0 %v4101_v58  ;;  %v3128_v52 = vpop.f32.mrf.mxu0  ;;  %v5180_v56 = vld [vmem:[#allocation20 + $0x880] sm:$0xf]  ;;  %v3103_v60 = vadd.f32 %v6217_v2, %v3090_v48  ;;  %v4414_v47 = vld [vmem:[#allocation20 + $0x298] sm:$0xf0]  ;;  %v5382_v55 = vld [vmem:[#allocation20 + $0xa4] sm:$0xf] }
 0x317   :  { %v4940_v58 = vld [vmem:[#allocation20 + $0x6a0] sm:$0xf] }
 0x318   :  { %3420 = vmatpush.bf16.msra.mxu3 %v4797_v57  ;;  %v5637_v57 = vld [vmem:[#allocation20 + $0x894] sm:$0xf0]  ;;  %v3116_v3 = vadd.f32 %v3115_v31, %v3103_v60  ;;  %v4941_v6 = vor.u32 %v5577_v59, %v4940_v58  ;;  %v4225_v31 = vor.u32 %v5394_v18, %v4222_v19  ;;  %v5109_v59 = vor.u32 %v5619_v42, %v5108_v40  ;;  %v5607_v19 = vld [vmem:[#allocation20 + $0x7a4] sm:$0xf0]  ;;  %v4342_v40 = vld [vmem:[#allocation20 + $0x208] sm:$0xf0] }
 0x319   :  { %3409 = vmatpush.bf16.msra.mxu2 %v4557_v61  ;;  %3387 = vmatmul.bf16.vlgmr.msra.gmra.mxu0 %v6173_v25  ;;  %v5400_v61 = vld [vmem:[#allocation20 + $0x134] sm:$0xf]  ;;  %v5181_v63 = vor.u32 %v5637_v57, %v5180_v56  ;;  %v4174_v56 = vld [vmem:[#allocation20 + $0xb8] sm:$0xf0]  ;;  %v5502_v57 = vld [vmem:[#allocation20 + $0x464] sm:$0xf] }
 0x31a   :  { %3431 = vmatpush.bf16.msrb.mxu0 %v5037_v62  ;;  %3398 = vmatpush.bf16.msra.mxu1 %v4317_v8  ;;  %v4246_v62 = vld [vmem:[#allocation20 + $0x148] sm:$0xf0]  ;;  %v3117_v5 = vpop.f32.mrf.mxu3  ;;  %v5156_v8 = vld [vmem:[#allocation20 + $0x850] sm:$0xf]  ;;  %v4177_v0 = vor.u32 %v5382_v55, %v4174_v56 }
 0x31b   :  { %v6227_v12 = vpop.f32.mrf.mxu2  ;;  %v4249_v2 = vor.u32 %v5400_v61, %v4246_v62  ;;  %v5157_v22 = vor.u32 %v5631_v10, %v5156_v8  ;;  %v4390_v5 = vld [vmem:[#allocation20 + $0x268] sm:$0xf0] }
 0x31c   :  { %3421 = vmatpush.bf16.msra.mxu3 %v4773_v11  ;;  %v5454_v11 = vld [vmem:[#allocation20 + $0x2e4] sm:$0xf]  ;;  %v3155_v8 = vadd.f32 %v6227_v12, %v1616_v43  ;;  %v4150_v10 = vld [vmem:[#allocation20 + $0x88] sm:$0xf0] }
 0x31d   :  { %3410 = vmatpush.bf16.msra.mxu2 %v4533_v16  ;;  %v5571_v16 = vld [vmem:[#allocation20 + $0x684] sm:$0xf0]  ;;  %v5550_v12 = vld [vmem:[#allocation20 + $0x5e4] sm:$0xf] }
 0x31e   :  { %3432 = vmatpush.bf16.msrb.mxu0 %v5013_v17  ;;  %3399 = vmatpush.bf16.msra.mxu1 %v4293_v26  ;;  %v3129_v17 = vadd.f32 %v3128_v52, %v3116_v3  ;;  %v3141_v20 = vpop.f32.mrf.mxu1  ;;  %v3130_v24 = vpop.f32.mrf.mxu0  ;;  %v4465_v26 = vor.u32 %v5454_v11, %v4462_v13  ;;  %v4201_v52 = vor.u32 %v5388_v37, %v4198_v38  ;;  %v5436_v3 = vld [vmem:[#allocation20 + $0x254] sm:$0xf] }
 0x31f   :  { %v5496_v11 = vld [vmem:[#allocation20 + $0x434] sm:$0xf]  ;;  %v4393_v18 = vor.u32 %v5436_v3, %v4390_v5  ;;  %v4558_v3 = vld [vmem:[#allocation20 + $0x3b8] sm:$0xf0] }
 0x320   :  { %3422 = vmatpush.bf16.msra.mxu3 %v4749_v27  ;;  %v3142_v23 = vadd.f32 %v3141_v20, %v3129_v17  ;;  %v4917_v27 = vor.u32 %v5571_v16, %v4916_v14  ;;  %v5060_v14 = vld [vmem:[#allocation20 + $0x790] sm:$0xf]  ;;  %v5430_v20 = vld [vmem:[#allocation20 + $0x224] sm:$0xf] }
 0x321   :  { %3411 = vmatpush.bf16.msra.mxu2 %v4509_v32  ;;  %3400 = vmatmul.bf16.vlgmr.msra.gmra.mxu1 %v6177_v41  ;;  %v4438_v32 = vld [vmem:[#allocation20 + $0x2c8] sm:$0xf0] }
 0x322   :  { %3444 = vmatpush.bf16.msrb.mxu1 %v5229_v28  ;;  %3433 = vmatpush.bf16.msrb.mxu0 %v4989_v33  ;;  %v5132_v28 = vld [vmem:[#allocation20 + $0x820] sm:$0xf]  ;;  %v3535_v35 = vmax.f32 %v3142_v23, 0.0  ;;  %v3167_v45 = vpop.f32.mrf.mxu3  ;;  %v4441_v46 = vor.u32 %v5448_v30, %v4438_v32  ;;  %v5490_v30 = vld [vmem:[#allocation20 + $0x404] sm:$0xf] }
 0x323   :  { %v4892_v33 = vld [vmem:[#allocation20 + $0x640] sm:$0xf]  ;;  %v5133_v39 = vor.u32 %v5625_v29, %v5132_v28  ;;  %v3156_v48 = vpop.f32.mrf.mxu2  ;;  %v3168_v16 = vadd.f32 %v3167_v45, %v3155_v8  ;;  %v4126_v29 = vld [vmem:[#allocation20 + $0x58] sm:$0xf0]  ;;  %v5544_v45 = vld [vmem:[#allocation20 + $0x5b4] sm:$0xf] }
 0x324   :  { %3423 = vmatpush.bf16.msra.mxu3 %v4725_v50  ;;  %3541 = vst [vmem:[#allocation23] sm:$0xff] %v3535_v35  ;;  %v4893_v50 = vor.u32 %v5565_v34, %v4892_v33  ;;  %v5061_v33 = vor.u32 %v5607_v19, %v5060_v14  ;;  %v4582_v48 = vld [vmem:[#allocation20 + $0x3e8] sm:$0xf0]  ;;  %v5592_v8 = vld [vmem:[#allocation20 + $0x734] sm:$0xf] }
 0x325   :  { %3412 = vmatpush.bf16.msra.mxu2 %v4485_v53  ;;  %v4868_v53 = vld [vmem:[#allocation20 + $0x610] sm:$0xf]  ;;  %v4294_v14 = vld [vmem:[#allocation20 + $0x1a8] sm:$0xf0] }
 0x326   :  { %3445 = vmatpush.bf16.msrb.mxu1 %v5205_v51  ;;  %3434 = vmatpush.bf16.msrb.mxu0 %v4965_v54  ;;  %v5442_v51 = vld [vmem:[#allocation20 + $0x284] sm:$0xf]  ;;  %v5559_v54 = vld [vmem:[#allocation20 + $0x624] sm:$0xf0]  ;;  %v3143_v58 = vpop.f32.mrf.mxu1  ;;  %v3180_v60 = vpop.f32.mrf.mxu0  ;;  %v4774_v19 = vld [vmem:[#allocation20 + $0x568] sm:$0xf0] }
 0x327   :  { %v4417_v61 = vor.u32 %v5442_v51, %v4414_v47  ;;  %v4869_v62 = vor.u32 %v5559_v54, %v4868_v53  ;;  %v3181_v28 = vadd.f32 %v3180_v60, %v3168_v16  ;;  %v4102_v51 = vld [vmem:[#allocation20 + $0x28] sm:$0xf0]  ;;  %v5484_v47 = vld [vmem:[#allocation20 + $0x3d4] sm:$0xf]  ;;  %v5598_v53 = vld [vmem:[#allocation20 + $0x764] sm:$0xf] }
 0x328   :  { %3424 = vmatpush.bf16.msra.mxu3 %v4701_v4  ;;  %3413 = vmatmul.bf16.vlgmr.msra.gmra.mxu2 %v6181_v9  ;;  %v5084_v4 = vld [vmem:[#allocation20 + $0x7c0] sm:$0xf]  ;;  %v5038_v54 = vld [vmem:[#allocation20 + $0x778] sm:$0xf0]  ;;  %v5532_v16 = vld [vmem:[#allocation20 + $0x554] sm:$0xf] }
 0x329   :  { %3457 = vmatpush.bf16.msrb.mxu2 %v4273_v44  ;;  %v4654_v44 = vld [vmem:[#allocation20 + $0x478] sm:$0xf0] }
 0x32a   :  { %3446 = vmatpush.bf16.msrb.mxu1 %v5181_v63  ;;  %3435 = vmatpush.bf16.msrb.mxu0 %v4941_v6  ;;  %v5613_v63 = vld [vmem:[#allocation20 + $0x7d4] sm:$0xf0]  ;;  %v4657_v1 = vor.u32 %v5502_v57, %v4654_v44  ;;  %v5376_v6 = vld [vmem:[#allocation20 + $0x74] sm:$0xf]  ;;  %v3169_v17 = vpop.f32.mrf.mxu3  ;;  %v5418_v44 = vld [vmem:[#allocation20 + $0x1c4] sm:$0xf] }
 0x32b   :  { %v5085_v13 = vor.u32 %v5613_v63, %v5084_v4  ;;  %v4153_v23 = vor.u32 %v5376_v6, %v4150_v10  ;;  %v5538_v4 = vld [vmem:[#allocation20 + $0x584] sm:$0xf]  ;;  %v4798_v63 = vld [vmem:[#allocation20 + $0x598] sm:$0xf0]  ;;  %v5014_v10 = vld [vmem:[#allocation20 + $0x748] sm:$0xf0] }
 0x32c   :  { %3425 = vmatpush.bf16.msra.mxu3 %v4677_v21  ;;  %v4366_v21 = vld [vmem:[#allocation20 + $0x238] sm:$0xf0] }
 0x32d   :  { %3458 = vmatpush.bf16.msrb.mxu2 %v4249_v2  ;;  %v4630_v2 = vld [vmem:[#allocation20 + $0x448] sm:$0xf0]  ;;  %v4369_v37 = vor.u32 %v5430_v20, %v4366_v21  ;;  %v5646_v20 = vld [vmem:[#allocation20 + $0x8e4] sm:$0xf]  ;;  %v5017_v21 = vor.u32 %v5592_v8, %v5014_v10 }
 0x32e   :  { %3447 = vmatpush.bf16.msrb.mxu1 %v5157_v22  ;;  %3436 = vmatpush.bf16.msrb.mxu0 %v4917_v27  ;;  %v3206_v22 = vpop.f32.mrf.mxu2  ;;  %v4633_v24 = vor.u32 %v5496_v11, %v4630_v2  ;;  %v5370_v27 = vld [vmem:[#allocation20 + $0x44] sm:$0xf]  ;;  %v3193_v32 = vpop.f32.mrf.mxu1  ;;  %v4801_v2 = vor.u32 %v5538_v4, %v4798_v63  ;;  %v5628_v4 = vld [vmem:[#allocation20 + $0x854] sm:$0xf]  ;;  %v5158_v63 = vld [vmem:[#allocation20 + $0x868] sm:$0xf0] }
 0x32f   :  { %3426 = vmatmul.bf16.vlgmr.msra.gmra.mxu3 %v6185_v36  ;;  %v3194_v34 = vadd.f32 %v3193_v32, %v3181_v28  ;;  %v3182_v35 = vpop.f32.mrf.mxu0  ;;  %v4129_v42 = vor.u32 %v5370_v27, %v4126_v29  ;;  %v4777_v29 = vor.u32 %v5532_v16, %v4774_v19  ;;  %v5526_v32 = vld [vmem:[#allocation20 + $0x524] sm:$0xf]  ;;  %v4678_v8 = vld [vmem:[#allocation20 + $0x4a8] sm:$0xf0]  ;;  %v4894_v16 = vld [vmem:[#allocation20 + $0x658] sm:$0xf0] }
 0x330   :  { %3470 = vmatpush.bf16.msrb.mxu3 %v4465_v26  ;;  %v4846_v26 = vld [vmem:[#allocation20 + $0x5f8] sm:$0xf0] }
 0x331   :  { %3459 = vmatpush.bf16.msrb.mxu2 %v4225_v31  ;;  %v4606_v31 = vld [vmem:[#allocation20 + $0x418] sm:$0xf0]  ;;  %v4849_v38 = vor.u32 %v5550_v12, %v4846_v26  ;;  %v5586_v12 = vld [vmem:[#allocation20 + $0x704] sm:$0xf] }
 0x332   :  { %3448 = vmatpush.bf16.msrb.mxu1 %v5133_v39  ;;  %3437 = vmatpush.bf16.msrb.mxu0 %v4893_v50  ;;  %v5424_v39 = vld [vmem:[#allocation20 + $0x1f4] sm:$0xf]  ;;  %v4609_v43 = vor.u32 %v5490_v30, %v4606_v31  ;;  %v3219_v55 = vpop.f32.mrf.mxu3  ;;  %v4990_v26 = vld [vmem:[#allocation20 + $0x718] sm:$0xf0] }
 0x333   :  { %v5364_v50 = vld [vmem:[#allocation20 + $0x14] sm:$0xf]  ;;  %v4345_v56 = vor.u32 %v5424_v39, %v4342_v40  ;;  %v4993_v35 = vor.u32 %v5586_v12, %v4990_v26  ;;  %v4510_v39 = vld [vmem:[#allocation20 + $0x358] sm:$0xf0]  ;;  %v4870_v12 = vld [vmem:[#allocation20 + $0x628] sm:$0xf0] }
 0x334   :  { %3471 = vmatpush.bf16.msrb.mxu3 %v4441_v46  ;;  %v4822_v46 = vld [vmem:[#allocation20 + $0x5c8] sm:$0xf0]  ;;  %v4105_v60 = vor.u32 %v5364_v50, %v4102_v51  ;;  %v5520_v51 = vld [vmem:[#allocation20 + $0x4f4] sm:$0xf] }
 0x335   :  { %3460 = vmatpush.bf16.msrb.mxu2 %v4201_v52  ;;  %v3207_v52 = vadd.f32 %v3206_v22, %v3194_v34  ;;  %v4825_v57 = vor.u32 %v5544_v45, %v4822_v46  ;;  %v5230_v22 = vld [vmem:[#allocation20 + $0x8f8] sm:$0xf0]  ;;  %v5640_v34 = vld [vmem:[#allocation20 + $0x8b4] sm:$0xf] }
 0x336   :  { %3449 = vmatpush.bf16.msrb.mxu1 %v5109_v59  ;;  %3438 = vmatpush.bf16.msrb.mxu0 %v4869_v62  ;;  %v3208_v59 = vpop.f32.mrf.mxu2  ;;  %v4318_v62 = vld [vmem:[#allocation20 + $0x1d8] sm:$0xf0]  ;;  %v3195_v6 = vpop.f32.mrf.mxu1  ;;  %v5233_v30 = vor.u32 %v5646_v20, %v5230_v22  ;;  %v5110_v22 = vld [vmem:[#allocation20 + $0x808] sm:$0xf0] }
 0x337   :  { %v3220_v58 = vadd.f32 %v3219_v55, %v3207_v52  ;;  %v4321_v11 = vor.u32 %v5418_v44, %v4318_v62  ;;  %v6235_v17 = vpop.f32.mrf.mxu0  ;;  %v4486_v55 = vld [vmem:[#allocation20 + $0x328] sm:$0xf0]  ;;  %v5508_v6 = vld [vmem:[#allocation20 + $0x494] sm:$0xf] }
 0x338   :  { %3472 = vmatpush.bf16.msrb.mxu3 %v4417_v61  ;;  %v4585_v61 = vor.u32 %v5484_v47, %v4582_v48  ;;  %v4726_v47 = vld [vmem:[#allocation20 + $0x508] sm:$0xf0]  ;;  %v5634_v48 = vld [vmem:[#allocation20 + $0x884] sm:$0xf] }
 0x339   :  { %3461 = vmatpush.bf16.msrb.mxu2 %v4177_v0  ;;  %3439 = vmatmul.bf16.vlgmr.msrb.gmra.mxu0 %v6189_v15  ;;  %v5041_v0 = vor.u32 %v5598_v53, %v5038_v54  ;;  %v3536_v5 = vmax.f32 %v3220_v58, 0.0  ;;  %v5182_v53 = vld [vmem:[#allocation20 + $0x898] sm:$0xf0]  ;;  %v5460_v54 = vld [vmem:[#allocation20 + $0x314] sm:$0xf]  ;;  %v4729_v44 = vor.u32 %v5520_v51, %v4726_v47 }
 0x33a   :  { %3483 = vmatpush.bf16.msra.mxu0 %v4657_v1  ;;  %3450 = vmatpush.bf16.msrb.mxu1 %v5085_v13  ;;  %v5478_v1 = vld [vmem:[#allocation20 + $0x3a4] sm:$0xf]  ;;  %v5412_v13 = vld [vmem:[#allocation20 + $0x194] sm:$0xf]  ;;  %v3221_v27 = vpop.f32.mrf.mxu3  ;;  %v5185_v58 = vor.u32 %v5634_v48, %v5182_v53  ;;  %v4489_v59 = vor.u32 %v5460_v54, %v4486_v55 }
 0x33b   :  { %3542 = vst [vmem:[#allocation23 + $0x8] sm:$0xff] %v3536_v5  ;;  %v4297_v28 = vor.u32 %v5412_v13, %v4294_v14  ;;  %v5134_v13 = vld [vmem:[#allocation20 + $0x838] sm:$0xf0]  ;;  %v5562_v14 = vld [vmem:[#allocation20 + $0x644] sm:$0xf] }
 0x33c   :  { %3473 = vmatpush.bf16.msrb.mxu3 %v4393_v18  ;;  %v4561_v18 = vor.u32 %v5478_v1, %v4558_v3  ;;  %v5568_v1 = vld [vmem:[#allocation20 + $0x674] sm:$0xf]  ;;  %v4918_v3 = vld [vmem:[#allocation20 + $0x688] sm:$0xf0]  ;;  %v4897_v20 = vor.u32 %v5562_v14, %v4894_v16 }
 0x33d   :  { %3462 = vmatpush.bf16.msrb.mxu2 %v4153_v23  ;;  %v5472_v23 = vld [vmem:[#allocation20 + $0x374] sm:$0xf] }
 0x33e   :  { %3484 = vmatpush.bf16.msra.mxu0 %v4633_v24  ;;  %3451 = vmatpush.bf16.msrb.mxu1 %v5061_v33  ;;  %v4534_v24 = vld [vmem:[#allocation20 + $0x388] sm:$0xf0]  ;;  %v4750_v33 = vld [vmem:[#allocation20 + $0x538] sm:$0xf0]  ;;  %v6238_v40 = vpop.f32.mrf.mxu1 }
 0x33f   :  { %v4537_v31 = vor.u32 %v5472_v23, %v4534_v24  ;;  %v4753_v45 = vor.u32 %v5526_v32, %v4750_v33  ;;  %v1617_v23 = vperm.slane %v6219_v7, 2  ;;  %v5556_v24 = vld [vmem:[#allocation20 + $0x614] sm:$0xf] }
 0x340   :  { %3474 = vmatpush.bf16.msrb.mxu3 %v4369_v37  ;;  %v5206_v37 = vld [vmem:[#allocation20 + $0x8c8] sm:$0xf0] }
 0x341   :  { %3463 = vmatpush.bf16.msrb.mxu2 %v4129_v42  ;;  %3452 = vmatmul.bf16.vlgmr.msrb.gmra.mxu1 %v6193_v49  ;;  %v5580_v42 = vld [vmem:[#allocation20 + $0x6d4] sm:$0xf]  ;;  %v5209_v46 = vor.u32 %v5640_v34, %v5206_v37  ;;  %v5062_v37 = vld [vmem:[#allocation20 + $0x7a8] sm:$0xf0] }
 0x342   :  { %3496 = vmatpush.bf16.msra.mxu1 %v4849_v38  ;;  %3485 = vmatpush.bf16.msra.mxu0 %v4609_v43  ;;  %v5466_v38 = vld [vmem:[#allocation20 + $0x344] sm:$0xf]  ;;  %v4966_v43 = vld [vmem:[#allocation20 + $0x6e8] sm:$0xf0] }
 0x343   :  { %v4513_v50 = vor.u32 %v5466_v38, %v4510_v39  ;;  %v4969_v52 = vor.u32 %v5580_v42, %v4966_v43 }
 0x344   :  { %3475 = vmatpush.bf16.msrb.mxu3 %v4345_v56  ;;  %v5574_v56 = vld [vmem:[#allocation20 + $0x6a4] sm:$0xf] }
 0x345   :  { %3464 = vmatpush.bf16.msrb.mxu2 %v4105_v60  ;;  %v5514_v60 = vld [vmem:[#allocation20 + $0x4c4] sm:$0xf] }
 0x346   :  { %3497 = vmatpush.bf16.msra.mxu1 %v4825_v57  ;;  %3486 = vmatpush.bf16.msra.mxu0 %v4585_v61  ;;  %v4942_v57 = vld [vmem:[#allocation20 + $0x6b8] sm:$0xf0] }
 0x347   :  { %v4702_v61 = vld [vmem:[#allocation20 + $0x4d8] sm:$0xf0]  ;;  %v4945_v62 = vor.u32 %v5574_v56, %v4942_v57 }
 0x348   :  { %3476 = vmatpush.bf16.msrb.mxu3 %v4321_v11  ;;  %3465 = vmatmul.bf16.vlgmr.msrb.gmra.mxu2 %v6173_v25  ;;  %v3234_v25 = vpop.f32.mrf.mxu0  ;;  %v4705_v5 = vor.u32 %v5514_v60, %v4702_v61  ;;  %v4921_v11 = vor.u32 %v5568_v1, %v4918_v3 }
 0x349   :  { %3509 = vmatpush.bf16.msra.mxu2 %v5041_v0  ;;  %v3247_v0 = vpop.f32.mrf.mxu1 }
 0x34a   :  { %3498 = vmatpush.bf16.msra.mxu1 %v4801_v2  ;;  %3487 = vmatpush.bf16.msra.mxu0 %v4561_v18  ;;  %v5622_v2 = vld [vmem:[#allocation20 + $0x824] sm:$0xf]  ;;  %v4681_v18 = vor.u32 %v5508_v6, %v4678_v8  ;;  %v1619_v6 = vperm.slane %v6219_v7, 4 }
 0x34b   :  { %v3258_v10 = vpop.f32.mrf.mxu2  ;;  %v5137_v19 = vor.u32 %v5622_v2, %v5134_v13 }
 0x34c   :  { %3477 = vmatpush.bf16.msrb.mxu3 %v4297_v28 }
 0x34d   :  { %3510 = vmatpush.bf16.msra.mxu2 %v5017_v21  ;;  %v5616_v21 = vld [vmem:[#allocation20 + $0x7f4] sm:$0xf] }
 0x34e   :  { %3499 = vmatpush.bf16.msra.mxu1 %v4777_v29  ;;  %3488 = vmatpush.bf16.msra.mxu0 %v4537_v31  ;;  %v5113_v27 = vor.u32 %v5616_v21, %v5110_v22  ;;  %v4873_v29 = vor.u32 %v5556_v24, %v4870_v12  ;;  %v3233_v31 = vadd.f32 %v6235_v17, %v1617_v23 }
 0x34f   :  { %3478 = vmatmul.bf16.vlgmr.msrb.gmra.mxu3 %v6177_v41  ;;  %v5161_v41 = vor.u32 %v5628_v4, %v5158_v63 }
 0x350   :  { %3522 = vmatpush.bf16.msra.mxu3 %v5233_v30  ;;  %v5610_v30 = vld [vmem:[#allocation20 + $0x7c4] sm:$0xf]  ;;  %v3246_v32 = vadd.f32 %v6238_v40, %v3233_v31  ;;  %v1620_v31 = vperm.slane %v6219_v7, 5 }
 0x351   :  { %3511 = vmatpush.bf16.msra.mxu2 %v4993_v35  ;;  %v5604_v35 = vld [vmem:[#allocation20 + $0x794] sm:$0xf] }
 0x352   :  { %3500 = vmatpush.bf16.msra.mxu1 %v4753_v45  ;;  %3489 = vmatpush.bf16.msra.mxu0 %v4513_v50  ;;  %v3271_v26 = vpop.f32.mrf.mxu3  ;;  %v3259_v38 = vadd.f32 %v3258_v10, %v3246_v32  ;;  %v5065_v43 = vor.u32 %v5604_v35, %v5062_v37 }
 0x353   :  { %v3260_v28 = vpop.f32.mrf.mxu2 }
 0x354   :  { %3523 = vmatpush.bf16.msra.mxu3 %v5209_v46  ;;  %v3272_v39 = vadd.f32 %v3271_v26, %v3259_v38 }
 0x355   :  { %3512 = vmatpush.bf16.msra.mxu2 %v4969_v52 }
 0x356   :  { %3501 = vmatpush.bf16.msra.mxu1 %v4729_v44  ;;  %3490 = vmatpush.bf16.msra.mxu0 %v4489_v59  ;;  %v3284_v33 = vpop.f32.mrf.mxu0 }
 0x357   :  { %v3285_v45 = vadd.f32 %v3284_v33, %v3272_v39 }
 0x358   :  { %3524 = vmatpush.bf16.msra.mxu3 %v5185_v58 }
 0x359   :  { %3513 = vmatpush.bf16.msra.mxu2 %v4945_v62  ;;  %3491 = vmatmul.bf16.vlgmr.msra.gmra.mxu0 %v6181_v9  ;;  %v5086_v9 = vld [vmem:[#allocation20 + $0x7d8] sm:$0xf0] }
 0x35a   :  { %3502 = vmatpush.bf16.msra.mxu1 %v4705_v5  ;;  %v5089_v34 = vor.u32 %v5610_v30, %v5086_v9  ;;  %v3273_v42 = vpop.f32.mrf.mxu3 }
 0x35c   :  { %3525 = vmatpush.bf16.msra.mxu3 %v5161_v41 }
 0x35d   :  { %3514 = vmatpush.bf16.msra.mxu2 %v4921_v11 }
 0x35e   :  { %3503 = vmatpush.bf16.msra.mxu1 %v4681_v18  ;;  %v3297_v25 = vpop.f32.mrf.mxu1 }
 0x35f   :  { %v3298_v17 = vadd.f32 %v3297_v25, %v3285_v45 }
 0x360   :  { %3526 = vmatpush.bf16.msra.mxu3 %v5137_v19 }
 0x361   :  { %3515 = vmatpush.bf16.msra.mxu2 %v4897_v20  ;;  %3504 = vmatmul.bf16.vlgmr.msra.gmra.mxu1 %v6185_v36  ;;  %v3286_v36 = vpop.f32.mrf.mxu0  ;;  %v3537_v46 = vmax.f32 %v3298_v17, 0.0 }
 0x363   :  { %3543 = vst [vmem:[#allocation23 + $0x10] sm:$0xff] %v3537_v46 }
 0x364   :  { %3527 = vmatpush.bf16.msra.mxu3 %v5113_v27 }
 0x365   :  { %3516 = vmatpush.bf16.msra.mxu2 %v4873_v29 }
 0x366   :  { %v3299_v40 = vpop.f32.mrf.mxu1 }
 0x368   :  { %3528 = vmatpush.bf16.msra.mxu3 %v5089_v34  ;;  %3517 = vmatmul.bf16.vlgmr.msra.gmra.mxu2 %v6189_v15  ;;  %v1618_v15 = vperm.slane %v6219_v7, 3 }
 0x36b   :  { %v3310_v50 = vpop.f32.mrf.mxu2 }
 0x36c   :  { %3529 = vmatpush.bf16.msra.mxu3 %v5065_v43  ;;  %v3311_v56 = vadd.f32 %v3310_v50, %v1618_v15 }
 0x36f   :  { %3530 = vmatmul.bf16.vlgmr.msra.gmra.mxu3 %v6193_v49 }
 0x372   :  { %v3323_v51 = vpop.f32.mrf.mxu3 }
 0x373   :  { %v3312_v47 = vpop.f32.mrf.mxu2  ;;  %v3324_v57 = vadd.f32 %v3323_v51, %v3311_v56 }
 0x376   :  { %v3336_v48 = vpop.f32.mrf.mxu0 }
 0x377   :  { %v3337_v58 = vadd.f32 %v3336_v48, %v3324_v57 }
 0x37a   :  { %v3325_v52 = vpop.f32.mrf.mxu3 }
 0x37e   :  { %v3349_v53 = vpop.f32.mrf.mxu1  ;;  %v3338_v54 = vpop.f32.mrf.mxu0 }
 0x37f   :  { %v3350_v59 = vadd.f32 %v3349_v53, %v3337_v58 }
 0x386   :  { %v3351_v55 = vpop.f32.mrf.mxu1 }
 0x38b   :  { %v3362_v44 = vpop.f32.mrf.mxu2 }
 0x38c   :  { %v3363_v60 = vadd.f32 %v3362_v44, %v3350_v59 }
 0x392   :  { %v3375_v61 = vpop.f32.mrf.mxu3 }
 0x393   :  { %v3376_v49 = vadd.f32 %v3375_v61, %v3363_v60  ;;  %v3364_v62 = vpop.f32.mrf.mxu2 }
 0x395   :  { %v3538_v4 = vmax.f32 %v3376_v49, 0.0 }
 0x396   :  { %v3388_v63 = vpop.f32.mrf.mxu0 }
 0x397   :  { %3544 = vst [vmem:[#allocation23 + $0x18] sm:$0xff] %v3538_v4  ;;  %v3389_v10 = vadd.f32 %v3388_v63, %v1619_v6 }
 0x39a   :  { %v3377_v0 = vpop.f32.mrf.mxu3 }
 0x39e   :  { %v3401_v1 = vpop.f32.mrf.mxu1  ;;  %v3390_v3 = vpop.f32.mrf.mxu0 }
 0x39f   :  { %v3402_v2 = vadd.f32 %v3401_v1, %v3389_v10 }
 0x3a6   :  { %v3403_v5 = vpop.f32.mrf.mxu1 }
 0x3ab   :  { %v3414_v41 = vpop.f32.mrf.mxu2 }
 0x3ac   :  { %v3415_v14 = vadd.f32 %v3414_v41, %v3402_v2 }
 0x3b2   :  { %v3427_v8 = vpop.f32.mrf.mxu3 }
 0x3b3   :  { %v3416_v11 = vpop.f32.mrf.mxu2  ;;  %v3428_v16 = vadd.f32 %v3427_v8, %v3415_v14 }
 0x3b6   :  { %v3440_v13 = vpop.f32.mrf.mxu0 }
 0x3b7   :  { %v3441_v19 = vadd.f32 %v3440_v13, %v3428_v16 }
 0x3ba   :  { %v3429_v18 = vpop.f32.mrf.mxu3 }
 0x3be   :  { %v3453_v20 = vpop.f32.mrf.mxu1  ;;  %v3442_v22 = vpop.f32.mrf.mxu0 }
 0x3bf   :  { %v3454_v21 = vadd.f32 %v3453_v20, %v3441_v19 }
 0x3c1   :  { %v3539_v23 = vmax.f32 %v3454_v21, 0.0 }
 0x3c3   :  { %3545 = vst [vmem:[#allocation23 + $0x20] sm:$0xff] %v3539_v23 }
 0x3c6   :  { %v3455_v24 = vpop.f32.mrf.mxu1 }
 0x3cb   :  { %v3466_v12 = vpop.f32.mrf.mxu2 }
 0x3cc   :  { %v3467_v33 = vadd.f32 %v3466_v12, %v1620_v31 }
 0x3d2   :  { %v3479_v26 = vpop.f32.mrf.mxu3 }
 0x3d3   :  { %v3468_v27 = vpop.f32.mrf.mxu2  ;;  %v3480_v34 = vadd.f32 %v3479_v26, %v3467_v33 }
 0x3d6   :  { %v3492_v28 = vpop.f32.mrf.mxu0 }
 0x3d7   :  { %v3493_v37 = vadd.f32 %v3492_v28, %v3480_v34 }
 0x3da   :  { %v3481_v29 = vpop.f32.mrf.mxu3 }
 0x3de   :  { %v3505_v30 = vpop.f32.mrf.mxu1  ;;  %v3494_v9 = vpop.f32.mrf.mxu0 }
 0x3df   :  { %v3506_v38 = vadd.f32 %v3505_v30, %v3493_v37 }
 0x3e6   :  { %v3507_v32 = vpop.f32.mrf.mxu1 }
 0x3eb   :  { %v3518_v35 = vpop.f32.mrf.mxu2 }
 0x3ec   :  { %v3519_v39 = vadd.f32 %v3518_v35, %v3506_v38 }
 0x3f2   :  { %v3531_v42 = vpop.f32.mrf.mxu3 }
 0x3f3   :  { %v3532_v43 = vadd.f32 %v3531_v42, %v3519_v39  ;;  %v3520_v45 = vpop.f32.mrf.mxu2 }
 0x3f5   :  { %v3540_v25 = vmax.f32 %v3532_v43, 0.0 }
 0x3f7   :  { %3546 = vst [vmem:[#allocation23 + $0x28] sm:$0xff] %v3540_v25 }
 0x3f8   :  { %3557 = dma.vmem_to_hbm [thread:$0]  %s3553_s12, 768, %s3555_s27, [#allocation4]  }
 0x3fa   :  { %v3533_v7 = vpop.f32.mrf.mxu3 }
 0x3fb   :  { %6022 = dma.done.wait [#allocation4], 768  }
 0x3fc   :  { %6023 = vsyncadd [#allocation4], 4294966528 }
 0x3fd   :  { %3562 = vsyncpa [#allocation3], 1 }
 0x3fe   :  { %3563 = vsyncpa [#allocation6], 1 }
 0x3ff   :  { %3564 = vsyncpa [#allocation9], 1 }
 0x400   :  { %3565 = vsyncpa [#allocation12], 1 }
 0x401   :  { %3566 = vsyncpa [#allocation15], 1 }
 0x402   :  { %3567 = vsyncpa [#allocation18], 1 }
 0x403   :  { %3568 = vsyncpa [#allocation21], 1 }
 0x404   :  { %3569 = vsyncpa [#allocation4], 1 }

</bundles_post_ra>
